<compile_context>
chip_gen: v5e
topology: v5e:2x2
jax: 0.10.0
libtpu: 0.0.40
codegen_flags: <defaults>
</compile_context>

<pallas_src>
import jax
import jax.numpy as jnp
import numpy as np
from jax.experimental import pallas as pl
from jax.experimental.pallas import tpu as pltpu


def _aux_head_kernel(x_ref, wpc_ref, b1_ref, w2_ref, b2_ref, wl_ref, bl_ref,
                     out_ref):
    # x_ref: (TN, C*HW) bf16, lane-dense.
    x = jnp.maximum(x_ref[...], 0)                                    # ReLU (bf16)

    # Fused AvgPool(5)/25 + Conv1x1 + BN1-scale: one MXU pass -> (TN, 4*128).
    y = jnp.dot(x, wpc_ref[...], preferred_element_type=jnp.float32)
    y = jnp.maximum(y + b1_ref[...], 0.0)                             # BN1 bias + ReLU

    # Conv2x2 (valid conv on the 2x2 pooled map) with BN2-scale folded into w2:
    # one (TN, 512) @ (512, 768) matmul; rows of w2 are ordered (kh, kw, ci),
    # matching the position-major column layout p*128+ci of `y`.
    h = jnp.dot(y.astype(jnp.bfloat16), w2_ref[...],
                preferred_element_type=jnp.float32)
    h = jnp.maximum(h + b2_ref[...], 0.0)                              # BN2 bias + ReLU

    # Classifier, lane-padded to 128*k output columns (unmasked lane-dense vst).
    out_ref[...] = (jnp.dot(h.astype(jnp.bfloat16), wl_ref[...],
                            preferred_element_type=jnp.float32)
                    + bl_ref[...]).astype(out_ref.dtype)


def _pool_matrix(input_size):
    """0/1 window-membership matrix (H*W, 4) for AvgPool2d(5, stride=size-5)."""
    stride = input_size - 5
    offs = (0, stride)
    hw = input_size * input_size
    pm = np.zeros((hw, 4), np.float32)
    for p, (oh, ow) in enumerate([(a, b) for a in offs for b in offs]):
        for dh in range(5):
            for dw in range(5):
                pm[(oh + dh) * input_size + (ow + dw), p] = 1.0
    return jnp.asarray(pm)


def _pick_tn(n, chw):
    """Batch tile: sublane-aligned, >=2 grid steps for n > 8 (v7x megacore),
    capped so the double-buffered bf16 x block stays <= ~16 MiB (v7x budget)."""
    if n <= 8:
        return n                                     # block == full batch extent
    tn = ((-(-n // 2)) + 7) // 8 * 8                 # ~ceil(n/2), multiple of 8
    tn = min(tn, 256)                                # fills the 256-wide MXU (v6e/v7x)
    cap = max(8, ((16 << 20) // (4 * chw)) // 8 * 8)
    return min(tn, cap)


def auxiliary_head_forward(x_nchw, params, *, input_size, n_classes):
    assert input_size in (7, 8)
    n, c, hh, ww = x_nchw.shape
    assert hh == input_size and ww == input_size
    hw = hh * ww
    chw = c * hw

    # Lane-dense bf16 input block (free reshape from NCHW; halves HBM traffic).
    x2 = x_nchw.reshape(n, chw).astype(jnp.bfloat16)

    # ---- Fold everything foldable into the matmul weights (f32 math, bf16 cast) ----
    pm = _pool_matrix(input_size)                                     # (HW, 4), 0/1
    s1 = params["bn1_scale"].reshape(1, 128)
    w1s = params["w1"] * (s1 / 25.0)                                  # (C, 128) f32
    # W_pc[c*HW+hw, p*128+co] = pm[hw,p]/25 * w1[c,co] * s1[co]
    wpc = jnp.einsum("hp,co->chpo", pm, w1s).reshape(chw, 512).astype(jnp.bfloat16)
    b1 = jnp.tile(params["bn1_bias"].reshape(1, 128), (1, 4))         # (1, 512) f32

    w2s = (params["w2"] * params["bn2_scale"].reshape(1, 768)).astype(jnp.bfloat16)
    b2 = params["bn2_bias"].reshape(1, 768)

    n_pad = ((n_classes + 127) // 128) * 128
    wl = jnp.zeros((768, n_pad), jnp.bfloat16).at[:, :n_classes].set(
        params["wl"].astype(jnp.bfloat16))
    bl = jnp.zeros((1, n_pad), jnp.float32).at[:, :n_classes].set(
        params["bl"].reshape(1, n_classes))

    weights = (wpc, b1, w2s, b2, wl, bl)

    tn = _pick_tn(n, chw)
    grid = (pl.cdiv(n, tn),)

    # Explicit VMEM budget: double-buffered x/out blocks, single-buffered weights,
    # generous headroom; clamped to v7x's physical 64 MiB.
    need = (2 * tn * chw * 2 + 2 * tn * n_pad * 4
            + sum(int(a.size) * a.dtype.itemsize for a in weights) + (16 << 20))
    vmem_limit = int(min(need, 64 << 20))

    x_spec = pl.BlockSpec((tn, chw), lambda i: (i, 0))
    out_spec = pl.BlockSpec((tn, n_pad), lambda i: (i, 0))

    def call(weight_pipeline_mode):
        def const_spec(a):
            kw = ({} if weight_pipeline_mode is None
                  else {"pipeline_mode": weight_pipeline_mode})
            return pl.BlockSpec(a.shape, lambda i: (0,) * a.ndim, **kw)
        return pl.pallas_call(
            _aux_head_kernel,
            grid=grid,
            in_specs=[x_spec] + [const_spec(a) for a in weights],
            out_specs=out_spec,
            # Logits kept f32 (n_pad=128 is already an unmasked lane-dense store);
            # switch to bf16 here if downstream tolerates it.
            out_shape=jax.ShapeDtypeStruct((n, n_pad), jnp.float32),
            compiler_params=pltpu.CompilerParams(
                dimension_semantics=("parallel",),
                vmem_limit_bytes=vmem_limit),
        )(x2, *weights)

    try:
        # Constant-index weights only need one VMEM buffer; dropping the second
        # buffer frees several MiB of v7x's 64 MiB VMEM for the x/out tiles.
        logits = call(pl.Buffered(1))
    except Exception:
        logits = call(None)  # fall back to default double-buffering

    return logits[:, :n_classes]


def make_params(key, C, n_classes, eps=1e-5):
    """Deterministic synthetic parameters, shaped like the PyTorch module."""
    ks = jax.random.split(key, 10)

    # Conv2d(C, 128, kernel_size=1, bias=False): torch weight (128, C, 1, 1)
    w1_t = 0.1 * jax.random.normal(ks[0], (128, C, 1, 1), jnp.float32)
    w1 = jnp.transpose(w1_t[:, :, 0, 0], (1, 0))                 # (C, 128)

    # BatchNorm2d(128): inference mode, folded into scale/bias.
    g1 = 1.0 + 0.05 * jax.random.normal(ks[1], (128,), jnp.float32)
    be1 = 0.05 * jax.random.normal(ks[2], (128,), jnp.float32)
    rm1 = 0.01 * jax.random.normal(ks[3], (128,), jnp.float32)
    rv1 = 1.0 + 0.1 * jax.random.uniform(ks[4], (128,), jnp.float32)
    s1 = g1 / jnp.sqrt(rv1 + eps)
    b1 = be1 - rm1 * s1

    # Conv2d(128, 768, kernel_size=2, bias=False): torch weight (768,128,2,2)
    # -> (kh, kw, ci, co) -> (2*2*128, 768)
    w2_t = 0.05 * jax.random.normal(ks[5], (768, 128, 2, 2), jnp.float32)
    w2 = jnp.transpose(w2_t, (2, 3, 1, 0)).reshape(2 * 2 * 128, 768)

    # BatchNorm2d(768): fresh running stats (mean=0, var=1), folded.
    g2 = 1.0 + 0.05 * jax.random.normal(ks[6], (768,), jnp.float32)
    be2 = 0.05 * jax.random.normal(ks[7], (768,), jnp.float32)
    s2 = g2 / jnp.sqrt(jnp.ones((768,), jnp.float32) + eps)
    b2 = be2

    # Linear(768, n_classes): torch weight (n_classes, 768), bias (n_classes,)
    wl_t = 0.05 * jax.random.normal(ks[8], (n_classes, 768), jnp.float32)
    bl = 0.05 * jax.random.normal(ks[9], (n_classes,), jnp.float32)

    return {
        "w1": w1,
        "bn1_scale": s1.reshape(1, 128), "bn1_bias": b1.reshape(1, 128),
        "w2": w2,
        "bn2_scale": s2.reshape(1, 768), "bn2_bias": b2.reshape(1, 768),
        "wl": jnp.transpose(wl_t, (1, 0)), "bl": bl.reshape(1, n_classes),
    }


def reference_forward(x_nchw, params, *, input_size):
    """Plain-JAX f32 reference with identical math (for correctness check)."""
    x = jnp.maximum(jnp.transpose(x_nchw, (0, 2, 3, 1)), 0.0)
    offs = (0, input_size - 5)
    ys = []
    for oh in offs:
        for ow in offs:
            p = jnp.mean(x[:, oh:oh + 5, ow:ow + 5, :], axis=(1, 2))
            y = p @ params["w1"]
            ys.append(jnp.maximum(y * params["bn1_scale"] + params["bn1_bias"], 0.0))
    acc = sum(y @ params["w2"][i * 128:(i + 1) * 128] for i, y in enumerate(ys))
    h = jnp.maximum(acc * params["bn2_scale"] + params["bn2_bias"], 0.0)
    return h @ params["wl"] + params["bl"]


if __name__ == "__main__":
    key = jax.random.PRNGKey(0)
    kx, kp = jax.random.split(key)

    N, C, input_size, n_classes = 2, 4, 8, 10
    x = jax.random.normal(kx, (N, C, input_size, input_size), jnp.float32)  # NCHW
    params = make_params(kp, C, n_classes)

    logits = auxiliary_head_forward(x, params, input_size=input_size,
                                    n_classes=n_classes)
    logits = jax.block_until_ready(logits)
    assert logits.shape == (N, n_classes)

    ref = reference_forward(x, params, input_size=input_size)
    np.testing.assert_allclose(np.asarray(logits), np.asarray(ref),
                               rtol=2e-2, atol=2e-2)

    print("KERNEL_OK")
</pallas_src>

<mosaic_0001>
module attributes {stable_mosaic.version = 11 : i64} {
  func.func @_aux_head_kernel(%arg0: i32, %arg1: memref<2x256xbf16, #tpu.memory_space<vmem>>, %arg2: memref<256x512xbf16, #tpu.memory_space<vmem>>, %arg3: memref<1x512xf32, #tpu.memory_space<vmem>>, %arg4: memref<512x768xbf16, #tpu.memory_space<vmem>>, %arg5: memref<1x768xf32, #tpu.memory_space<vmem>>, %arg6: memref<768x128xbf16, #tpu.memory_space<vmem>>, %arg7: memref<1x128xf32, #tpu.memory_space<vmem>>, %arg8: memref<2x128xf32, #tpu.memory_space<vmem>>) attributes {dimension_semantics = [#tpu.dimension_semantics<parallel>], iteration_bounds = array<i64: 1>, scalar_prefetch = 0 : i64, scratch_operands = 0 : i64, tpu.core_type = #tpu.core_type<tc>, window_params = [{transform_indices = @transform_0, window_bounds = array<i64: 2, 256>}, {pipeline_mode = #tpu.pipeline_mode<synchronous>, transform_indices = @transform_1, window_bounds = array<i64: 256, 512>}, {pipeline_mode = #tpu.pipeline_mode<synchronous>, transform_indices = @transform_2, window_bounds = array<i64: 1, 512>}, {pipeline_mode = #tpu.pipeline_mode<synchronous>, transform_indices = @transform_3, window_bounds = array<i64: 512, 768>}, {pipeline_mode = #tpu.pipeline_mode<synchronous>, transform_indices = @transform_4, window_bounds = array<i64: 1, 768>}, {pipeline_mode = #tpu.pipeline_mode<synchronous>, transform_indices = @transform_5, window_bounds = array<i64: 768, 128>}, {pipeline_mode = #tpu.pipeline_mode<synchronous>, transform_indices = @transform_6, window_bounds = array<i64: 1, 128>}, {transform_indices = @transform_7, window_bounds = array<i64: 2, 128>}]} {
    %c0 = arith.constant 0 : index
    %c0_0 = arith.constant 0 : index
    %0 = vector.load %arg1[%c0, %c0_0] : memref<2x256xbf16, #tpu.memory_space<vmem>>, vector<2x256xbf16>
    %cst = arith.constant 0.000000e+00 : bf16
    %1 = vector.broadcast %cst : bf16 to vector<2x256xbf16>
    %2 = arith.maximumf %0, %1 : vector<2x256xbf16>
    %c0_1 = arith.constant 0 : index
    %c0_2 = arith.constant 0 : index
    %3 = vector.load %arg2[%c0_1, %c0_2] : memref<256x512xbf16, #tpu.memory_space<vmem>>, vector<256x512xbf16>
    %cst_3 = arith.constant dense<0.000000e+00> : vector<2x512xf32>
    %4 = tpu.matmul %2, %3, %cst_3 {dimension_numbers = #tpu.dot_dimension_numbers<[1], [0], [0], [1], [0, 0, 1, 1], [], []>} : vector<2x256xbf16>, vector<256x512xbf16>, vector<2x512xf32> -> vector<2x512xf32>
    %c0_4 = arith.constant 0 : index
    %c0_5 = arith.constant 0 : index
    %5 = vector.load %arg3[%c0_4, %c0_5] : memref<1x512xf32, #tpu.memory_space<vmem>>, vector<1x512xf32>
    %6 = vector.broadcast %5 : vector<1x512xf32> to vector<2x512xf32>
    %7 = arith.addf %4, %6 : vector<2x512xf32>
    %cst_6 = arith.constant 0.000000e+00 : f32
    %8 = vector.broadcast %cst_6 : f32 to vector<2x512xf32>
    %9 = arith.maximumf %7, %8 : vector<2x512xf32>
    %10 = arith.truncf %9 : vector<2x512xf32> to vector<2x512xbf16>
    %c0_7 = arith.constant 0 : index
    %c0_8 = arith.constant 0 : index
    %11 = vector.load %arg4[%c0_7, %c0_8] : memref<512x768xbf16, #tpu.memory_space<vmem>>, vector<512x768xbf16>
    %cst_9 = arith.constant dense<0.000000e+00> : vector<2x768xf32>
    %12 = tpu.matmul %10, %11, %cst_9 {dimension_numbers = #tpu.dot_dimension_numbers<[1], [0], [0], [1], [0, 0, 1, 1], [], []>} : vector<2x512xbf16>, vector<512x768xbf16>, vector<2x768xf32> -> vector<2x768xf32>
    %c0_10 = arith.constant 0 : index
    %c0_11 = arith.constant 0 : index
    %13 = vector.load %arg5[%c0_10, %c0_11] : memref<1x768xf32, #tpu.memory_space<vmem>>, vector<1x768xf32>
    %14 = vector.broadcast %13 : vector<1x768xf32> to vector<2x768xf32>
    %15 = arith.addf %12, %14 : vector<2x768xf32>
    %cst_12 = arith.constant 0.000000e+00 : f32
    %16 = vector.broadcast %cst_12 : f32 to vector<2x768xf32>
    %17 = arith.maximumf %15, %16 : vector<2x768xf32>
    %18 = arith.truncf %17 : vector<2x768xf32> to vector<2x768xbf16>
    %c0_13 = arith.constant 0 : index
    %c0_14 = arith.constant 0 : index
    %19 = vector.load %arg6[%c0_13, %c0_14] : memref<768x128xbf16, #tpu.memory_space<vmem>>, vector<768x128xbf16>
    %cst_15 = arith.constant dense<0.000000e+00> : vector<2x128xf32>
    %20 = tpu.matmul %18, %19, %cst_15 {dimension_numbers = #tpu.dot_dimension_numbers<[1], [0], [0], [1], [0, 0, 1, 1], [], []>} : vector<2x768xbf16>, vector<768x128xbf16>, vector<2x128xf32> -> vector<2x128xf32>
    %c0_16 = arith.constant 0 : index
    %c0_17 = arith.constant 0 : index
    %21 = vector.load %arg7[%c0_16, %c0_17] : memref<1x128xf32, #tpu.memory_space<vmem>>, vector<1x128xf32>
    %22 = vector.broadcast %21 : vector<1x128xf32> to vector<2x128xf32>
    %23 = arith.addf %20, %22 : vector<2x128xf32>
    %c0_18 = arith.constant 0 : index
    %c0_19 = arith.constant 0 : index
    %24 = vector.load %arg8[%c0_18, %c0_19] : memref<2x128xf32, #tpu.memory_space<vmem>>, vector<2x128xf32>
    tpu.vector_store %arg8[%c0_18, %c0_19], %23 {strides = array<i32>} : memref<2x128xf32, #tpu.memory_space<vmem>>, vector<2x128xf32>,
    return
  }
  func.func @transform_0(%arg0: i32) -> (i32, i32) {
    %c0_i32 = arith.constant 0 : i32
    %c0_i32_0 = arith.constant 0 : i32
    return %arg0, %c0_i32 : i32, i32
  }
  func.func @transform_1(%arg0: i32) -> (i32, i32) {
    %c0_i32 = arith.constant 0 : i32
    %c0_i32_0 = arith.constant 0 : i32
    %c0_i32_1 = arith.constant 0 : i32
    return %c0_i32, %c0_i32_0 : i32, i32
  }
  func.func @transform_2(%arg0: i32) -> (i32, i32) {
    %c0_i32 = arith.constant 0 : i32
    %c0_i32_0 = arith.constant 0 : i32
    %c0_i32_1 = arith.constant 0 : i32
    return %c0_i32, %c0_i32_0 : i32, i32
  }
  func.func @transform_3(%arg0: i32) -> (i32, i32) {
    %c0_i32 = arith.constant 0 : i32
    %c0_i32_0 = arith.constant 0 : i32
    %c0_i32_1 = arith.constant 0 : i32
    return %c0_i32, %c0_i32_0 : i32, i32
  }
  func.func @transform_4(%arg0: i32) -> (i32, i32) {
    %c0_i32 = arith.constant 0 : i32
    %c0_i32_0 = arith.constant 0 : i32
    %c0_i32_1 = arith.constant 0 : i32
    return %c0_i32, %c0_i32_0 : i32, i32
  }
  func.func @transform_5(%arg0: i32) -> (i32, i32) {
    %c0_i32 = arith.constant 0 : i32
    %c0_i32_0 = arith.constant 0 : i32
    %c0_i32_1 = arith.constant 0 : i32
    return %c0_i32, %c0_i32_0 : i32, i32
  }
  func.func @transform_6(%arg0: i32) -> (i32, i32) {
    %c0_i32 = arith.constant 0 : i32
    %c0_i32_0 = arith.constant 0 : i32
    %c0_i32_1 = arith.constant 0 : i32
    return %c0_i32, %c0_i32_0 : i32, i32
  }
  func.func @transform_7(%arg0: i32) -> (i32, i32) {
    %c0_i32 = arith.constant 0 : i32
    %c0_i32_0 = arith.constant 0 : i32
    return %arg0, %c0_i32 : i32, i32
  }
}

module attributes {stable_mosaic.version = 11 : i64} {
  func.func @_aux_head_kernel(%arg0: i32, %arg1: memref<2x256xbf16, #tpu.memory_space<vmem>>, %arg2: memref<256x512xbf16, #tpu.memory_space<vmem>>, %arg3: memref<1x512xf32, #tpu.memory_space<vmem>>, %arg4: memref<512x768xbf16, #tpu.memory_space<vmem>>, %arg5: memref<1x768xf32, #tpu.memory_space<vmem>>, %arg6: memref<768x128xbf16, #tpu.memory_space<vmem>>, %arg7: memref<1x128xf32, #tpu.memory_space<vmem>>, %arg8: memref<2x128xf32, #tpu.memory_space<vmem>>) attributes {dimension_semantics = [#tpu.dimension_semantics<parallel>], iteration_bounds = array<i64: 1>, scalar_prefetch = 0 : i64, scratch_operands = 0 : i64, tpu.core_type = #tpu.core_type<tc>, window_params = [{transform_indices = @transform_0, window_bounds = array<i64: 2, 256>}, {pipeline_mode = #tpu.pipeline_mode<synchronous>, transform_indices = @transform_1, window_bounds = array<i64: 256, 512>}, {pipeline_mode = #tpu.pipeline_mode<synchronous>, transform_indices = @transform_2, window_bounds = array<i64: 1, 512>}, {pipeline_mode = #tpu.pipeline_mode<synchronous>, transform_indices = @transform_3, window_bounds = array<i64: 512, 768>}, {pipeline_mode = #tpu.pipeline_mode<synchronous>, transform_indices = @transform_4, window_bounds = array<i64: 1, 768>}, {pipeline_mode = #tpu.pipeline_mode<synchronous>, transform_indices = @transform_5, window_bounds = array<i64: 768, 128>}, {pipeline_mode = #tpu.pipeline_mode<synchronous>, transform_indices = @transform_6, window_bounds = array<i64: 1, 128>}, {transform_indices = @transform_7, window_bounds = array<i64: 2, 128>}]} {
    %c0 = arith.constant 0 : index
    %c0_0 = arith.constant 0 : index
    %0 = vector.load %arg1[%c0, %c0_0] : memref<2x256xbf16, #tpu.memory_space<vmem>>, vector<2x256xbf16>
    %cst = arith.constant 0.000000e+00 : bf16
    %1 = vector.broadcast %cst : bf16 to vector<2x256xbf16>
    %2 = arith.maximumf %0, %1 : vector<2x256xbf16>
    %c0_1 = arith.constant 0 : index
    %c0_2 = arith.constant 0 : index
    %3 = vector.load %arg2[%c0_1, %c0_2] : memref<256x512xbf16, #tpu.memory_space<vmem>>, vector<256x512xbf16>
    %cst_3 = arith.constant dense<0.000000e+00> : vector<2x512xf32>
    %4 = tpu.matmul %2, %3, %cst_3 {dimension_numbers = #tpu.dot_dimension_numbers<[1], [0], [0], [1], [0, 0, 1, 1], [], []>} : vector<2x256xbf16>, vector<256x512xbf16>, vector<2x512xf32> -> vector<2x512xf32>
    %c0_4 = arith.constant 0 : index
    %c0_5 = arith.constant 0 : index
    %5 = vector.load %arg3[%c0_4, %c0_5] : memref<1x512xf32, #tpu.memory_space<vmem>>, vector<1x512xf32>
    %6 = vector.broadcast %5 : vector<1x512xf32> to vector<2x512xf32>
    %7 = arith.addf %4, %6 : vector<2x512xf32>
    %cst_6 = arith.constant 0.000000e+00 : f32
    %8 = vector.broadcast %cst_6 : f32 to vector<2x512xf32>
    %9 = arith.maximumf %7, %8 : vector<2x512xf32>
    %10 = arith.truncf %9 : vector<2x512xf32> to vector<2x512xbf16>
    %c0_7 = arith.constant 0 : index
    %c0_8 = arith.constant 0 : index
    %11 = vector.load %arg4[%c0_7, %c0_8] : memref<512x768xbf16, #tpu.memory_space<vmem>>, vector<512x768xbf16>
    %cst_9 = arith.constant dense<0.000000e+00> : vector<2x768xf32>
    %12 = tpu.matmul %10, %11, %cst_9 {dimension_numbers = #tpu.dot_dimension_numbers<[1], [0], [0], [1], [0, 0, 1, 1], [], []>} : vector<2x512xbf16>, vector<512x768xbf16>, vector<2x768xf32> -> vector<2x768xf32>
    %c0_10 = arith.constant 0 : index
    %c0_11 = arith.constant 0 : index
    %13 = vector.load %arg5[%c0_10, %c0_11] : memref<1x768xf32, #tpu.memory_space<vmem>>, vector<1x768xf32>
    %14 = vector.broadcast %13 : vector<1x768xf32> to vector<2x768xf32>
    %15 = arith.addf %12, %14 : vector<2x768xf32>
    %cst_12 = arith.constant 0.000000e+00 : f32
    %16 = vector.broadcast %cst_12 : f32 to vector<2x768xf32>
    %17 = arith.maximumf %15, %16 : vector<2x768xf32>
    %18 = arith.truncf %17 : vector<2x768xf32> to vector<2x768xbf16>
    %c0_13 = arith.constant 0 : index
    %c0_14 = arith.constant 0 : index
    %19 = vector.load %arg6[%c0_13, %c0_14] : memref<768x128xbf16, #tpu.memory_space<vmem>>, vector<768x128xbf16>
    %cst_15 = arith.constant dense<0.000000e+00> : vector<2x128xf32>
    %20 = tpu.matmul %18, %19, %cst_15 {dimension_numbers = #tpu.dot_dimension_numbers<[1], [0], [0], [1], [0, 0, 1, 1], [], []>} : vector<2x768xbf16>, vector<768x128xbf16>, vector<2x128xf32> -> vector<2x128xf32>
    %c0_16 = arith.constant 0 : index
    %c0_17 = arith.constant 0 : index
    %21 = vector.load %arg7[%c0_16, %c0_17] : memref<1x128xf32, #tpu.memory_space<vmem>>, vector<1x128xf32>
    %22 = vector.broadcast %21 : vector<1x128xf32> to vector<2x128xf32>
    %23 = arith.addf %20, %22 : vector<2x128xf32>
    %c0_18 = arith.constant 0 : index
    %c0_19 = arith.constant 0 : index
    %24 = vector.load %arg8[%c0_18, %c0_19] : memref<2x128xf32, #tpu.memory_space<vmem>>, vector<2x128xf32>
    tpu.vector_store %arg8[%c0_18, %c0_19], %23 {strides = array<i32>} : memref<2x128xf32, #tpu.memory_space<vmem>>, vector<2x128xf32>,
    return
  }
  func.func @transform_0(%arg0: i32) -> (i32, i32) {
    %c0_i32 = arith.constant 0 : i32
    %c0_i32_0 = arith.constant 0 : i32
    return %arg0, %c0_i32 : i32, i32
  }
  func.func @transform_1(%arg0: i32) -> (i32, i32) {
    %c0_i32 = arith.constant 0 : i32
    %c0_i32_0 = arith.constant 0 : i32
    %c0_i32_1 = arith.constant 0 : i32
    return %c0_i32, %c0_i32_0 : i32, i32
  }
  func.func @transform_2(%arg0: i32) -> (i32, i32) {
    %c0_i32 = arith.constant 0 : i32
    %c0_i32_0 = arith.constant 0 : i32
    %c0_i32_1 = arith.constant 0 : i32
    return %c0_i32, %c0_i32_0 : i32, i32
  }
  func.func @transform_3(%arg0: i32) -> (i32, i32) {
    %c0_i32 = arith.constant 0 : i32
    %c0_i32_0 = arith.constant 0 : i32
    %c0_i32_1 = arith.constant 0 : i32
    return %c0_i32, %c0_i32_0 : i32, i32
  }
  func.func @transform_4(%arg0: i32) -> (i32, i32) {
    %c0_i32 = arith.constant 0 : i32
    %c0_i32_0 = arith.constant 0 : i32
    %c0_i32_1 = arith.constant 0 : i32
    return %c0_i32, %c0_i32_0 : i32, i32
  }
  func.func @transform_5(%arg0: i32) -> (i32, i32) {
    %c0_i32 = arith.constant 0 : i32
    %c0_i32_0 = arith.constant 0 : i32
    %c0_i32_1 = arith.constant 0 : i32
    return %c0_i32, %c0_i32_0 : i32, i32
  }
  func.func @transform_6(%arg0: i32) -> (i32, i32) {
    %c0_i32 = arith.constant 0 : i32
    %c0_i32_0 = arith.constant 0 : i32
    %c0_i32_1 = arith.constant 0 : i32
    return %c0_i32, %c0_i32_0 : i32, i32
  }
  func.func @transform_7(%arg0: i32) -> (i32, i32) {
    %c0_i32 = arith.constant 0 : i32
    %c0_i32_0 = arith.constant 0 : i32
    return %arg0, %c0_i32 : i32, i32
  }
}

</mosaic_0001>

<bundles_post_ra>
// kernel: tpu_custom_call.1
= control target key start
LH: loop header
LB: loop body
LE: loop exit
PB: predicated region body
PF: predicated region fallthrough
CT: control target
= control target key end

     0   :  { %12 = vsyncpa [#allocation3], 0  ;;  %s4462_s0 = inlined_call_operand.hbm [shape: bf16[2,256], index: 0, kind: input, shape index: {}]   ;;  %s4463_s1 = inlined_call_operand.hbm [shape: bf16[256,512], index: 1, kind: input, shape index: {}]   ;;  %s4464_s2 = inlined_call_operand.hbm [shape: f32[1,512], index: 2, kind: input, shape index: {}]   ;;  %s4465_s3 = inlined_call_operand.hbm [shape: bf16[512,768], index: 3, kind: input, shape index: {}]   ;;  %s4466_s4 = inlined_call_operand.hbm [shape: f32[1,768], index: 4, kind: input, shape index: {}]   ;;  %s4467_s5 = inlined_call_operand.hbm [shape: bf16[768,128], index: 5, kind: input, shape index: {}]   ;;  %s4468_s6 = inlined_call_operand.vmem [shape: f32[1,128], index: 6, kind: input, shape index: {}]   ;;  %s4469_s7 = inlined_call_operand.hbm [shape: f32[2,128], index: 7, kind: output, shape index: {}]  }
   0x1   :  { %13 = vsyncpa [#allocation6], 0 }
   0x2   :  { %14 = vsyncpa [#allocation9], 0 }
   0x3   :  { %15 = vsyncpa [#allocation12], 0  ;;  %s32_s26 = sshll.u32 %s4463_s1, 4  ;;  %s33_s26 = int_to_ptr.hbm [resolvable:$true] %s32_s26 }
   0x4   :  { %16 = vsyncpa [#allocation4], 0  ;;  %s4321_s27 = smov [#allocation5]   ;;  %s56_s8 = sshll.u32 %s4465_s3, 4  ;;  %s57_s8 = int_to_ptr.hbm [resolvable:$true] %s56_s8 }
   0x5   :  { %s34_s28 = sshll.u32 %s4321_s27, 4  ;;  %s4322_s9 = smov 256   ;;  %s35_s28 = int_to_ptr.vmem [resolvable:$true] %s34_s28 }
   0x6   :  { %s4323_s10 = smov 16   ;;  %s4324_s11 = smov [#allocation8]  }
   0x7   :  { %40 = dma.hbm_to_vmem [thread:$0]  %s33_s26, 8192, %s35_s28, [#allocation6], %s4322_s9, %s4322_s9, %s4323_s10  }
   0x8   :  { %s58_s12 = sshll.u32 %s4324_s11, 4  ;;  %s4325_s13 = smov 384   ;;  %s59_s12 = int_to_ptr.vmem [resolvable:$true] %s58_s12 }
   0x9   :  { %s4326_s14 = smov 24   ;;  %s22_s16 = sshll.u32 %s4462_s0, 4  ;;  %s23_s16 = int_to_ptr.hbm [resolvable:$true] %s22_s16 }
   0xa   :  { %64 = dma.hbm_to_vmem [thread:$0]  %s57_s8, 24576, %s59_s12, [#allocation9], %s4325_s13, %s4325_s13, %s4326_s14  }
   0xb   :  { %s4327_s17 = smov [#allocation2]   ;;  %s46_s20 = sshll.u32 %s4464_s2, 4  ;;  %s47_s20 = int_to_ptr.hbm [resolvable:$true] %s46_s20 }
   0xc   :  { %s24_s18 = sshll.u32 %s4327_s17, 4  ;;  %s4328_s21 = smov [#allocation7]   ;;  %s25_s18 = int_to_ptr.vmem [resolvable:$true] %s24_s18 }
   0xd   :  { %27 = dma.hbm_to_vmem [thread:$0]  %s23_s16, 32, %s25_s18, [#allocation3]  }
   0xe   :  { %s48_s22 = sshll.u32 %s4328_s21, 4  ;;  %s70_s25 = sshll.u32 %s4466_s4, 4  ;;  %s49_s22 = int_to_ptr.vmem [resolvable:$true] %s48_s22  ;;  %s71_s25 = int_to_ptr.hbm [resolvable:$true] %s70_s25 }
   0xf   :  { %51 = dma.hbm_to_vmem [thread:$0]  %s47_s20, 64, %s49_s22, [#allocation6]  }
  0x10   :  { %s80_s27 = sshll.u32 %s4467_s5, 4  ;;  %s4329_s28 = smov [#allocation10]   ;;  %s81_s27 = int_to_ptr.hbm [resolvable:$true] %s80_s27 }
  0x11   :  { %s72_s29 = sshll.u32 %s4329_s28, 4  ;;  %s4330_s2 = smov [#allocation11]   ;;  %s73_s29 = int_to_ptr.vmem [resolvable:$true] %s72_s29 }
  0x12   :  { %75 = dma.hbm_to_vmem [thread:$0]  %s71_s25, 96, %s73_s29, [#allocation9]  }
  0x13   :  { %s82_s30 = sshll.u32 %s4330_s2, 4  ;;  %s4331_s8 = smov 64   ;;  %s83_s30 = int_to_ptr.vmem [resolvable:$true] %s82_s30 }
  0x14   :  { %s4332_s9 = smov 4  }
  0x15   :  { %88 = dma.hbm_to_vmem [thread:$0]  %s81_s27, 6144, %s83_s30, [#allocation12], %s4331_s8, %s4331_s8, %s4332_s9  }
  0x16   :  { %4311 = dma.done.wait [#allocation3], 32  }
  0x17   :  { %4312 = vsyncadd [#allocation3], 4294967264 }
  0x18   :  { %4313 = dma.done.wait [#allocation6], 8256  }
  0x19   :  { %4314 = vsyncadd [#allocation6], 4294959040 }
  0x1a   :  { %4315 = dma.done.wait [#allocation9], 24672  }
  0x1b   :  { %4316 = vsyncadd [#allocation9], 4294942624 }
  0x1c   :  { %4317 = dma.done.wait [#allocation12], 6144  }
  0x1d   :  { %4318 = vsyncadd [#allocation12], 4294961152  ;;  %v2723_v0 = vld [vmem:[#allocation5 + $0xe0] sm:$0xf]  ;;  %v3855_v1 = vld [vmem:[#allocation5 + $0xec] sm:$0xf0] }
  0x1e   :  { %v2851_v2 = vld [vmem:[#allocation5 + $0x1e0] sm:$0xf]  ;;  %v2724_v3 = vor.u32 %v3855_v1, %v2723_v0  ;;  %v3887_v4 = vld [vmem:[#allocation5 + $0x1ec] sm:$0xf0]  ;;  %v3853_v5 = vld [vmem:[#allocation5 + $0xe4] sm:$0xf] }
  0x1f   :  { %v2725_v6 = vld [vmem:[#allocation5 + $0xf0] sm:$0xf0]  ;;  %v2852_v7 = vor.u32 %v3887_v4, %v2851_v2  ;;  %v3885_v9 = vld [vmem:[#allocation5 + $0x1e4] sm:$0xf]  ;;  %v2707_v11 = vld [vmem:[#allocation5 + $0xc0] sm:$0xf] }
  0x20   :  { %v2728_v8 = vor.u32 %v3853_v5, %v2725_v6  ;;  %v2853_v10 = vld [vmem:[#allocation5 + $0x1f0] sm:$0xf0]  ;;  %520 = vmatpush.bf16.msra.mxu0 %v2724_v3  ;;  %v3851_v13 = vld [vmem:[#allocation5 + $0xcc] sm:$0xf0]  ;;  %v2835_v14 = vld [vmem:[#allocation5 + $0x1c0] sm:$0xf] }
  0x21   :  { %v2856_v12 = vor.u32 %v3885_v9, %v2853_v10  ;;  %v3883_v15 = vld [vmem:[#allocation5 + $0x1cc] sm:$0xf0]  ;;  %533 = vmatpush.bf16.msra.mxu1 %v2852_v7  ;;  %v2708_v16 = vor.u32 %v3851_v13, %v2707_v11  ;;  %v3849_v18 = vld [vmem:[#allocation5 + $0xc4] sm:$0xf]  ;;  %v2709_v19 = vld [vmem:[#allocation5 + $0xd0] sm:$0xf0] }
  0x22   :  { %546 = vmatpush.bf16.msra.mxu2 %v2728_v8  ;;  %v2836_v17 = vor.u32 %v3883_v15, %v2835_v14  ;;  %v3881_v20 = vld [vmem:[#allocation5 + $0x1c4] sm:$0xf]  ;;  %v2712_v21 = vor.u32 %v3849_v18, %v2709_v19  ;;  %v2837_v22 = vld [vmem:[#allocation5 + $0x1d0] sm:$0xf0]  ;;  %v2691_v23 = vld [vmem:[#allocation5 + $0xa0] sm:$0xf] }
  0x23   :  { %559 = vmatpush.bf16.msra.mxu3 %v2856_v12  ;;  %v3847_v24 = vld [vmem:[#allocation5 + $0xac] sm:$0xf0]  ;;  %v2840_v25 = vor.u32 %v3881_v20, %v2837_v22  ;;  %v2819_v26 = vld [vmem:[#allocation5 + $0x1a0] sm:$0xf]  ;;  %v3845_v28 = vld [vmem:[#allocation5 + $0xa4] sm:$0xf] }
  0x24   :  { %v3879_v27 = vld [vmem:[#allocation5 + $0x1ac] sm:$0xf0]  ;;  %521 = vmatpush.bf16.msra.mxu0 %v2708_v16  ;;  %v2692_v29 = vor.u32 %v3847_v24, %v2691_v23  ;;  %v2693_v30 = vld [vmem:[#allocation5 + $0xb0] sm:$0xf0]  ;;  %v3877_v31 = vld [vmem:[#allocation5 + $0x1a4] sm:$0xf] }
  0x25   :  { %v2821_v32 = vld [vmem:[#allocation5 + $0x1b0] sm:$0xf0]  ;;  %534 = vmatpush.bf16.msra.mxu1 %v2836_v17  ;;  %v2820_v33 = vor.u32 %v3879_v27, %v2819_v26  ;;  %v2696_v34 = vor.u32 %v3845_v28, %v2693_v30  ;;  %v2675_v35 = vld [vmem:[#allocation5 + $0x80] sm:$0xf]  ;;  %v3843_v36 = vld [vmem:[#allocation5 + $0x8c] sm:$0xf0] }
  0x26   :  { %547 = vmatpush.bf16.msra.mxu2 %v2712_v21  ;;  %v2803_v37 = vld [vmem:[#allocation5 + $0x180] sm:$0xf]  ;;  %v2824_v38 = vor.u32 %v3877_v31, %v2821_v32  ;;  %v3875_v39 = vld [vmem:[#allocation5 + $0x18c] sm:$0xf0]  ;;  %v3841_v40 = vld [vmem:[#allocation5 + $0x84] sm:$0xf]  ;;  %v2676_v44 = vor.u32 %v3843_v36, %v2675_v35 }
  0x27   :  { %560 = vmatpush.bf16.msra.mxu3 %v2840_v25  ;;  %v2677_v41 = vld [vmem:[#allocation5 + $0x90] sm:$0xf0]  ;;  %v3873_v42 = vld [vmem:[#allocation5 + $0x184] sm:$0xf]  ;;  %v2804_v45 = vor.u32 %v3875_v39, %v2803_v37  ;;  %v2659_v47 = vld [vmem:[#allocation5 + $0x60] sm:$0xf] }
  0x28   :  { %v2805_v43 = vld [vmem:[#allocation5 + $0x190] sm:$0xf0]  ;;  %522 = vmatpush.bf16.msra.mxu0 %v2692_v29  ;;  %v2680_v46 = vor.u32 %v3841_v40, %v2677_v41  ;;  %v3839_v48 = vld [vmem:[#allocation5 + $0x6c] sm:$0xf0]  ;;  %v2787_v49 = vld [vmem:[#allocation5 + $0x160] sm:$0xf] }
  0x29   :  { %535 = vmatpush.bf16.msra.mxu1 %v2820_v33  ;;  %v2808_v50 = vor.u32 %v3873_v42, %v2805_v43  ;;  %v3871_v51 = vld [vmem:[#allocation5 + $0x16c] sm:$0xf0]  ;;  %v3837_v52 = vld [vmem:[#allocation5 + $0x64] sm:$0xf]  ;;  %v2661_v53 = vld [vmem:[#allocation5 + $0x70] sm:$0xf0]  ;;  %v2660_v56 = vor.u32 %v3839_v48, %v2659_v47 }
  0x2a   :  { %548 = vmatpush.bf16.msra.mxu2 %v2696_v34  ;;  %v3869_v54 = vld [vmem:[#allocation5 + $0x164] sm:$0xf]  ;;  %v2789_v55 = vld [vmem:[#allocation5 + $0x170] sm:$0xf0]  ;;  %v2788_v57 = vor.u32 %v3871_v51, %v2787_v49  ;;  %v2664_v58 = vor.u32 %v3837_v52, %v2661_v53  ;;  %v2643_v59 = vld [vmem:[#allocation5 + $0x40] sm:$0xf] }
  0x2b   :  { %561 = vmatpush.bf16.msra.mxu3 %v2824_v38  ;;  %v3835_v60 = vld [vmem:[#allocation5 + $0x4c] sm:$0xf0]  ;;  %v2771_v61 = vld [vmem:[#allocation5 + $0x140] sm:$0xf]  ;;  %v2792_v62 = vor.u32 %v3869_v54, %v2789_v55  ;;  %v3833_v0 = vld [vmem:[#allocation5 + $0x44] sm:$0xf] }
  0x2c   :  { %523 = vmatpush.bf16.msra.mxu0 %v2676_v44  ;;  %v3867_v63 = vld [vmem:[#allocation5 + $0x14c] sm:$0xf0]  ;;  %v2645_v1 = vld [vmem:[#allocation5 + $0x50] sm:$0xf0]  ;;  %v3865_v2 = vld [vmem:[#allocation5 + $0x144] sm:$0xf]  ;;  %v2644_v4 = vor.u32 %v3835_v60, %v2643_v59 }
  0x2d   :  { %536 = vmatpush.bf16.msra.mxu1 %v2804_v45  ;;  %v2773_v3 = vld [vmem:[#allocation5 + $0x150] sm:$0xf0]  ;;  %v2772_v5 = vor.u32 %v3867_v63, %v2771_v61  ;;  %v2648_v6 = vor.u32 %v3833_v0, %v2645_v1  ;;  %v2627_v7 = vld [vmem:[#allocation5 + $0x20] sm:$0xf]  ;;  %v3831_v8 = vld [vmem:[#allocation5 + $0x2c] sm:$0xf0] }
  0x2e   :  { %549 = vmatpush.bf16.msra.mxu2 %v2680_v46  ;;  %v2755_v9 = vld [vmem:[#allocation5 + $0x120] sm:$0xf]  ;;  %v2776_v10 = vor.u32 %v3865_v2, %v2773_v3  ;;  %v3863_v11 = vld [vmem:[#allocation5 + $0x12c] sm:$0xf0]  ;;  %v3829_v12 = vld [vmem:[#allocation5 + $0x24] sm:$0xf]  ;;  %v2628_v17 = vor.u32 %v3831_v8, %v2627_v7 }
  0x2f   :  { %562 = vmatpush.bf16.msra.mxu3 %v2808_v50  ;;  %v2629_v13 = vld [vmem:[#allocation5 + $0x30] sm:$0xf0]  ;;  %v3861_v14 = vld [vmem:[#allocation5 + $0x124] sm:$0xf]  ;;  %v2611_v16 = vld [vmem:[#allocation5] sm:$0xf]  ;;  %v2756_v21 = vor.u32 %v3863_v11, %v2755_v9 }
  0x30   :  { %524 = vmatpush.bf16.msra.mxu0 %v2660_v56  ;;  %v2757_v15 = vld [vmem:[#allocation5 + $0x130] sm:$0xf0]  ;;  %v3827_v18 = vld [vmem:[#allocation5 + $0xc] sm:$0xf0]  ;;  %v2739_v19 = vld [vmem:[#allocation5 + $0x100] sm:$0xf]  ;;  %v2632_v22 = vor.u32 %v3829_v12, %v2629_v13 }
  0x31   :  { %537 = vmatpush.bf16.msra.mxu1 %v2788_v57  ;;  %v3859_v20 = vld [vmem:[#allocation5 + $0x10c] sm:$0xf0]  ;;  %v3825_v23 = vld [vmem:[#allocation5 + $0x4] sm:$0xf]  ;;  %v2613_v24 = vld [vmem:[#allocation5 + $0x10] sm:$0xf0]  ;;  %v2760_v26 = vor.u32 %v3861_v14, %v2757_v15  ;;  %v2612_v34 = vor.u32 %v3827_v18, %v2611_v16 }
  0x32   :  { %550 = vmatpush.bf16.msra.mxu2 %v2664_v58  ;;  %v115_v25 = vld [vmem:[#allocation2] sm:$0x3]  ;;  %v3857_v27 = vld [vmem:[#allocation5 + $0x104] sm:$0xf]  ;;  %v2741_v28 = vld [vmem:[#allocation5 + $0x110] sm:$0xf0]  ;;  %v2740_v38 = vor.u32 %v3859_v20, %v2739_v19  ;;  %v2616_v39 = vor.u32 %v3825_v23, %v2613_v24 }
  0x33   :  { %563 = vmatpush.bf16.msra.mxu3 %v2792_v62  ;;  %v2731_v29 = vld [vmem:[#allocation5 + $0xe8] sm:$0xf]  ;;  %v116_v30 = vunpack.c.l.bf16 %v115_v25  ;;  %v3856_v31 = vld [vmem:[#allocation5 + $0xf4] sm:$0xf0]  ;;  %v3854_v35 = vld [vmem:[#allocation5 + $0xec] sm:$0xf]  ;;  %v2744_v42 = vor.u32 %v3857_v27, %v2741_v28 }
  0x34   :  { %525 = vmatpush.bf16.msra.mxu0 %v2644_v4  ;;  %v2859_v32 = vld [vmem:[#allocation5 + $0x1e8] sm:$0xf]  ;;  %v3888_v33 = vld [vmem:[#allocation5 + $0x1f4] sm:$0xf0]  ;;  %v2733_v36 = vld [vmem:[#allocation5 + $0xf8] sm:$0xf0]  ;;  %v2732_v43 = vor.u32 %v3856_v31, %v2731_v29 }
  0x35   :  { %538 = vmatpush.bf16.msra.mxu1 %v2772_v5  ;;  %v117_v37 = vmax.f32 %v116_v30, 0.0  ;;  %v3886_v40 = vld [vmem:[#allocation5 + $0x1ec] sm:$0xf]  ;;  %v2861_v41 = vld [vmem:[#allocation5 + $0x1f8] sm:$0xf0]  ;;  %v2860_v44 = vor.u32 %v3888_v33, %v2859_v32  ;;  %v2736_v45 = vor.u32 %v3854_v35, %v2733_v36  ;;  %s4333_s10 = smov [#allocation13]  }
  0x36   :  { %551 = vmatpush.bf16.msra.mxu2 %v2648_v6  ;;  %v2715_v46 = vld [vmem:[#allocation5 + $0xc8] sm:$0xf]  ;;  %v3852_v47 = vld [vmem:[#allocation5 + $0xd4] sm:$0xf0]  ;;  %v2864_v49 = vor.u32 %v3886_v40, %v2861_v41  ;;  %v3850_v51 = vld [vmem:[#allocation5 + $0xcc] sm:$0xf] }
  0x37   :  { %564 = vmatpush.bf16.msra.mxu3 %v2776_v10  ;;  %119 = vst [vmem:[#allocation1] ss:$4 sm:$0xff] %v117_v37  ;;  %v2843_v48 = vld [vmem:[#allocation5 + $0x1c8] sm:$0xf]  ;;  %v3884_v50 = vld [vmem:[#allocation5 + $0x1d4] sm:$0xf0]  ;;  %v2716_v53 = vor.u32 %v3852_v47, %v2715_v46 }
  0x38   :  { %526 = vmatpush.bf16.msra.mxu0 %v2628_v17  ;;  %v2717_v52 = vld [vmem:[#allocation5 + $0xd8] sm:$0xf0]  ;;  %v3882_v54 = vld [vmem:[#allocation5 + $0x1cc] sm:$0xf]  ;;  %v2844_v56 = vor.u32 %v3884_v50, %v2843_v48  ;;  %v2699_v58 = vld [vmem:[#allocation5 + $0xa8] sm:$0xf] }
  0x39   :  { %539 = vmatpush.bf16.msra.mxu1 %v2756_v21  ;;  %v2845_v55 = vld [vmem:[#allocation5 + $0x1d8] sm:$0xf0]  ;;  %v2720_v57 = vor.u32 %v3850_v51, %v2717_v52  ;;  %v3848_v59 = vld [vmem:[#allocation5 + $0xb4] sm:$0xf0]  ;;  %v2827_v60 = vld [vmem:[#allocation5 + $0x1a8] sm:$0xf] }
  0x3a   :  { %552 = vmatpush.bf16.msra.mxu2 %v2632_v22  ;;  %v3880_v61 = vld [vmem:[#allocation5 + $0x1b4] sm:$0xf0]  ;;  %v3846_v62 = vld [vmem:[#allocation5 + $0xac] sm:$0xf]  ;;  %v2701_v63 = vld [vmem:[#allocation5 + $0xb8] sm:$0xf0]  ;;  %v2848_v4 = vor.u32 %v3882_v54, %v2845_v55  ;;  %v2700_v5 = vor.u32 %v3848_v59, %v2699_v58 }
  0x3b   :  { %565 = vmatpush.bf16.msra.mxu3 %v2760_v26  ;;  %v3878_v6 = vld [vmem:[#allocation5 + $0x1ac] sm:$0xf]  ;;  %v2829_v7 = vld [vmem:[#allocation5 + $0x1b8] sm:$0xf0]  ;;  %v2828_v8 = vor.u32 %v3880_v61, %v2827_v60  ;;  %v2704_v9 = vor.u32 %v3846_v62, %v2701_v63  ;;  %v2683_v10 = vld [vmem:[#allocation5 + $0x88] sm:$0xf] }
  0x3c   :  { %527 = vmatpush.bf16.msra.mxu0 %v2612_v34  ;;  %v3844_v11 = vld [vmem:[#allocation5 + $0x94] sm:$0xf0]  ;;  %v2811_v12 = vld [vmem:[#allocation5 + $0x188] sm:$0xf]  ;;  %v3842_v14 = vld [vmem:[#allocation5 + $0x8c] sm:$0xf]  ;;  %v2832_v16 = vor.u32 %v3878_v6, %v2829_v7 }
  0x3d   :  { %540 = vmatpush.bf16.msra.mxu1 %v2740_v38  ;;  %v3876_v13 = vld [vmem:[#allocation5 + $0x194] sm:$0xf0]  ;;  %v2685_v15 = vld [vmem:[#allocation5 + $0x98] sm:$0xf0]  ;;  %v2684_v17 = vor.u32 %v3844_v11, %v2683_v10  ;;  %v3874_v18 = vld [vmem:[#allocation5 + $0x18c] sm:$0xf] }
  0x3e   :  { %553 = vmatpush.bf16.msra.mxu2 %v2616_v39  ;;  %v120_v0 = vld.sshfl [vmem:[#allocation1] sm:$0xff pattern:$0x73625140]  ;;  %v121_v1 = vld.sshfl [vmem:[#allocation1 + $0x8] sm:$0xff pattern:$0x73625140]  ;;  %v2812_v20 = vor.u32 %v3876_v13, %v2811_v12  ;;  %v2688_v21 = vor.u32 %v3842_v14, %v2685_v15 }
  0x3f   :  { %566 = vmatpush.bf16.msra.mxu3 %v2744_v42  ;;  %v4392_v2 = vpack.c.bf16 %v120_v0, %v120_v0  ;;  %v4394_v3 = vpack.c.bf16 %v121_v1, %v121_v1  ;;  %v2813_v19 = vld [vmem:[#allocation5 + $0x198] sm:$0xf0]  ;;  %v2667_v22 = vld [vmem:[#allocation5 + $0x68] sm:$0xf]  ;;  %v3840_v23 = vld [vmem:[#allocation5 + $0x74] sm:$0xf0] }
  0x40   :  { %572 = vmatpush.bf16.msrb.mxu0 %v2732_v43  ;;  %v2795_v24 = vld [vmem:[#allocation5 + $0x168] sm:$0xf]  ;;  %v3872_v25 = vld [vmem:[#allocation5 + $0x174] sm:$0xf0]  ;;  %v3838_v26 = vld [vmem:[#allocation5 + $0x6c] sm:$0xf]  ;;  %v2816_v28 = vor.u32 %v3874_v18, %v2813_v19  ;;  %v2668_v29 = vor.u32 %v3840_v23, %v2667_v22 }
  0x41   :  { %585 = vmatpush.bf16.msrb.mxu1 %v2860_v44  ;;  %528 = vmatmul.bf16.vlgmr.msra.gmra.mxu0 %v4392_v2  ;;  %v2669_v27 = vld [vmem:[#allocation5 + $0x78] sm:$0xf0]  ;;  %v3870_v30 = vld [vmem:[#allocation5 + $0x16c] sm:$0xf]  ;;  %v2796_v32 = vor.u32 %v3872_v25, %v2795_v24  ;;  %v2651_v34 = vld [vmem:[#allocation5 + $0x48] sm:$0xf] }
  0x42   :  { %598 = vmatpush.bf16.msrb.mxu2 %v2736_v45  ;;  %541 = vmatmul.bf16.vlgmr.msra.gmra.mxu1 %v4394_v3  ;;  %v2797_v31 = vld [vmem:[#allocation5 + $0x178] sm:$0xf0]  ;;  %v2672_v33 = vor.u32 %v3838_v26, %v2669_v27  ;;  %v3836_v35 = vld [vmem:[#allocation5 + $0x54] sm:$0xf0]  ;;  %v2779_v36 = vld [vmem:[#allocation5 + $0x148] sm:$0xf] }
  0x43   :  { %611 = vmatpush.bf16.msrb.mxu3 %v2864_v49  ;;  %554 = vmatmul.bf16.vlgmr.msra.gmra.mxu2 %v4392_v2  ;;  %v3868_v37 = vld [vmem:[#allocation5 + $0x154] sm:$0xf0]  ;;  %v3834_v38 = vld [vmem:[#allocation5 + $0x4c] sm:$0xf]  ;;  %v2653_v39 = vld [vmem:[#allocation5 + $0x58] sm:$0xf0]  ;;  %v2800_v40 = vor.u32 %v3870_v30, %v2797_v31  ;;  %v2652_v41 = vor.u32 %v3836_v35, %v2651_v34 }
  0x44   :  { %573 = vmatpush.bf16.msrb.mxu0 %v2716_v53  ;;  %567 = vmatmul.bf16.vlgmr.msra.gmra.mxu3 %v4394_v3  ;;  %v3866_v42 = vld [vmem:[#allocation5 + $0x14c] sm:$0xf]  ;;  %v2781_v43 = vld [vmem:[#allocation5 + $0x158] sm:$0xf0]  ;;  %v2780_v44 = vor.u32 %v3868_v37, %v2779_v36  ;;  %v2656_v45 = vor.u32 %v3834_v38, %v2653_v39  ;;  %v2635_v46 = vld [vmem:[#allocation5 + $0x28] sm:$0xf] }
  0x45   :  { %586 = vmatpush.bf16.msrb.mxu1 %v2844_v56  ;;  %v3832_v47 = vld [vmem:[#allocation5 + $0x34] sm:$0xf0]  ;;  %v2763_v48 = vld [vmem:[#allocation5 + $0x128] sm:$0xf]  ;;  %v3830_v50 = vld [vmem:[#allocation5 + $0x2c] sm:$0xf]  ;;  %v2784_v52 = vor.u32 %v3866_v42, %v2781_v43 }
  0x46   :  { %599 = vmatpush.bf16.msrb.mxu2 %v2720_v57  ;;  %v3864_v49 = vld [vmem:[#allocation5 + $0x134] sm:$0xf0]  ;;  %v2637_v51 = vld [vmem:[#allocation5 + $0x38] sm:$0xf0]  ;;  %v2636_v53 = vor.u32 %v3832_v47, %v2635_v46  ;;  %v3862_v54 = vld [vmem:[#allocation5 + $0x12c] sm:$0xf] }
  0x47   :  { %612 = vmatpush.bf16.msrb.mxu3 %v2848_v4  ;;  %v2765_v55 = vld [vmem:[#allocation5 + $0x138] sm:$0xf0]  ;;  %v2619_v56 = vld [vmem:[#allocation5 + $0x8] sm:$0xf]  ;;  %v2764_v57 = vor.u32 %v3864_v49, %v2763_v48  ;;  %v2640_v58 = vor.u32 %v3830_v50, %v2637_v51  ;;  %v3828_v59 = vld [vmem:[#allocation5 + $0x14] sm:$0xf0] }
  0x48   :  { %574 = vmatpush.bf16.msrb.mxu0 %v2700_v5  ;;  %v2747_v60 = vld [vmem:[#allocation5 + $0x108] sm:$0xf]  ;;  %v3860_v61 = vld [vmem:[#allocation5 + $0x114] sm:$0xf0]  ;;  %v3826_v62 = vld [vmem:[#allocation5 + $0xc] sm:$0xf]  ;;  %v2768_v6 = vor.u32 %v3862_v54, %v2765_v55  ;;  %v2620_v7 = vor.u32 %v3828_v59, %v2619_v56 }
  0x49   :  { %587 = vmatpush.bf16.msrb.mxu1 %v2828_v8  ;;  %v2621_v63 = vld [vmem:[#allocation5 + $0x18] sm:$0xf0]  ;;  %v3035_v0 = vld [vmem:[#allocation8 + $0x150] sm:$0xf]  ;;  %v3934_v1 = vld [vmem:[#allocation8 + $0x164] sm:$0xf0]  ;;  %v2748_v8 = vor.u32 %v3860_v61, %v2747_v60 }
  0x4a   :  { %600 = vmatpush.bf16.msrb.mxu2 %v2704_v9  ;;  %v3227_v4 = vld [vmem:[#allocation8 + $0x2d0] sm:$0xf]  ;;  %v3982_v5 = vld [vmem:[#allocation8 + $0x2e4] sm:$0xf0]  ;;  %v2624_v9 = vor.u32 %v3826_v62, %v2621_v63  ;;  %v2749_v11 = vld [vmem:[#allocation5 + $0x118] sm:$0xf0]  ;;  %v3036_v12 = vor.u32 %v3934_v1, %v3035_v0 }
  0x4b   :  { %613 = vmatpush.bf16.msrb.mxu3 %v2832_v16  ;;  %v3858_v10 = vld [vmem:[#allocation5 + $0x10c] sm:$0xf]  ;;  %v3011_v13 = vld [vmem:[#allocation8 + $0x120] sm:$0xf]  ;;  %v3228_v14 = vor.u32 %v3982_v5, %v3227_v4  ;;  %v3419_v15 = vld [vmem:[#allocation8 + $0x450] sm:$0xf] }
  0x4c   :  { %575 = vmatpush.bf16.msrb.mxu0 %v2684_v17  ;;  %v4030_v16 = vld [vmem:[#allocation8 + $0x464] sm:$0xf0]  ;;  %v3928_v17 = vld [vmem:[#allocation8 + $0x134] sm:$0xf0]  ;;  %v3203_v18 = vld [vmem:[#allocation8 + $0x2a0] sm:$0xf] }
  0x4d   :  { %588 = vmatpush.bf16.msrb.mxu1 %v2812_v20  ;;  %v3976_v19 = vld [vmem:[#allocation8 + $0x2b4] sm:$0xf0]  ;;  %v3420_v20 = vor.u32 %v4030_v16, %v3419_v15  ;;  %v3395_v22 = vld [vmem:[#allocation8 + $0x420] sm:$0xf]  ;;  %v3012_v24 = vor.u32 %v3928_v17, %v3011_v13  ;;  %v2987_v25 = vld [vmem:[#allocation8 + $0xf0] sm:$0xf] }
  0x4e   :  { %601 = vmatpush.bf16.msrb.mxu2 %v2688_v21  ;;  %v2752_v21 = vor.u32 %v3858_v10, %v2749_v11  ;;  %v4024_v23 = vld [vmem:[#allocation8 + $0x434] sm:$0xf0]  ;;  %v3922_v26 = vld [vmem:[#allocation8 + $0x104] sm:$0xf0]  ;;  %v3204_v27 = vor.u32 %v3976_v19, %v3203_v18  ;;  %v3611_v31 = vld [vmem:[#allocation8 + $0x5d0] sm:$0xf] }
  0x4f   :  { %614 = vmatpush.bf16.msrb.mxu3 %v2816_v28  ;;  %v3179_v28 = vld [vmem:[#allocation8 + $0x270] sm:$0xf]  ;;  %v3396_v30 = vor.u32 %v4024_v23, %v3395_v22  ;;  %v4018_v35 = vld [vmem:[#allocation8 + $0x404] sm:$0xf0]  ;;  %v2988_v36 = vor.u32 %v3922_v26, %v2987_v25  ;;  %v2963_v37 = vld [vmem:[#allocation8 + $0xc0] sm:$0xf] }
  0x50   :  { %576 = vmatpush.bf16.msrb.mxu0 %v2668_v29  ;;  %v3970_v29 = vld [vmem:[#allocation8 + $0x284] sm:$0xf0]  ;;  %v3371_v34 = vld [vmem:[#allocation8 + $0x3f0] sm:$0xf]  ;;  %v3916_v38 = vld [vmem:[#allocation8 + $0xd4] sm:$0xf0] }
  0x51   :  { %589 = vmatpush.bf16.msrb.mxu1 %v2796_v32  ;;  %v4078_v32 = vld [vmem:[#allocation8 + $0x5e4] sm:$0xf0]  ;;  %v3180_v39 = vor.u32 %v3970_v29, %v3179_v28  ;;  %v3372_v42 = vor.u32 %v4018_v35, %v3371_v34  ;;  %v3587_v43 = vld [vmem:[#allocation8 + $0x5a0] sm:$0xf]  ;;  %v4012_v46 = vld [vmem:[#allocation8 + $0x3d4] sm:$0xf0]  ;;  %v2964_v47 = vor.u32 %v3916_v38, %v2963_v37 }
  0x52   :  { %602 = vmatpush.bf16.msrb.mxu2 %v2672_v33  ;;  %v3612_v33 = vor.u32 %v4078_v32, %v3611_v31  ;;  %v2939_v48 = vld [vmem:[#allocation8 + $0x90] sm:$0xf]  ;;  %v3910_v49 = vld [vmem:[#allocation8 + $0xa4] sm:$0xf0]  ;;  %v2915_v59 = vld [vmem:[#allocation8 + $0x60] sm:$0xf] }
  0x53   :  { %615 = vmatpush.bf16.msrb.mxu3 %v2800_v40  ;;  %v3155_v40 = vld [vmem:[#allocation8 + $0x240] sm:$0xf]  ;;  %v3131_v51 = vld [vmem:[#allocation8 + $0x210] sm:$0xf]  ;;  %v4066_v54 = vld [vmem:[#allocation8 + $0x584] sm:$0xf0] }
  0x54   :  { %577 = vmatpush.bf16.msrb.mxu0 %v2652_v41  ;;  %v3964_v41 = vld [vmem:[#allocation8 + $0x254] sm:$0xf0]  ;;  %v3323_v56 = vld [vmem:[#allocation8 + $0x390] sm:$0xf]  ;;  %v3107_v62 = vld [vmem:[#allocation8 + $0x1e0] sm:$0xf] }
  0x55   :  { %590 = vmatpush.bf16.msrb.mxu1 %v2780_v44  ;;  %v4072_v44 = vld [vmem:[#allocation8 + $0x5b4] sm:$0xf0]  ;;  %v3156_v50 = vor.u32 %v3964_v41, %v3155_v40  ;;  %v3539_v1 = vld [vmem:[#allocation8 + $0x540] sm:$0xf]  ;;  %v3083_v10 = vld [vmem:[#allocation8 + $0x1b0] sm:$0xf] }
  0x56   :  { %603 = vmatpush.bf16.msrb.mxu2 %v2656_v45  ;;  %v3588_v45 = vor.u32 %v4072_v44, %v3587_v43  ;;  %v3904_v60 = vld [vmem:[#allocation8 + $0x74] sm:$0xf0]  ;;  %v3946_v11 = vld [vmem:[#allocation8 + $0x1c4] sm:$0xf0]  ;;  %v2867_v13 = vld [vmem:[#allocation8] sm:$0xf] }
  0x57   :  { %616 = vmatpush.bf16.msrb.mxu3 %v2784_v52  ;;  %v3958_v52 = vld [vmem:[#allocation8 + $0x224] sm:$0xf0]  ;;  %v3952_v63 = vld [vmem:[#allocation8 + $0x1f4] sm:$0xf0]  ;;  %v3084_v15 = vor.u32 %v3946_v11, %v3083_v10  ;;  %v3931_v16 = vld [vmem:[#allocation8 + $0x154] sm:$0xf] }
  0x58   :  { %578 = vmatpush.bf16.msrb.mxu0 %v2636_v53  ;;  %v3132_v61 = vor.u32 %v3958_v52, %v3131_v51  ;;  %v4060_v4 = vld [vmem:[#allocation8 + $0x554] sm:$0xf0]  ;;  %v3059_v17 = vld [vmem:[#allocation8 + $0x180] sm:$0xf]  ;;  %v3037_v19 = vld [vmem:[#allocation8 + $0x168] sm:$0xf0] }
  0x59   :  { %591 = vmatpush.bf16.msrb.mxu1 %v2764_v57  ;;  %v4006_v57 = vld [vmem:[#allocation8 + $0x3a4] sm:$0xf0]  ;;  %v3540_v5 = vor.u32 %v4060_v4, %v3539_v1  ;;  %v3940_v18 = vld [vmem:[#allocation8 + $0x194] sm:$0xf0]  ;;  %v3925_v25 = vld [vmem:[#allocation8 + $0x124] sm:$0xf] }
  0x5a   :  { %604 = vmatpush.bf16.msrb.mxu2 %v2640_v58  ;;  %v2940_v58 = vor.u32 %v3910_v49, %v2939_v48  ;;  %v3324_v0 = vor.u32 %v4006_v57, %v3323_v56  ;;  %v3060_v23 = vor.u32 %v3940_v18, %v3059_v17  ;;  %v3973_v28 = vld [vmem:[#allocation8 + $0x2a4] sm:$0xf]  ;;  %v3205_v29 = vld [vmem:[#allocation8 + $0x2b8] sm:$0xf0]  ;;  %v3919_v31 = vld [vmem:[#allocation8 + $0xf4] sm:$0xf] }
  0x5b   :  { %617 = vmatpush.bf16.msrb.mxu3 %v2768_v6  ;;  %v2916_v6 = vor.u32 %v3904_v60, %v2915_v59  ;;  %v3208_v32 = vor.u32 %v3973_v28, %v3205_v29  ;;  %v3967_v34 = vld [vmem:[#allocation8 + $0x274] sm:$0xf]  ;;  %v3181_v35 = vld [vmem:[#allocation8 + $0x288] sm:$0xf0]  ;;  %v3913_v37 = vld [vmem:[#allocation8 + $0xc4] sm:$0xf] }
  0x5c   :  { %579 = vmatpush.bf16.msrb.mxu0 %v2620_v7  ;;  %v2891_v7 = vld [vmem:[#allocation8 + $0x30] sm:$0xf]  ;;  %v3184_v38 = vor.u32 %v3967_v34, %v3181_v35  ;;  %v3961_v40 = vld [vmem:[#allocation8 + $0x244] sm:$0xf]  ;;  %v3157_v41 = vld [vmem:[#allocation8 + $0x258] sm:$0xf0] }
  0x5d   :  { %592 = vmatpush.bf16.msrb.mxu1 %v2748_v8  ;;  %v3108_v8 = vor.u32 %v3952_v63, %v3107_v62  ;;  %v3160_v43 = vor.u32 %v3961_v40, %v3157_v41  ;;  %v3907_v44 = vld [vmem:[#allocation8 + $0x94] sm:$0xf]  ;;  %v3901_v48 = vld [vmem:[#allocation8 + $0x64] sm:$0xf]  ;;  %v3515_v52 = vld [vmem:[#allocation8 + $0x510] sm:$0xf] }
  0x5e   :  { %605 = vmatpush.bf16.msrb.mxu2 %v2624_v9  ;;  %v3898_v9 = vld [vmem:[#allocation8 + $0x44] sm:$0xf0]  ;;  %v3275_v57 = vld [vmem:[#allocation8 + $0x330] sm:$0xf]  ;;  %v3895_v59 = vld [vmem:[#allocation8 + $0x34] sm:$0xf] }
  0x5f   :  { %580 = vmatmul.bf16.vlgmr.msrb.gmra.mxu0 %v4392_v2  ;;  %618 = vmatpush.bf16.msrb.mxu3 %v2752_v21  ;;  %v3229_v21 = vld [vmem:[#allocation8 + $0x2e8] sm:$0xf0]  ;;  %v3491_v63 = vld [vmem:[#allocation8 + $0x4e0] sm:$0xf]  ;;  %v3949_v1 = vld [vmem:[#allocation8 + $0x1e4] sm:$0xf] }
  0x60   :  { %1798 = vmatpush.bf16.msra.mxu0 %v3036_v12  ;;  %593 = vmatmul.bf16.vlgmr.msrb.gmra.mxu1 %v4394_v3  ;;  %v2892_v12 = vor.u32 %v3898_v9, %v2891_v7  ;;  %v3251_v7 = vld [vmem:[#allocation8 + $0x300] sm:$0xf]  ;;  %v3889_v10 = vld [vmem:[#allocation8 + $0x4] sm:$0xf]  ;;  %v2869_v11 = vld [vmem:[#allocation8 + $0x18] sm:$0xf0] }
  0x61   :  { %1811 = vmatpush.bf16.msra.mxu1 %v3228_v14  ;;  %606 = vmatmul.bf16.vlgmr.msrb.gmra.mxu2 %v4392_v2  ;;  %v3347_v2 = vld [vmem:[#allocation8 + $0x3c0] sm:$0xf]  ;;  %v3892_v14 = vld [vmem:[#allocation8 + $0x14] sm:$0xf0]  ;;  %v4042_v17 = vld [vmem:[#allocation8 + $0x4c4] sm:$0xf0] }
  0x62   :  { %1824 = vmatpush.bf16.msra.mxu2 %v3420_v20  ;;  %619 = vmatmul.bf16.vlgmr.msrb.gmra.mxu3 %v4394_v3  ;;  %v3348_v53 = vor.u32 %v4012_v46, %v3347_v2  ;;  %v3563_v3 = vld [vmem:[#allocation8 + $0x570] sm:$0xf]  ;;  %v3979_v20 = vld [vmem:[#allocation8 + $0x2d4] sm:$0xf]  ;;  %v2868_v22 = vor.u32 %v3892_v14, %v2867_v13  ;;  %v3299_v46 = vld [vmem:[#allocation8 + $0x360] sm:$0xf]  ;;  %v2872_v13 = vor.u32 %v3889_v10, %v2869_v11 }
  0x63   :  { %1837 = vmatpush.bf16.msra.mxu3 %v3612_v33  ;;  %v3564_v55 = vor.u32 %v4066_v54, %v3563_v3  ;;  %v3232_v26 = vor.u32 %v3979_v20, %v3229_v21  ;;  %v2989_v33 = vld [vmem:[#allocation8 + $0x108] sm:$0xf0]  ;;  %v3955_v3 = vld [vmem:[#allocation8 + $0x214] sm:$0xf]  ;;  %v3937_v28 = vld [vmem:[#allocation8 + $0x184] sm:$0xf] }
  0x64   :  { %1799 = vmatpush.bf16.msra.mxu0 %v3012_v24  ;;  %v3040_v24 = vor.u32 %v3931_v16, %v3037_v19  ;;  %v3421_v14 = vld [vmem:[#allocation8 + $0x468] sm:$0xf0]  ;;  %v3467_v16 = vld [vmem:[#allocation8 + $0x4b0] sm:$0xf]  ;;  %v3943_v18 = vld [vmem:[#allocation8 + $0x1b4] sm:$0xf] }
  0x65   :  { %1812 = vmatpush.bf16.msra.mxu1 %v3204_v27  ;;  %v3013_v27 = vld [vmem:[#allocation8 + $0x138] sm:$0xf0]  ;;  %v3468_v19 = vor.u32 %v4042_v17, %v3467_v16  ;;  %v3085_v20 = vld [vmem:[#allocation8 + $0x1c8] sm:$0xf0]  ;;  %v4015_v34 = vld [vmem:[#allocation8 + $0x3f4] sm:$0xf] }
  0x66   :  { %1825 = vmatpush.bf16.msra.mxu2 %v3396_v30  ;;  %v3016_v30 = vor.u32 %v3925_v25, %v3013_v27  ;;  %v3088_v21 = vor.u32 %v3943_v18, %v3085_v20  ;;  %v3443_v25 = vld [vmem:[#allocation8 + $0x480] sm:$0xf]  ;;  %v3061_v29 = vld [vmem:[#allocation8 + $0x198] sm:$0xf0]  ;;  %v3373_v35 = vld [vmem:[#allocation8 + $0x408] sm:$0xf0] }
  0x67   :  { %1838 = vmatpush.bf16.msra.mxu3 %v3588_v45  ;;  %v2941_v45 = vld [vmem:[#allocation8 + $0xa8] sm:$0xf0]  ;;  %v4009_v40 = vld [vmem:[#allocation8 + $0x3c4] sm:$0xf]  ;;  %v3349_v41 = vld [vmem:[#allocation8 + $0x3d8] sm:$0xf0] }
  0x68   :  { %1800 = vmatpush.bf16.msra.mxu0 %v2988_v36  ;;  %v2992_v36 = vor.u32 %v3919_v31, %v2989_v33  ;;  %v2944_v2 = vor.u32 %v3907_v44, %v2941_v45  ;;  %v3064_v31 = vor.u32 %v3937_v28, %v3061_v29  ;;  %v3565_v44 = vld [vmem:[#allocation8 + $0x588] sm:$0xf0]  ;;  %v3253_v10 = vld [vmem:[#allocation8 + $0x318] sm:$0xf0]  ;;  %v3019_v20 = vld [vmem:[#allocation8 + $0x128] sm:$0xf] }
  0x69   :  { %1813 = vmatpush.bf16.msra.mxu1 %v3180_v39  ;;  %v2965_v39 = vld [vmem:[#allocation8 + $0xd8] sm:$0xf0]  ;;  %v3469_v16 = vld [vmem:[#allocation8 + $0x4c8] sm:$0xf0]  ;;  %v4033_v28 = vld [vmem:[#allocation8 + $0x484] sm:$0xf] }
  0x6a   :  { %1826 = vmatpush.bf16.msra.mxu2 %v3372_v42  ;;  %v2968_v42 = vor.u32 %v3913_v37, %v2965_v39  ;;  %v4069_v37 = vld [vmem:[#allocation8 + $0x5a4] sm:$0xf]  ;;  %v3445_v29 = vld [vmem:[#allocation8 + $0x498] sm:$0xf0]  ;;  %s2594_s11 = sshll.u32 %s4333_s10, 4  ;;  %s2596_s14 = sshll.u32 %s4469_s7, 4  ;;  %s2595_s11 = int_to_ptr.vmem [resolvable:$true] %s2594_s11  ;;  %s2597_s14 = int_to_ptr.hbm [resolvable:$true] %s2596_s14 }
  0x6b   :  { %1839 = vmatpush.bf16.msra.mxu3 %v3564_v55  ;;  %v3133_v55 = vld [vmem:[#allocation8 + $0x228] sm:$0xf0] }
  0x6c   :  { %1801 = vmatpush.bf16.msra.mxu0 %v2964_v47  ;;  %v4000_v47 = vld [vmem:[#allocation8 + $0x374] sm:$0xf0]  ;;  %v3136_v56 = vor.u32 %v3955_v3, %v3133_v55  ;;  %v4051_v55 = vld [vmem:[#allocation8 + $0x514] sm:$0xf] }
  0x6d   :  { %1814 = vmatpush.bf16.msra.mxu1 %v3156_v50  ;;  %v3300_v49 = vor.u32 %v4000_v47, %v3299_v46  ;;  %v2917_v50 = vld [vmem:[#allocation8 + $0x78] sm:$0xf0]  ;;  %v3325_v46 = vld [vmem:[#allocation8 + $0x3a8] sm:$0xf0] }
  0x6e   :  { %1827 = vmatpush.bf16.msra.mxu2 %v3348_v53  ;;  %v2920_v51 = vor.u32 %v3901_v48, %v2917_v50  ;;  %v4054_v53 = vld [vmem:[#allocation8 + $0x524] sm:$0xf0]  ;;  %v4057_v48 = vld [vmem:[#allocation8 + $0x544] sm:$0xf]  ;;  %v4404_v50 = vld [vmem:[#allocation7] sm:$0xf] }
  0x6f   :  { %1840 = vmatpush.bf16.msra.mxu3 %v3540_v5  ;;  %v3516_v54 = vor.u32 %v4054_v53, %v3515_v52  ;;  %v3109_v5 = vld [vmem:[#allocation8 + $0x1f8] sm:$0xf0]  ;;  %v3997_v52 = vld [vmem:[#allocation8 + $0x364] sm:$0xf] }
  0x70   :  { %1802 = vmatpush.bf16.msra.mxu0 %v2940_v58  ;;  %v3994_v58 = vld [vmem:[#allocation8 + $0x344] sm:$0xf0]  ;;  %v3301_v53 = vld [vmem:[#allocation8 + $0x378] sm:$0xf0] }
  0x71   :  { %1815 = vmatpush.bf16.msra.mxu1 %v3132_v61  ;;  %v3276_v60 = vor.u32 %v3994_v58, %v3275_v57  ;;  %v2893_v61 = vld [vmem:[#allocation8 + $0x48] sm:$0xf0]  ;;  %v3304_v3 = vor.u32 %v3997_v52, %v3301_v53  ;;  %v3991_v58 = vld [vmem:[#allocation8 + $0x334] sm:$0xf]  ;;  %v3965_v52 = vld [vmem:[#allocation8 + $0x25c] sm:$0xf0] }
  0x72   :  { %1828 = vmatpush.bf16.msra.mxu2 %v3324_v0  ;;  %v2896_v62 = vor.u32 %v3895_v59, %v2893_v61  ;;  %v4048_v0 = vld [vmem:[#allocation8 + $0x4f4] sm:$0xf0]  ;;  %v3277_v59 = vld [vmem:[#allocation8 + $0x348] sm:$0xf0] }
  0x73   :  { %1841 = vmatpush.bf16.msra.mxu3 %v3516_v54  ;;  %v3492_v4 = vor.u32 %v4048_v0, %v3491_v63  ;;  %v192_v54 = vperm.slane %v4404_v50, 0  ;;  %v3280_v61 = vor.u32 %v3991_v58, %v3277_v59  ;;  %v4045_v0 = vld [vmem:[#allocation8 + $0x4e4] sm:$0xf]  ;;  %v3139_v58 = vld [vmem:[#allocation8 + $0x218] sm:$0xf] }
  0x74   :  { %1803 = vmatpush.bf16.msra.mxu0 %v2916_v6  ;;  %v3112_v6 = vor.u32 %v3949_v1, %v3109_v5  ;;  %v3493_v1 = vld [vmem:[#allocation8 + $0x4f8] sm:$0xf0]  ;;  %v3043_v5 = vld [vmem:[#allocation8 + $0x158] sm:$0xf]  ;;  %v3959_v59 = vld [vmem:[#allocation8 + $0x22c] sm:$0xf0] }
  0x75   :  { %1816 = vmatpush.bf16.msra.mxu1 %v3108_v8  ;;  %v3988_v8 = vld [vmem:[#allocation8 + $0x314] sm:$0xf0] }
  0x76   :  { %1829 = vmatpush.bf16.msra.mxu2 %v3300_v49  ;;  %v3252_v9 = vor.u32 %v3988_v8, %v3251_v7  ;;  %v3541_v49 = vld [vmem:[#allocation8 + $0x558] sm:$0xf0]  ;;  %v3935_v8 = vld [vmem:[#allocation8 + $0x16c] sm:$0xf0] }
  0x77   :  { %1842 = vmatpush.bf16.msra.mxu3 %v3492_v4  ;;  %v193_v4 = vperm.slane %v4404_v50, 1 }
  0x78   :  { %1804 = vmatpush.bf16.msra.mxu0 %v2892_v12  ;;  %v4027_v12 = vld [vmem:[#allocation8 + $0x454] sm:$0xf] }
  0x79   :  { %1817 = vmatpush.bf16.msra.mxu1 %v3084_v15  ;;  %v3424_v15 = vor.u32 %v4027_v12, %v3421_v14  ;;  %v3044_v14 = vor.u32 %v3935_v8, %v3043_v5  ;;  %v3427_v5 = vld [vmem:[#allocation8 + $0x458] sm:$0xf]  ;;  %v3953_v8 = vld [vmem:[#allocation8 + $0x1fc] sm:$0xf0] }
  0x7a   :  { %1830 = vmatpush.bf16.msra.mxu2 %v3276_v60 }
  0x7b   :  { %1843 = vmatpush.bf16.msra.mxu3 %v3468_v19 }
  0x7c   :  { %1805 = vmatpush.bf16.msra.mxu0 %v2868_v22  ;;  %v4021_v22 = vld [vmem:[#allocation8 + $0x424] sm:$0xf] }
  0x7d   :  { %1818 = vmatpush.bf16.msra.mxu1 %v3060_v23  ;;  %v3397_v23 = vld [vmem:[#allocation8 + $0x438] sm:$0xf0] }
  0x7e   :  { %1831 = vmatpush.bf16.msra.mxu2 %v3252_v9  ;;  %v3985_v9 = vld [vmem:[#allocation8 + $0x304] sm:$0xf] }
  0x7f   :  { %v3256_v11 = vor.u32 %v3985_v9, %v3253_v10 }
  0x80   :  { %1850 = vmatpush.bf16.msrb.mxu0 %v3040_v24  ;;  %v3400_v24 = vor.u32 %v4021_v22, %v3397_v23  ;;  %v3235_v23 = vld [vmem:[#allocation8 + $0x2d8] sm:$0xf] }
  0x81   :  { %1863 = vmatpush.bf16.msrb.mxu1 %v3232_v26  ;;  %v4036_v26 = vld [vmem:[#allocation8 + $0x494] sm:$0xf0] }
  0x82   :  { %1876 = vmatpush.bf16.msrb.mxu2 %v3424_v15  ;;  %v3444_v27 = vor.u32 %v4036_v26, %v3443_v25  ;;  %v4039_v15 = vld [vmem:[#allocation8 + $0x4b4] sm:$0xf]  ;;  %v3983_v26 = vld [vmem:[#allocation8 + $0x2ec] sm:$0xf0] }
  0x83   :  { %v3472_v22 = vor.u32 %v4039_v15, %v3469_v16  ;;  %v3932_v15 = vld [vmem:[#allocation8 + $0x15c] sm:$0xf] }
  0x84   :  { %1851 = vmatpush.bf16.msrb.mxu0 %v3016_v30  ;;  %v4075_v30 = vld [vmem:[#allocation8 + $0x5d4] sm:$0xf]  ;;  %1844 = vmatpush.bf16.msra.mxu3 %v3444_v27 }
  0x85   :  { %1864 = vmatpush.bf16.msrb.mxu1 %v3208_v32  ;;  %v3613_v32 = vld [vmem:[#allocation8 + $0x5e8] sm:$0xf0] }
  0x86   :  { %1877 = vmatpush.bf16.msrb.mxu2 %v3400_v24  ;;  %v3616_v33 = vor.u32 %v4075_v30, %v3613_v32 }
  0x88   :  { %1852 = vmatpush.bf16.msrb.mxu0 %v2992_v36  ;;  %v3376_v36 = vor.u32 %v4015_v34, %v3373_v35  ;;  %1889 = vmatpush.bf16.msrb.mxu3 %v3616_v33  ;;  %v2995_v33 = vld [vmem:[#allocation8 + $0xf8] sm:$0xf]  ;;  %v3923_v34 = vld [vmem:[#allocation8 + $0x10c] sm:$0xf0]  ;;  %v3236_v35 = vor.u32 %v3983_v26, %v3235_v23 }
  0x89   :  { %1865 = vmatpush.bf16.msrb.mxu1 %v3184_v38  ;;  %v3589_v38 = vld [vmem:[#allocation8 + $0x5b8] sm:$0xf0] }
  0x8a   :  { %1878 = vmatpush.bf16.msrb.mxu2 %v3376_v36  ;;  %v3592_v39 = vor.u32 %v4069_v37, %v3589_v38  ;;  %v3211_v37 = vld [vmem:[#allocation8 + $0x2a8] sm:$0xf]  ;;  %v3977_v38 = vld [vmem:[#allocation8 + $0x2bc] sm:$0xf0] }
  0x8c   :  { %1853 = vmatpush.bf16.msrb.mxu0 %v2968_v42  ;;  %v3352_v42 = vor.u32 %v4009_v40, %v3349_v41  ;;  %1890 = vmatpush.bf16.msrb.mxu3 %v3592_v39  ;;  %v2996_v39 = vor.u32 %v3923_v34, %v2995_v33 }
  0x8d   :  { %1866 = vmatpush.bf16.msrb.mxu1 %v3160_v43  ;;  %v4063_v43 = vld [vmem:[#allocation8 + $0x574] sm:$0xf] }
  0x8e   :  { %1879 = vmatpush.bf16.msrb.mxu2 %v3352_v42  ;;  %v3568_v45 = vor.u32 %v4063_v43, %v3565_v44  ;;  %v2971_v42 = vld [vmem:[#allocation8 + $0xc8] sm:$0xf]  ;;  %v3917_v43 = vld [vmem:[#allocation8 + $0xdc] sm:$0xf0]  ;;  %v3212_v44 = vor.u32 %v3977_v38, %v3211_v37  ;;  %v3619_v37 = vld [vmem:[#allocation8 + $0x5d8] sm:$0xf] }
  0x8f   :  { %v4079_v38 = vld [vmem:[#allocation8 + $0x5ec] sm:$0xf0] }
  0x90   :  { %1854 = vmatpush.bf16.msrb.mxu0 %v2944_v2  ;;  %v4003_v2 = vld [vmem:[#allocation8 + $0x394] sm:$0xf]  ;;  %1891 = vmatpush.bf16.msrb.mxu3 %v3568_v45  ;;  %v3187_v45 = vld [vmem:[#allocation8 + $0x278] sm:$0xf] }
  0x91   :  { %1867 = vmatpush.bf16.msrb.mxu1 %v3136_v56  ;;  %v3328_v47 = vor.u32 %v4003_v2, %v3325_v46  ;;  %v3517_v56 = vld [vmem:[#allocation8 + $0x528] sm:$0xf0]  ;;  %v3971_v2 = vld [vmem:[#allocation8 + $0x28c] sm:$0xf0]  ;;  %v2972_v46 = vor.u32 %v3917_v43, %v2971_v42  ;;  %v3980_v43 = vld [vmem:[#allocation8 + $0x2dc] sm:$0xf] }
  0x92   :  { %v3520_v57 = vor.u32 %v4051_v55, %v3517_v56  ;;  %v3905_v55 = vld [vmem:[#allocation8 + $0x7c] sm:$0xf0] }
  0x93   :  { %1880 = vmatpush.bf16.msrb.mxu2 %v3328_v47  ;;  %v2947_v47 = vld [vmem:[#allocation8 + $0x98] sm:$0xf] }
  0x94   :  { %1855 = vmatpush.bf16.msrb.mxu0 %v2920_v51  ;;  %v3544_v51 = vor.u32 %v4057_v48, %v3541_v49  ;;  %v3911_v48 = vld [vmem:[#allocation8 + $0xac] sm:$0xf0]  ;;  %v3188_v49 = vor.u32 %v3971_v2, %v3187_v45  ;;  %v3620_v2 = vor.u32 %v4079_v38, %v3619_v37  ;;  %v3896_v37 = vld [vmem:[#allocation8 + $0x3c] sm:$0xf] }
  0x95   :  { %1868 = vmatpush.bf16.msrb.mxu1 %v3112_v6  ;;  %v3496_v6 = vor.u32 %v4045_v0, %v3493_v1  ;;  %v2948_v53 = vor.u32 %v3911_v48, %v2947_v47  ;;  %v3899_v0 = vld [vmem:[#allocation8 + $0x4c] sm:$0xf0] }
  0x96   :  { %1892 = vmatpush.bf16.msrb.mxu3 %v3544_v51  ;;  %v3163_v51 = vld [vmem:[#allocation8 + $0x248] sm:$0xf] }
  0x97   :  { %1881 = vmatpush.bf16.msrb.mxu2 %v3304_v3  ;;  %v194_v3 = vperm.slane %v4404_v50, 2  ;;  %v3164_v56 = vor.u32 %v3965_v52, %v3163_v51  ;;  %v2997_v51 = vld [vmem:[#allocation8 + $0x110] sm:$0xf0]  ;;  %v3595_v52 = vld [vmem:[#allocation8 + $0x5a8] sm:$0xf] }
  0x98   :  { %1856 = vmatpush.bf16.msrb.mxu0 %v2896_v62 }
  0x99   :  { %1869 = vmatpush.bf16.msrb.mxu1 %v3088_v21  ;;  %v3929_v21 = vld [vmem:[#allocation8 + $0x13c] sm:$0xf0] }
  0x9a   :  { %1893 = vmatpush.bf16.msrb.mxu3 %v3520_v57  ;;  %v3020_v30 = vor.u32 %v3929_v21, %v3019_v20  ;;  %v3403_v20 = vld [vmem:[#allocation8 + $0x428] sm:$0xf]  ;;  %v4025_v21 = vld [vmem:[#allocation8 + $0x43c] sm:$0xf0] }
  0x9b   :  { %1882 = vmatpush.bf16.msrb.mxu2 %v3280_v61 }
  0x9c   :  { %1857 = vmatpush.bf16.msrb.mxu0 %v2872_v13 }
  0x9d   :  { %1870 = vmatpush.bf16.msrb.mxu1 %v3064_v31  ;;  %v3448_v31 = vor.u32 %v4033_v28, %v3445_v29 }
  0x9e   :  { %1894 = vmatpush.bf16.msrb.mxu3 %v3496_v6  ;;  %v4031_v6 = vld [vmem:[#allocation8 + $0x46c] sm:$0xf0] }
  0x9f   :  { %1883 = vmatpush.bf16.msrb.mxu2 %v3256_v11  ;;  %v195_v11 = vperm.slane %v4404_v50, 3 }
  0xa2   :  { %1895 = vmatpush.bf16.msrb.mxu3 %v3472_v22 }
  0xa6   :  { %1896 = vmatpush.bf16.msrb.mxu3 %v3448_v31  ;;  %v3926_v31 = vld [vmem:[#allocation8 + $0x12c] sm:$0xf] }
  0xbe   :  { %v529_v60 = vpop.f32.mrf.mxu0 }
  0xbf   :  { %v530_v62 = vadd.f32 %v529_v60, %v192_v54  ;;  %v542_v63 = vpop.f32.mrf.mxu1  ;;  %v2923_v54 = vld [vmem:[#allocation8 + $0x68] sm:$0xf] }
  0xc1   :  { %v543_v7 = vadd.f32 %v542_v63, %v530_v62  ;;  %v2924_v62 = vor.u32 %v3905_v55, %v2923_v54  ;;  %v2899_v63 = vld [vmem:[#allocation8 + $0x38] sm:$0xf]  ;;  %v4073_v54 = vld [vmem:[#allocation8 + $0x5bc] sm:$0xf0]  ;;  %v3355_v55 = vld [vmem:[#allocation8 + $0x3c8] sm:$0xf] }
  0xc2   :  { %v2900_v10 = vor.u32 %v3899_v0, %v2899_v63  ;;  %v3914_v63 = vld [vmem:[#allocation8 + $0xcc] sm:$0xf]  ;;  %v2973_v0 = vld [vmem:[#allocation8 + $0xe0] sm:$0xf0] }
  0xc3   :  { %v624_v12 = vmax.f32 %v543_v7, 0.0  ;;  %v3115_v7 = vld [vmem:[#allocation8 + $0x1e8] sm:$0xf] }
  0xc5   :  { %v4408_v17 = vpack.c.bf16 %v624_v12, %v624_v12  ;;  %v2875_v12 = vld [vmem:[#allocation8 + $0x8] sm:$0xf] }
  0xc6   :  { %v555_v13 = vpop.f32.mrf.mxu2  ;;  %v531_v24 = vpop.f32.mrf.mxu0 }
  0xc7   :  { %v556_v18 = vadd.f32 %v555_v13, %v193_v4  ;;  %v568_v19 = vpop.f32.mrf.mxu3  ;;  %1806 = vmatmul.bf16.vlgmr.msra.gmra.mxu0 %v4408_v17  ;;  %v544_v27 = vpop.f32.mrf.mxu1  ;;  %v3140_v4 = vor.u32 %v3959_v59, %v3139_v58  ;;  %v3893_v13 = vld [vmem:[#allocation8 + $0x1c] sm:$0xf0]  ;;  %v3091_v24 = vld [vmem:[#allocation8 + $0x1b8] sm:$0xf]  ;;  %v3213_v58 = vld [vmem:[#allocation8 + $0x2c0] sm:$0xf0] }
  0xc8   :  { %1902 = vmatpush.bf16.msra.mxu0 %v3044_v14  ;;  %v3428_v14 = vor.u32 %v4031_v6, %v3427_v5  ;;  %v2876_v27 = vor.u32 %v3893_v13, %v2875_v12  ;;  %v4067_v5 = vld [vmem:[#allocation8 + $0x58c] sm:$0xf0]  ;;  %v3331_v6 = vld [vmem:[#allocation8 + $0x398] sm:$0xf]  ;;  %v3908_v13 = vld [vmem:[#allocation8 + $0x9c] sm:$0xf] }
  0xc9   :  { %v569_v25 = vadd.f32 %v568_v19, %v556_v18  ;;  %v3116_v18 = vor.u32 %v3953_v8, %v3115_v7  ;;  %v3045_v19 = vld [vmem:[#allocation8 + $0x170] sm:$0xf0]  ;;  %v4007_v7 = vld [vmem:[#allocation8 + $0x3ac] sm:$0xf0]  ;;  %v3968_v8 = vld [vmem:[#allocation8 + $0x27c] sm:$0xf] }
  0xca   :  { %v3048_v29 = vor.u32 %v3932_v15, %v3045_v19  ;;  %v3332_v12 = vor.u32 %v4007_v7, %v3331_v6  ;;  %v3547_v15 = vld [vmem:[#allocation8 + $0x548] sm:$0xf]  ;;  %v4061_v19 = vld [vmem:[#allocation8 + $0x55c] sm:$0xf0]  ;;  %v3027_v6 = vld [vmem:[#allocation8 + $0x130] sm:$0xf] }
  0xcb   :  { %v625_v32 = vmax.f32 %v569_v25, 0.0  ;;  %v3947_v25 = vld [vmem:[#allocation8 + $0x1cc] sm:$0xf0]  ;;  %v3930_v7 = vld [vmem:[#allocation8 + $0x144] sm:$0xf0] }
  0xcc   :  { %1903 = vmatpush.bf16.msra.mxu0 %v3020_v30  ;;  %v3404_v30 = vor.u32 %v4025_v21, %v3403_v20  ;;  %v3092_v34 = vor.u32 %v3947_v25, %v3091_v24  ;;  %v3307_v20 = vld [vmem:[#allocation8 + $0x368] sm:$0xf]  ;;  %v4001_v21 = vld [vmem:[#allocation8 + $0x37c] sm:$0xf0]  ;;  %v3548_v25 = vor.u32 %v4061_v19, %v3547_v15  ;;  %v3621_v15 = vld [vmem:[#allocation8 + $0x5f0] sm:$0xf0] }
  0xcd   :  { %v4411_v36 = vpack.c.bf16 %v625_v32, %v625_v32  ;;  %v3021_v32 = vld [vmem:[#allocation8 + $0x140] sm:$0xf0]  ;;  %v3984_v19 = vld [vmem:[#allocation8 + $0x2f4] sm:$0xf0] }
  0xce   :  { %v557_v40 = vpop.f32.mrf.mxu2  ;;  %v3024_v45 = vor.u32 %v3926_v31, %v3021_v32  ;;  %v3283_v31 = vld [vmem:[#allocation8 + $0x338] sm:$0xf]  ;;  %v3995_v32 = vld [vmem:[#allocation8 + $0x34c] sm:$0xf0] }
  0xcf   :  { %1819 = vmatmul.bf16.vlgmr.msra.gmra.mxu1 %v4411_v36  ;;  %v570_v41 = vpop.f32.mrf.mxu3  ;;  %v3379_v40 = vld [vmem:[#allocation8 + $0x3f8] sm:$0xf] }
  0xd0   :  { %1915 = vmatpush.bf16.msra.mxu1 %v3236_v35  ;;  %1904 = vmatpush.bf16.msra.mxu0 %v2996_v39  ;;  %v3067_v35 = vld [vmem:[#allocation8 + $0x188] sm:$0xf]  ;;  %v3941_v39 = vld [vmem:[#allocation8 + $0x19c] sm:$0xf0]  ;;  %v4019_v41 = vld [vmem:[#allocation8 + $0x40c] sm:$0xf0] }
  0xd1   :  { %v3068_v47 = vor.u32 %v3941_v39, %v3067_v35  ;;  %v3380_v48 = vor.u32 %v4019_v41, %v3379_v40  ;;  %v3284_v39 = vor.u32 %v3995_v32, %v3283_v31  ;;  %v2901_v40 = vld [vmem:[#allocation8 + $0x50] sm:$0xf0]  ;;  %v3499_v41 = vld [vmem:[#allocation8 + $0x4e8] sm:$0xf]  ;;  %v3219_v31 = vld [vmem:[#allocation8 + $0x2b0] sm:$0xf] }
  0xd2   :  { %v3978_v32 = vld [vmem:[#allocation8 + $0x2c4] sm:$0xf0] }
  0xd4   :  { %1916 = vmatpush.bf16.msra.mxu1 %v3212_v44  ;;  %1905 = vmatpush.bf16.msra.mxu0 %v2972_v46  ;;  %v3237_v44 = vld [vmem:[#allocation8 + $0x2f0] sm:$0xf0] }
  0xd7   :  { %1858 = vmatmul.bf16.vlgmr.msrb.gmra.mxu0 %v4408_v17 }
  0xd8   :  { %1917 = vmatpush.bf16.msra.mxu1 %v3188_v49  ;;  %1906 = vmatpush.bf16.msra.mxu0 %v2948_v53  ;;  %v3920_v49 = vld [vmem:[#allocation8 + $0xfc] sm:$0xf] }
  0xdc   :  { %v581_v57 = vpop.f32.mrf.mxu0  ;;  %1918 = vmatpush.bf16.msra.mxu1 %v3164_v56  ;;  %1907 = vmatpush.bf16.msra.mxu0 %v2924_v62  ;;  %v4013_v56 = vld [vmem:[#allocation8 + $0x3dc] sm:$0xf0] }
  0xdd   :  { %v582_v60 = vadd.f32 %v581_v57, %v194_v3  ;;  %v594_v61 = vpop.f32.mrf.mxu1  ;;  %v3240_v3 = vor.u32 %v3980_v43, %v3237_v44  ;;  %v3974_v57 = vld [vmem:[#allocation8 + $0x2ac] sm:$0xf]  ;;  %v3356_v62 = vor.u32 %v4013_v56, %v3355_v55  ;;  %v3051_v55 = vld [vmem:[#allocation8 + $0x160] sm:$0xf]  ;;  %v3936_v56 = vld [vmem:[#allocation8 + $0x174] sm:$0xf0] }
  0xde   :  { %v3950_v44 = vld [vmem:[#allocation8 + $0x1ec] sm:$0xf] }
  0xdf   :  { %v595_v1 = vadd.f32 %v594_v61, %v582_v60  ;;  %1871 = vmatmul.bf16.vlgmr.msrb.gmra.mxu1 %v4411_v36  ;;  %v3000_v60 = vor.u32 %v3920_v49, %v2997_v51  ;;  %v3596_v61 = vor.u32 %v4073_v54, %v3595_v52  ;;  %v3429_v49 = vld [vmem:[#allocation8 + $0x470] sm:$0xf0]  ;;  %v2904_v51 = vor.u32 %v3896_v37, %v2901_v40  ;;  %v3890_v52 = vld [vmem:[#allocation8 + $0xc] sm:$0xf]  ;;  %v2877_v54 = vld [vmem:[#allocation8 + $0x20] sm:$0xf0] }
  0xe0   :  { %1919 = vmatpush.bf16.msra.mxu1 %v3140_v4  ;;  %1908 = vmatpush.bf16.msra.mxu0 %v2900_v10  ;;  %v3216_v4 = vor.u32 %v3974_v57, %v3213_v58  ;;  %v2976_v10 = vor.u32 %v3914_v63, %v2973_v0  ;;  %v4022_v63 = vld [vmem:[#allocation8 + $0x42c] sm:$0xf]  ;;  %v3405_v0 = vld [vmem:[#allocation8 + $0x440] sm:$0xf0]  ;;  %v3220_v40 = vor.u32 %v3978_v32, %v3219_v31  ;;  %v3053_v32 = vld [vmem:[#allocation8 + $0x178] sm:$0xf0] }
  0xe1   :  { %v626_v9 = vmax.f32 %v595_v1, 0.0  ;;  %v3571_v1 = vld [vmem:[#allocation8 + $0x578] sm:$0xf] }
  0xe3   :  { %v4418_v16 = vpack.c.bf16 %v626_v9, %v626_v9  ;;  %v3189_v9 = vld [vmem:[#allocation8 + $0x290] sm:$0xf0] }
  0xe4   :  { %v607_v22 = vpop.f32.mrf.mxu2  ;;  %v583_v23 = vpop.f32.mrf.mxu0  ;;  %1920 = vmatpush.bf16.msra.mxu1 %v3116_v18  ;;  %1909 = vmatpush.bf16.msra.mxu0 %v2876_v27  ;;  %v3192_v18 = vor.u32 %v3968_v8, %v3189_v9  ;;  %v2925_v27 = vld [vmem:[#allocation8 + $0x80] sm:$0xf0]  ;;  %v3451_v8 = vld [vmem:[#allocation8 + $0x488] sm:$0xf] }
  0xe5   :  { %v608_v26 = vadd.f32 %v607_v22, %v195_v11  ;;  %v596_v50 = vpop.f32.mrf.mxu1  ;;  %1832 = vmatmul.bf16.vlgmr.msra.gmra.mxu2 %v4418_v16  ;;  %v620_v28 = vpop.f32.mrf.mxu3  ;;  %v3572_v11 = vor.u32 %v4067_v5, %v3571_v1  ;;  %v3962_v22 = vld [vmem:[#allocation8 + $0x24c] sm:$0xf]  ;;  %v3165_v23 = vld [vmem:[#allocation8 + $0x260] sm:$0xf0]  ;;  %v2880_v1 = vor.u32 %v3890_v52, %v2877_v54  ;;  %v3912_v52 = vld [vmem:[#allocation8 + $0xb4] sm:$0xf0] }
  0xe6   :  { %1928 = vmatpush.bf16.msra.mxu2 %v3428_v14  ;;  %v2949_v14 = vld [vmem:[#allocation8 + $0xb0] sm:$0xf0]  ;;  %v3902_v50 = vld [vmem:[#allocation8 + $0x6c] sm:$0xf] }
  0xe7   :  { %v621_v33 = vadd.f32 %v620_v28, %v608_v26  ;;  %1910 = vmatmul.bf16.vlgmr.msra.gmra.mxu0 %v4408_v17  ;;  %v2952_v24 = vor.u32 %v3908_v13, %v2949_v14  ;;  %v3308_v26 = vor.u32 %v4001_v21, %v3307_v20  ;;  %v3523_v28 = vld [vmem:[#allocation8 + $0x518] sm:$0xf]  ;;  %v2928_v35 = vor.u32 %v3902_v50, %v2925_v27  ;;  %v3069_v13 = vld [vmem:[#allocation8 + $0x1a0] sm:$0xf0]  ;;  %v4076_v14 = vld [vmem:[#allocation8 + $0x5dc] sm:$0xf] }
  0xe8   :  { %1954 = vmatpush.bf16.msrb.mxu0 %v3048_v29  ;;  %1921 = vmatpush.bf16.msra.mxu1 %v3092_v34  ;;  %v3168_v29 = vor.u32 %v3962_v22, %v3165_v23  ;;  %v3141_v34 = vld [vmem:[#allocation8 + $0x230] sm:$0xf0]  ;;  %v4016_v20 = vld [vmem:[#allocation8 + $0x3fc] sm:$0xf]  ;;  %v3028_v22 = vor.u32 %v3930_v7, %v3027_v6  ;;  %v3924_v50 = vld [vmem:[#allocation8 + $0x114] sm:$0xf0] }
  0xe9   :  { %v627_v42 = vmax.f32 %v621_v33, 0.0  ;;  %v3956_v33 = vld [vmem:[#allocation8 + $0x21c] sm:$0xf]  ;;  %v3381_v21 = vld [vmem:[#allocation8 + $0x410] sm:$0xf0] }
  0xea   :  { %1929 = vmatpush.bf16.msra.mxu2 %v3404_v30  ;;  %v4055_v30 = vld [vmem:[#allocation8 + $0x52c] sm:$0xf0]  ;;  %v3144_v43 = vor.u32 %v3956_v33, %v3141_v34  ;;  %v4010_v33 = vld [vmem:[#allocation8 + $0x3cc] sm:$0xf]  ;;  %v3357_v34 = vld [vmem:[#allocation8 + $0x3e0] sm:$0xf0] }
  0xeb   :  { %v4421_v46 = vpack.c.bf16 %v627_v42, %v627_v42  ;;  %v3524_v38 = vor.u32 %v4055_v30, %v3523_v28  ;;  %v4049_v42 = vld [vmem:[#allocation8 + $0x4fc] sm:$0xf0]  ;;  %v3384_v28 = vor.u32 %v4016_v20, %v3381_v21  ;;  %v3597_v30 = vld [vmem:[#allocation8 + $0x5c0] sm:$0xf0]  ;;  %v4058_v54 = vld [vmem:[#allocation8 + $0x54c] sm:$0xf] }
  0xec   :  { %v609_v53 = vpop.f32.mrf.mxu2  ;;  %1955 = vmatpush.bf16.msrb.mxu0 %v3024_v45  ;;  %1922 = vmatpush.bf16.msra.mxu1 %v3068_v47  ;;  %v3259_v45 = vld [vmem:[#allocation8 + $0x308] sm:$0xf]  ;;  %v3117_v47 = vld [vmem:[#allocation8 + $0x200] sm:$0xf0]  ;;  %v3147_v6 = vld [vmem:[#allocation8 + $0x220] sm:$0xf] }
  0xed   :  { %1845 = vmatmul.bf16.vlgmr.msra.gmra.mxu3 %v4421_v46  ;;  %v622_v59 = vpop.f32.mrf.mxu3  ;;  %v3500_v53 = vor.u32 %v4049_v42, %v3499_v41  ;;  %v3120_v57 = vor.u32 %v3950_v44, %v3117_v47  ;;  %v3360_v41 = vor.u32 %v4010_v33, %v3357_v34  ;;  %v4064_v42 = vld [vmem:[#allocation8 + $0x57c] sm:$0xf]  ;;  %v3195_v44 = vld [vmem:[#allocation8 + $0x280] sm:$0xf]  ;;  %v3333_v47 = vld [vmem:[#allocation8 + $0x3b0] sm:$0xf0] }
  0xee   :  { %1941 = vmatpush.bf16.msra.mxu3 %v3620_v2  ;;  %1930 = vmatpush.bf16.msra.mxu2 %v3380_v48  ;;  %v3989_v2 = vld [vmem:[#allocation8 + $0x31c] sm:$0xf0]  ;;  %v4028_v48 = vld [vmem:[#allocation8 + $0x45c] sm:$0xf]  ;;  %v3475_v59 = vld [vmem:[#allocation8 + $0x4b8] sm:$0xf] }
  0xef   :  { %1923 = vmatmul.bf16.vlgmr.msra.gmra.mxu1 %v4411_v36  ;;  %v3432_v58 = vor.u32 %v4028_v48, %v3429_v49  ;;  %v3960_v7 = vld [vmem:[#allocation8 + $0x234] sm:$0xf0]  ;;  %v3123_v20 = vld [vmem:[#allocation8 + $0x1f0] sm:$0xf]  ;;  %v3954_v21 = vld [vmem:[#allocation8 + $0x204] sm:$0xf0] }
  0xf0   :  { %1967 = vmatpush.bf16.msrb.mxu1 %v3240_v3  ;;  %1956 = vmatpush.bf16.msrb.mxu0 %v3000_v60  ;;  %v3260_v3 = vor.u32 %v3989_v2, %v3259_v45  ;;  %v4043_v60 = vld [vmem:[#allocation8 + $0x4cc] sm:$0xf0]  ;;  %v3972_v45 = vld [vmem:[#allocation8 + $0x294] sm:$0xf0]  ;;  %v4004_v2 = vld [vmem:[#allocation8 + $0x39c] sm:$0xf] }
  0xf1   :  { %v3476_v5 = vor.u32 %v4043_v60, %v3475_v59  ;;  %v3309_v59 = vld [vmem:[#allocation8 + $0x380] sm:$0xf0]  ;;  %v4040_v33 = vld [vmem:[#allocation8 + $0x4bc] sm:$0xf]  ;;  %v3477_v34 = vld [vmem:[#allocation8 + $0x4d0] sm:$0xf0] }
  0xf2   :  { %1942 = vmatpush.bf16.msra.mxu3 %v3596_v61  ;;  %1931 = vmatpush.bf16.msra.mxu2 %v3356_v62  ;;  %v3944_v61 = vld [vmem:[#allocation8 + $0x1bc] sm:$0xf]  ;;  %v3093_v62 = vld [vmem:[#allocation8 + $0x1d0] sm:$0xf0] }
  0xf3   :  { %v3096_v9 = vor.u32 %v3944_v61, %v3093_v62  ;;  %v2931_v62 = vld [vmem:[#allocation8 + $0x70] sm:$0xf] }
  0xf4   :  { %1968 = vmatpush.bf16.msrb.mxu1 %v3216_v4  ;;  %1957 = vmatpush.bf16.msrb.mxu0 %v2976_v10  ;;  %v3052_v4 = vor.u32 %v3936_v56, %v3051_v55  ;;  %v3408_v10 = vor.u32 %v4022_v63, %v3405_v0  ;;  %v3549_v55 = vld [vmem:[#allocation8 + $0x560] sm:$0xf0]  ;;  %v3171_v56 = vld [vmem:[#allocation8 + $0x250] sm:$0xf]  ;;  %v3906_v63 = vld [vmem:[#allocation8 + $0x84] sm:$0xf0] }
  0xf5   :  { %1884 = vmatmul.bf16.vlgmr.msrb.gmra.mxu2 %v4418_v16  ;;  %v3552_v61 = vor.u32 %v4058_v54, %v3549_v55  ;;  %v3981_v54 = vld [vmem:[#allocation8 + $0x2e4] sm:$0xf]  ;;  %v3245_v55 = vld [vmem:[#allocation8 + $0x2f8] sm:$0xf0] }
  0xf6   :  { %1943 = vmatpush.bf16.msra.mxu3 %v3572_v11  ;;  %1932 = vmatpush.bf16.msra.mxu2 %v3332_v12  ;;  %v4037_v11 = vld [vmem:[#allocation8 + $0x49c] sm:$0xf0]  ;;  %v3938_v12 = vld [vmem:[#allocation8 + $0x18c] sm:$0xf] }
  0xf7   :  { %v3452_v23 = vor.u32 %v4037_v11, %v3451_v8  ;;  %v3992_v8 = vld [vmem:[#allocation8 + $0x33c] sm:$0xf] }
  0xf8   :  { %1969 = vmatpush.bf16.msrb.mxu1 %v3192_v18  ;;  %1958 = vmatpush.bf16.msrb.mxu0 %v2952_v24  ;;  %v3243_v18 = vld [vmem:[#allocation8 + $0x2e0] sm:$0xf]  ;;  %v3072_v24 = vor.u32 %v3938_v12, %v3069_v13  ;;  %v3900_v13 = vld [vmem:[#allocation8 + $0x54] sm:$0xf0] }
  0xf9   :  { %v3244_v27 = vor.u32 %v3984_v19, %v3243_v18  ;;  %v2907_v12 = vld [vmem:[#allocation8 + $0x40] sm:$0xf]  ;;  %v4046_v18 = vld [vmem:[#allocation8 + $0x4ec] sm:$0xf]  ;;  %v3501_v19 = vld [vmem:[#allocation8 + $0x500] sm:$0xf0] }
  0xfa   :  { %1944 = vmatpush.bf16.msra.mxu3 %v3548_v25  ;;  %1933 = vmatpush.bf16.msra.mxu2 %v3308_v26  ;;  %v3624_v25 = vor.u32 %v4076_v14, %v3621_v15  ;;  %v3003_v26 = vld [vmem:[#allocation8 + $0x100] sm:$0xf]  ;;  %v3148_v14 = vor.u32 %v3960_v7, %v3147_v6  ;;  %v3975_v6 = vld [vmem:[#allocation8 + $0x2b4] sm:$0xf]  ;;  %v3221_v7 = vld [vmem:[#allocation8 + $0x2c8] sm:$0xf0] }
  0xfc   :  { %1970 = vmatpush.bf16.msrb.mxu1 %v3168_v29  ;;  %1959 = vmatpush.bf16.msrb.mxu0 %v2928_v35  ;;  %v4070_v29 = vld [vmem:[#allocation8 + $0x5ac] sm:$0xf]  ;;  %v3004_v35 = vor.u32 %v3924_v50, %v3003_v26  ;;  %v4032_v26 = vld [vmem:[#allocation8 + $0x474] sm:$0xf0]  ;;  %v3504_v50 = vor.u32 %v4046_v18, %v3501_v19  ;;  %v3579_v18 = vld [vmem:[#allocation8 + $0x580] sm:$0xf] }
  0xfd   :  { %1897 = vmatmul.bf16.vlgmr.msrb.gmra.mxu3 %v4421_v46  ;;  %v3600_v37 = vor.u32 %v4070_v29, %v3597_v30  ;;  %v3933_v29 = vld [vmem:[#allocation8 + $0x164] sm:$0xf]  ;;  %v3124_v30 = vor.u32 %v3954_v21, %v3123_v20  ;;  %v4068_v19 = vld [vmem:[#allocation8 + $0x594] sm:$0xf0]  ;;  %v3197_v21 = vld [vmem:[#allocation8 + $0x298] sm:$0xf0] }
  0xfe   :  { %1945 = vmatpush.bf16.msra.mxu3 %v3524_v38  ;;  %1934 = vmatpush.bf16.msra.mxu2 %v3284_v39  ;;  %v2979_v38 = vld [vmem:[#allocation8 + $0xd0] sm:$0xf]  ;;  %v3918_v39 = vld [vmem:[#allocation8 + $0xe4] sm:$0xf0]  ;;  %v3969_v20 = vld [vmem:[#allocation8 + $0x284] sm:$0xf] }
  0xff   :  { %v2980_v48 = vor.u32 %v3918_v39, %v2979_v38  ;;  %v3948_v38 = vld [vmem:[#allocation8 + $0x1d4] sm:$0xf0] }
 0x100   :  { %1971 = vmatpush.bf16.msrb.mxu1 %v3144_v43  ;;  %1960 = vmatpush.bf16.msrb.mxu0 %v2904_v51  ;;  %v3573_v43 = vld [vmem:[#allocation8 + $0x590] sm:$0xf0]  ;;  %v2955_v51 = vld [vmem:[#allocation8 + $0xa0] sm:$0xf] }
 0x101   :  { %v3576_v49 = vor.u32 %v4064_v42, %v3573_v43  ;;  %v2956_v60 = vor.u32 %v3912_v52, %v2955_v51  ;;  %v3056_v42 = vor.u32 %v3933_v29, %v3053_v32  ;;  %v3480_v43 = vor.u32 %v4040_v33, %v3477_v34  ;;  %v3942_v51 = vld [vmem:[#allocation8 + $0x1a4] sm:$0xf0]  ;;  %v3555_v29 = vld [vmem:[#allocation8 + $0x550] sm:$0xf]  ;;  %v3173_v32 = vld [vmem:[#allocation8 + $0x268] sm:$0xf0] }
 0x102   :  { %1946 = vmatpush.bf16.msra.mxu3 %v3500_v53  ;;  %1935 = vmatpush.bf16.msra.mxu2 %v3260_v3  ;;  %v3196_v53 = vor.u32 %v3972_v45, %v3195_v44  ;;  %v3336_v3 = vor.u32 %v4004_v2, %v3333_v47  ;;  %v3927_v44 = vld [vmem:[#allocation8 + $0x134] sm:$0xf]  ;;  %v3029_v45 = vld [vmem:[#allocation8 + $0x148] sm:$0xf0]  ;;  %v3315_v33 = vld [vmem:[#allocation8 + $0x370] sm:$0xf] }
 0x103   :  { %v4034_v2 = vld [vmem:[#allocation8 + $0x48c] sm:$0xf]  ;;  %v4002_v34 = vld [vmem:[#allocation8 + $0x384] sm:$0xf0] }
 0x104   :  { %1972 = vmatpush.bf16.msrb.mxu1 %v3120_v57  ;;  %1961 = vmatpush.bf16.msrb.mxu0 %v2880_v1  ;;  %v3966_v57 = vld [vmem:[#allocation8 + $0x264] sm:$0xf0] }
 0x105   :  { %1936 = vmatmul.bf16.vlgmr.msra.gmra.mxu2 %v4418_v16  ;;  %v3172_v0 = vor.u32 %v3966_v57, %v3171_v56  ;;  %v3387_v56 = vld [vmem:[#allocation8 + $0x400] sm:$0xf]  ;;  %v4020_v57 = vld [vmem:[#allocation8 + $0x414] sm:$0xf0] }
 0x106   :  { %1980 = vmatpush.bf16.msrb.mxu2 %v3432_v58  ;;  %1947 = vmatpush.bf16.msra.mxu3 %v3476_v5  ;;  %v3998_v58 = vld [vmem:[#allocation8 + $0x36c] sm:$0xf]  ;;  %v3525_v5 = vld [vmem:[#allocation8 + $0x530] sm:$0xf0] }
 0x107   :  { %1962 = vmatmul.bf16.vlgmr.msrb.gmra.mxu0 %v4408_v17  ;;  %v3312_v1 = vor.u32 %v3998_v58, %v3309_v59  ;;  %v3032_v58 = vor.u32 %v3927_v44, %v3029_v45  ;;  %v3957_v44 = vld [vmem:[#allocation8 + $0x224] sm:$0xf]  ;;  %v3149_v45 = vld [vmem:[#allocation8 + $0x238] sm:$0xf0] }
 0x108   :  { %2006 = vmatpush.bf16.msra.mxu0 %v3052_v4  ;;  %1973 = vmatpush.bf16.msrb.mxu1 %v3096_v9  ;;  %v4052_v4 = vld [vmem:[#allocation8 + $0x51c] sm:$0xf]  ;;  %v3285_v9 = vld [vmem:[#allocation8 + $0x350] sm:$0xf0] }
 0x109   :  { %v3528_v11 = vor.u32 %v4052_v4, %v3525_v5  ;;  %v3288_v15 = vor.u32 %v3992_v8, %v3285_v9  ;;  %v3603_v4 = vld [vmem:[#allocation8 + $0x5b0] sm:$0xf]  ;;  %v4074_v5 = vld [vmem:[#allocation8 + $0x5c4] sm:$0xf0] }
 0x10a   :  { %1981 = vmatpush.bf16.msrb.mxu2 %v3408_v10  ;;  %1948 = vmatpush.bf16.msra.mxu3 %v3452_v23  ;;  %v2932_v10 = vor.u32 %v3906_v63, %v2931_v62  ;;  %v3261_v23 = vld [vmem:[#allocation8 + $0x320] sm:$0xf0]  ;;  %v3005_v63 = vld [vmem:[#allocation8 + $0x118] sm:$0xf0]  ;;  %v3363_v8 = vld [vmem:[#allocation8 + $0x3d0] sm:$0xf] }
 0x10b   :  { %v3921_v62 = vld [vmem:[#allocation8 + $0x104] sm:$0xf]  ;;  %v4014_v9 = vld [vmem:[#allocation8 + $0x3e4] sm:$0xf0] }
 0x10c   :  { %2007 = vmatpush.bf16.msra.mxu0 %v3028_v22  ;;  %1974 = vmatpush.bf16.msrb.mxu1 %v3072_v24  ;;  %v3986_v22 = vld [vmem:[#allocation8 + $0x30c] sm:$0xf]  ;;  %v2908_v24 = vor.u32 %v3900_v13, %v2907_v12  ;;  %v3915_v12 = vld [vmem:[#allocation8 + $0xd4] sm:$0xf] }
 0x10d   :  { %1949 = vmatmul.bf16.vlgmr.msra.gmra.mxu3 %v4421_v46  ;;  %v3264_v31 = vor.u32 %v3986_v22, %v3261_v23  ;;  %v2981_v13 = vld [vmem:[#allocation8 + $0xe8] sm:$0xf0]  ;;  %v3339_v22 = vld [vmem:[#allocation8 + $0x3a0] sm:$0xf]  ;;  %v4008_v23 = vld [vmem:[#allocation8 + $0x3b4] sm:$0xf0] }
 0x10e   :  { %1993 = vmatpush.bf16.msrb.mxu3 %v3624_v25  ;;  %1982 = vmatpush.bf16.msrb.mxu2 %v3384_v28  ;;  %v3435_v25 = vld [vmem:[#allocation8 + $0x460] sm:$0xf]  ;;  %v3894_v28 = vld [vmem:[#allocation8 + $0x24] sm:$0xf0] }
 0x10f   :  { %1975 = vmatmul.bf16.vlgmr.msrb.gmra.mxu1 %v4411_v36 }
 0x110   :  { %2019 = vmatpush.bf16.msra.mxu1 %v3244_v27  ;;  %2008 = vmatpush.bf16.msra.mxu0 %v3004_v35  ;;  %v2883_v27 = vld [vmem:[#allocation8 + $0x10] sm:$0xf]  ;;  %v3436_v35 = vor.u32 %v4032_v26, %v3435_v25  ;;  %v3580_v25 = vor.u32 %v4068_v19, %v3579_v18  ;;  %v3909_v26 = vld [vmem:[#allocation8 + $0xa4] sm:$0xf]  ;;  %v4038_v19 = vld [vmem:[#allocation8 + $0x4a4] sm:$0xf0] }
 0x111   :  { %v2884_v39 = vor.u32 %v3894_v28, %v2883_v27  ;;  %v3200_v27 = vor.u32 %v3969_v20, %v3197_v21  ;;  %v3340_v28 = vor.u32 %v4008_v23, %v3339_v22  ;;  %v3939_v20 = vld [vmem:[#allocation8 + $0x194] sm:$0xf]  ;;  %v4088_v21 = vld [vmem:[#allocation11 + $0x38] sm:$0xff]  ;;  %v3077_v23 = vld [vmem:[#allocation8 + $0x1a8] sm:$0xf0] }
 0x112   :  { %1994 = vmatpush.bf16.msrb.mxu3 %v3600_v37  ;;  %1983 = vmatpush.bf16.msrb.mxu2 %v3360_v41  ;;  %v3099_v37 = vld [vmem:[#allocation8 + $0x1c0] sm:$0xf]  ;;  %v4026_v41 = vld [vmem:[#allocation8 + $0x444] sm:$0xf0] }
 0x113   :  { %v3100_v47 = vor.u32 %v3948_v38, %v3099_v37  ;;  %v3903_v38 = vld [vmem:[#allocation8 + $0x74] sm:$0xf] }
 0x114   :  { %2020 = vmatpush.bf16.msra.mxu1 %v3220_v40  ;;  %2009 = vmatpush.bf16.msra.mxu0 %v2980_v48  ;;  %v3411_v40 = vld [vmem:[#allocation8 + $0x430] sm:$0xf]  ;;  %v3453_v48 = vld [vmem:[#allocation8 + $0x4a0] sm:$0xf0] }
 0x115   :  { %v3412_v52 = vor.u32 %v4026_v41, %v3411_v40  ;;  %v3456_v59 = vor.u32 %v4034_v2, %v3453_v48  ;;  %v3316_v41 = vor.u32 %v4002_v34, %v3315_v33  ;;  %v3291_v2 = vld [vmem:[#allocation8 + $0x340] sm:$0xf]  ;;  %v4087_v33 = vld [vmem:[#allocation11 + $0x30] sm:$0xff] }
 0x116   :  { %1995 = vmatpush.bf16.msrb.mxu3 %v3576_v49  ;;  %1984 = vmatpush.bf16.msrb.mxu2 %v3336_v3  ;;  %v3075_v49 = vld [vmem:[#allocation8 + $0x190] sm:$0xf]  ;;  %v4080_v3 = vld [vmem:[#allocation8 + $0x5f4] sm:$0xf0]  ;;  %v4011_v34 = vld [vmem:[#allocation8 + $0x3d4] sm:$0xf] }
 0x118   :  { %2021 = vmatpush.bf16.msra.mxu1 %v3196_v53  ;;  %2010 = vmatpush.bf16.msra.mxu0 %v2956_v60  ;;  %v3627_v53 = vld [vmem:[#allocation8 + $0x5e0] sm:$0xf]  ;;  %v3076_v60 = vor.u32 %v3942_v51, %v3075_v49  ;;  %v3897_v51 = vld [vmem:[#allocation8 + $0x44] sm:$0xf] }
 0x11a   :  { %1996 = vmatpush.bf16.msrb.mxu3 %v3552_v61  ;;  %1985 = vmatpush.bf16.msrb.mxu2 %v3312_v1  ;;  %v3628_v61 = vor.u32 %v4080_v3, %v3627_v53  ;;  %v3388_v1 = vor.u32 %v4020_v57, %v3387_v56  ;;  %v3152_v53 = vor.u32 %v3957_v44, %v3149_v45  ;;  %v3951_v56 = vld [vmem:[#allocation8 + $0x1f4] sm:$0xf]  ;;  %v3125_v57 = vld [vmem:[#allocation8 + $0x208] sm:$0xf0]  ;;  %v4096_v44 = vld [vmem:[#allocation11 + $0x78] sm:$0xff] }
 0x11c   :  { %2022 = vmatpush.bf16.msra.mxu1 %v3172_v0  ;;  %2011 = vmatpush.bf16.msra.mxu0 %v2932_v10  ;;  %v3248_v0 = vor.u32 %v3981_v54, %v3245_v55  ;;  %v3008_v10 = vor.u32 %v3921_v62, %v3005_v63  ;;  %v3507_v54 = vld [vmem:[#allocation8 + $0x4f0] sm:$0xf]  ;;  %v4050_v55 = vld [vmem:[#allocation8 + $0x504] sm:$0xf0]  ;;  %v3437_v62 = vld [vmem:[#allocation8 + $0x478] sm:$0xf0] }
 0x11d   :  { %v3508_v63 = vor.u32 %v4050_v55, %v3507_v54  ;;  %v4053_v55 = vld [vmem:[#allocation8 + $0x524] sm:$0xf] }
 0x11e   :  { %1997 = vmatpush.bf16.msrb.mxu3 %v3528_v11  ;;  %1986 = vmatpush.bf16.msrb.mxu2 %v3288_v15  ;;  %v3604_v11 = vor.u32 %v4074_v5, %v3603_v4  ;;  %v3364_v15 = vor.u32 %v4014_v9, %v3363_v8  ;;  %v3128_v4 = vor.u32 %v3951_v56, %v3125_v57  ;;  %v3945_v9 = vld [vmem:[#allocation8 + $0x1c4] sm:$0xf]  ;;  %v3533_v56 = vld [vmem:[#allocation8 + $0x538] sm:$0xf0] }
 0x11f   :  { %v4084_v57 = vld [vmem:[#allocation11 + $0x18] sm:$0xff] }
 0x120   :  { %2023 = vmatpush.bf16.msra.mxu1 %v3148_v14  ;;  %2012 = vmatpush.bf16.msra.mxu0 %v2908_v24  ;;  %v3224_v14 = vor.u32 %v3975_v6, %v3221_v7  ;;  %v2984_v24 = vor.u32 %v3915_v12, %v2981_v13  ;;  %v3483_v6 = vld [vmem:[#allocation8 + $0x4c0] sm:$0xf]  ;;  %v4044_v7 = vld [vmem:[#allocation8 + $0x4d4] sm:$0xf0]  ;;  %v4023_v12 = vld [vmem:[#allocation8 + $0x434] sm:$0xf] }
 0x121   :  { %v3413_v13 = vld [vmem:[#allocation8 + $0x448] sm:$0xf0] }
 0x122   :  { %1998 = vmatpush.bf16.msrb.mxu3 %v3504_v50  ;;  %1987 = vmatpush.bf16.msrb.mxu2 %v3264_v31  ;;  %v2957_v50 = vld [vmem:[#allocation8 + $0xb8] sm:$0xf0]  ;;  %v3963_v31 = vld [vmem:[#allocation8 + $0x254] sm:$0xf]  ;;  %v3416_v22 = vor.u32 %v4023_v12, %v3413_v13 }
 0x123   :  { %v3176_v40 = vor.u32 %v3963_v31, %v3173_v32  ;;  %v4071_v31 = vld [vmem:[#allocation8 + $0x5b4] sm:$0xf]  ;;  %v3605_v32 = vld [vmem:[#allocation8 + $0x5c8] sm:$0xf0]  ;;  %v3485_v12 = vld [vmem:[#allocation8 + $0x4d8] sm:$0xf0] }
 0x124   :  { %2024 = vmatpush.bf16.msra.mxu1 %v3124_v30  ;;  %2013 = vmatpush.bf16.msra.mxu0 %v2884_v39  ;;  %v4062_v30 = vld [vmem:[#allocation8 + $0x564] sm:$0xf0]  ;;  %v2933_v39 = vld [vmem:[#allocation8 + $0x88] sm:$0xf0] }
 0x125   :  { %1988 = vmatmul.bf16.vlgmr.msrb.gmra.mxu2 %v4418_v16  ;;  %v3556_v37 = vor.u32 %v4062_v30, %v3555_v29  ;;  %v2936_v48 = vor.u32 %v3903_v38, %v2933_v39  ;;  %v4065_v39 = vld [vmem:[#allocation8 + $0x584] sm:$0xf]  ;;  %v4082_v13 = vld [vmem:[#allocation11 + $0x8] sm:$0xff] }
 0x126   :  { %2032 = vmatpush.bf16.msra.mxu2 %v3436_v35  ;;  %1999 = vmatpush.bf16.msrb.mxu3 %v3480_v43  ;;  %v2960_v35 = vor.u32 %v3909_v26, %v2957_v50  ;;  %v4056_v43 = vld [vmem:[#allocation8 + $0x534] sm:$0xf0]  ;;  %v4017_v26 = vld [vmem:[#allocation8 + $0x404] sm:$0xf]  ;;  %v3389_v50 = vld [vmem:[#allocation8 + $0x418] sm:$0xf0] }
 0x127   :  { %2014 = vmatmul.bf16.vlgmr.msra.gmra.mxu0 %v4408_v17  ;;  %v3392_v30 = vor.u32 %v4017_v26, %v3389_v50 }
 0x128   :  { %2058 = vmatpush.bf16.msrb.mxu0 %v3056_v42  ;;  %2025 = vmatpush.bf16.msra.mxu1 %v3100_v47  ;;  %v3531_v42 = vld [vmem:[#allocation8 + $0x520] sm:$0xf]  ;;  %v3996_v47 = vld [vmem:[#allocation8 + $0x354] sm:$0xf0] }
 0x129   :  { %v3532_v49 = vor.u32 %v4056_v43, %v3531_v42  ;;  %v3292_v3 = vor.u32 %v3996_v47, %v3291_v2  ;;  %v3341_v42 = vld [vmem:[#allocation8 + $0x3b8] sm:$0xf0]  ;;  %v4059_v47 = vld [vmem:[#allocation8 + $0x554] sm:$0xf] }
 0x12a   :  { %2033 = vmatpush.bf16.msra.mxu2 %v3412_v52  ;;  %2000 = vmatpush.bf16.msrb.mxu3 %v3456_v59  ;;  %v2909_v52 = vld [vmem:[#allocation8 + $0x58] sm:$0xf0]  ;;  %v3990_v59 = vld [vmem:[#allocation8 + $0x324] sm:$0xf0] }
 0x12c   :  { %2059 = vmatpush.bf16.msrb.mxu0 %v3032_v58  ;;  %2026 = vmatpush.bf16.msra.mxu1 %v3076_v60  ;;  %v3267_v58 = vld [vmem:[#allocation8 + $0x310] sm:$0xf]  ;;  %v2912_v60 = vor.u32 %v3897_v51, %v2909_v52  ;;  %v3999_v51 = vld [vmem:[#allocation8 + $0x374] sm:$0xf]  ;;  %v3317_v52 = vld [vmem:[#allocation8 + $0x388] sm:$0xf0] }
 0x12d   :  { %2001 = vmatmul.bf16.vlgmr.msrb.gmra.mxu3 %v4421_v46  ;;  %v3268_v5 = vor.u32 %v3990_v59, %v3267_v58  ;;  %v3993_v58 = vld [vmem:[#allocation8 + $0x344] sm:$0xf]  ;;  %v3293_v59 = vld [vmem:[#allocation8 + $0x358] sm:$0xf0] }
 0x12e   :  { %2045 = vmatpush.bf16.msra.mxu3 %v3628_v61  ;;  %2034 = vmatpush.bf16.msra.mxu2 %v3388_v1  ;;  %v4029_v61 = vld [vmem:[#allocation8 + $0x464] sm:$0xf]  ;;  %v2885_v1 = vld [vmem:[#allocation8 + $0x28] sm:$0xf0] }
 0x12f   :  { %2027 = vmatmul.bf16.vlgmr.msra.gmra.mxu1 %v4411_v36  ;;  %v3440_v8 = vor.u32 %v4029_v61, %v3437_v62  ;;  %v4094_v61 = vld [vmem:[#allocation11 + $0x68] sm:$0xff]  ;;  %v3536_v62 = vor.u32 %v4053_v55, %v3533_v56 }
 0x130   :  { %2071 = vmatpush.bf16.msrb.mxu1 %v3248_v0  ;;  %2060 = vmatpush.bf16.msrb.mxu0 %v3008_v10  ;;  %v3891_v0 = vld [vmem:[#allocation8 + $0x14] sm:$0xf]  ;;  %v3101_v10 = vld [vmem:[#allocation8 + $0x1d8] sm:$0xf0] }
 0x131   :  { %v3104_v18 = vor.u32 %v3945_v9, %v3101_v10 }
 0x132   :  { %2046 = vmatpush.bf16.msra.mxu3 %v3604_v11  ;;  %2035 = vmatpush.bf16.msra.mxu2 %v3364_v15  ;;  %v2888_v11 = vor.u32 %v3891_v0, %v2885_v1  ;;  %v3459_v15 = vld [vmem:[#allocation8 + $0x490] sm:$0xf]  ;;  %v4047_v0 = vld [vmem:[#allocation8 + $0x4f4] sm:$0xf]  ;;  %v3509_v1 = vld [vmem:[#allocation8 + $0x508] sm:$0xf0] }
 0x134   :  { %2072 = vmatpush.bf16.msrb.mxu1 %v3224_v14  ;;  %2061 = vmatpush.bf16.msrb.mxu0 %v2984_v24  ;;  %v3484_v14 = vor.u32 %v4044_v7, %v3483_v6  ;;  %v4077_v24 = vld [vmem:[#allocation8 + $0x5e4] sm:$0xf]  ;;  %v3269_v6 = vld [vmem:[#allocation8 + $0x328] sm:$0xf0] }
 0x135   :  { %v4093_v7 = vld [vmem:[#allocation11 + $0x60] sm:$0xff] }
 0x136   :  { %2047 = vmatpush.bf16.msra.mxu3 %v3580_v25  ;;  %2036 = vmatpush.bf16.msra.mxu2 %v3340_v28  ;;  %v3629_v25 = vld [vmem:[#allocation8 + $0x5f8] sm:$0xf0]  ;;  %v3080_v28 = vor.u32 %v3939_v20, %v3077_v23  ;;  %v4035_v20 = vld [vmem:[#allocation8 + $0x494] sm:$0xf] }
 0x137   :  { %v3632_v29 = vor.u32 %v4077_v24, %v3629_v25  ;;  %v4091_v23 = vld [vmem:[#allocation11 + $0x50] sm:$0xff] }
 0x138   :  { %2073 = vmatpush.bf16.msrb.mxu1 %v3200_v27  ;;  %2062 = vmatpush.bf16.msrb.mxu0 %v2960_v35  ;;  %v3460_v27 = vor.u32 %v4038_v19, %v3459_v15  ;;  %v3365_v35 = vld [vmem:[#allocation8 + $0x3e8] sm:$0xf0]  ;;  %v4104_v15 = vld [vmem:[#allocation11 + $0xb8] sm:$0xff]  ;;  %v4103_v24 = vld [vmem:[#allocation11 + $0xb0] sm:$0xff] }
 0x139   :  { %v3368_v38 = vor.u32 %v4011_v34, %v3365_v35  ;;  %v4100_v34 = vld [vmem:[#allocation11 + $0x98] sm:$0xff] }
 0x13a   :  { %2048 = vmatpush.bf16.msra.mxu3 %v3556_v37  ;;  %2037 = vmatpush.bf16.msra.mxu2 %v3316_v41  ;;  %v3608_v37 = vor.u32 %v4071_v31, %v3605_v32  ;;  %v4086_v41 = vld [vmem:[#allocation11 + $0x28] sm:$0xff]  ;;  %v4089_v31 = vld [vmem:[#allocation11 + $0x40] sm:$0xff] }
 0x13b   :  { %v4101_v32 = vld [vmem:[#allocation11 + $0xa0] sm:$0xff] }
 0x13c   :  { %2074 = vmatpush.bf16.msrb.mxu1 %v3176_v40  ;;  %2063 = vmatpush.bf16.msrb.mxu0 %v2936_v48  ;;  %v3581_v40 = vld [vmem:[#allocation8 + $0x598] sm:$0xf0]  ;;  %v3557_v48 = vld [vmem:[#allocation8 + $0x568] sm:$0xf0] }
 0x13d   :  { %v3584_v45 = vor.u32 %v4065_v39, %v3581_v40  ;;  %v4099_v39 = vld [vmem:[#allocation11 + $0x90] sm:$0xff] }
 0x13e   :  { %2049 = vmatpush.bf16.msra.mxu3 %v3532_v49  ;;  %2038 = vmatpush.bf16.msra.mxu2 %v3292_v3  ;;  %v4085_v49 = vld [vmem:[#allocation11 + $0x20] sm:$0xff]  ;;  %v3560_v3 = vor.u32 %v4059_v47, %v3557_v48 }
 0x13f   :  { %v4097_v48 = vld [vmem:[#allocation11 + $0x80] sm:$0xff] }
 0x140   :  { %2075 = vmatpush.bf16.msrb.mxu1 %v3152_v53  ;;  %2064 = vmatpush.bf16.msrb.mxu0 %v2912_v60  ;;  %v4095_v53 = vld [vmem:[#allocation11 + $0x70] sm:$0xff] }
 0x142   :  { %2050 = vmatpush.bf16.msra.mxu3 %v3508_v63  ;;  %2039 = vmatpush.bf16.msra.mxu2 %v3268_v5  ;;  %v3296_v63 = vor.u32 %v3993_v58, %v3293_v59  ;;  %v3987_v5 = vld [vmem:[#allocation8 + $0x314] sm:$0xf] }
 0x143   :  { %v3272_v10 = vor.u32 %v3987_v5, %v3269_v6  ;;  %v4107_v6 = vld [vmem:[#allocation11 + $0xd0] sm:$0xff] }
 0x144   :  { %2076 = vmatpush.bf16.msrb.mxu1 %v3128_v4  ;;  %2065 = vmatpush.bf16.msrb.mxu0 %v2888_v11  ;;  %v4440_v43 = vpop.f32.mrf.mxu0  ;;  %v4083_v4 = vld [vmem:[#allocation11 + $0x10] sm:$0xff]  ;;  %v4041_v11 = vld [vmem:[#allocation8 + $0x4c4] sm:$0xf] }
 0x145   :  { %2040 = vmatmul.bf16.vlgmr.msra.gmra.mxu2 %v4418_v16  ;;  %v3488_v19 = vor.u32 %v4041_v11, %v3485_v12 }
 0x146   :  { %2084 = vmatpush.bf16.msrb.mxu2 %v3440_v8  ;;  %2051 = vmatpush.bf16.msra.mxu3 %v3484_v14  ;;  %v3512_v8 = vor.u32 %v4047_v0, %v3509_v1  ;;  %v4092_v14 = vld [vmem:[#allocation11 + $0x58] sm:$0xff] }
 0x147   :  { %2066 = vmatmul.bf16.vlgmr.msrb.gmra.mxu0 %v4408_v17  ;;  %v4005_v17 = vld [vmem:[#allocation8 + $0x3a4] sm:$0xf] }
 0x148   :  { %2077 = vmatpush.bf16.msrb.mxu1 %v3104_v18  ;;  %2510 = vmatpush.bf16.msra.mxu0 %v4088_v21  ;;  %v3344_v2 = vor.u32 %v4005_v17, %v3341_v42  ;;  %v3461_v21 = vld [vmem:[#allocation8 + $0x4a8] sm:$0xf0] }
 0x149   :  { %v3464_v25 = vor.u32 %v4035_v20, %v3461_v21 }
 0x14a   :  { %2085 = vmatpush.bf16.msrb.mxu2 %v3416_v22  ;;  %2052 = vmatpush.bf16.msra.mxu3 %v3460_v27  ;;  %v4081_v22 = vld [vmem:[#allocation11] sm:$0xff]  ;;  %v4090_v27 = vld [vmem:[#allocation11 + $0x48] sm:$0xff] }
 0x14c   :  { %2078 = vmatpush.bf16.msrb.mxu1 %v3080_v28  ;;  %2511 = vmatpush.bf16.msra.mxu0 %v4087_v33  ;;  %v4442_v54 = vpop.f32.mrf.mxu1  ;;  %v1809_v60 = vpop.f32.mrf.mxu0  ;;  %v4102_v28 = vld [vmem:[#allocation11 + $0xa8] sm:$0xff] }
 0x14d   :  { %2053 = vmatmul.bf16.vlgmr.msra.gmra.mxu3 %v4421_v46  ;;  %v4109_v60 = vld [vmem:[#allocation11 + $0xe0] sm:$0xff] }
 0x14e   :  { %2097 = vmatpush.bf16.msrb.mxu3 %v3632_v29  ;;  %2086 = vmatpush.bf16.msrb.mxu2 %v3392_v30  ;;  %v4445_v29 = vld [vmem:[#allocation10] sm:$0x3f] }
 0x14f   :  { %2079 = vmatmul.bf16.vlgmr.msrb.gmra.mxu1 %v4411_v36  ;;  %v3320_v36 = vor.u32 %v3999_v51, %v3317_v52  ;;  %v826_v30 = vperm.slane %v4445_v29, 0  ;;  %v828_v1 = vperm.slane %v4445_v29, 2 }
 0x150   :  { %2512 = vmatpush.bf16.msra.mxu0 %v4086_v41  ;;  %2523 = vmatpush.bf16.msra.mxu1 %v4096_v44 }
 0x151   :  { %v1808_v35 = vadd.f32 %v4440_v43, %v826_v30  ;;  %v827_v43 = vperm.slane %v4445_v29, 1  ;;  %v4115_v30 = vld [vmem:[#allocation11 + $0x110] sm:$0xff] }
 0x152   :  { %2098 = vmatpush.bf16.msrb.mxu3 %v3608_v37  ;;  %2087 = vmatpush.bf16.msrb.mxu2 %v3368_v38 }
 0x153   :  { %v1821_v38 = vadd.f32 %v4442_v54, %v1808_v35 }
 0x154   :  { %2513 = vmatpush.bf16.msra.mxu0 %v4085_v49  ;;  %2524 = vmatpush.bf16.msra.mxu1 %v4095_v53  ;;  %v1822_v9 = vpop.f32.mrf.mxu1  ;;  %v1859_v18 = vpop.f32.mrf.mxu0  ;;  %v4112_v49 = vld [vmem:[#allocation11 + $0xf8] sm:$0xff] }
 0x155   :  { %v1860_v54 = vadd.f32 %v1859_v18, %v827_v43  ;;  %v4106_v9 = vld [vmem:[#allocation11 + $0xc8] sm:$0xff] }
 0x156   :  { %2099 = vmatpush.bf16.msrb.mxu3 %v3584_v45  ;;  %2088 = vmatpush.bf16.msrb.mxu2 %v3344_v2  ;;  %v4098_v45 = vld [vmem:[#allocation11 + $0x88] sm:$0xff] }
 0x158   :  { %2514 = vmatpush.bf16.msra.mxu0 %v4084_v57  ;;  %2525 = vmatpush.bf16.msra.mxu1 %v4094_v61 }
 0x15a   :  { %2100 = vmatpush.bf16.msrb.mxu3 %v3560_v3  ;;  %2089 = vmatpush.bf16.msrb.mxu2 %v3320_v36  ;;  %v4111_v3 = vld [vmem:[#allocation11 + $0xf0] sm:$0xff]  ;;  %v4110_v36 = vld [vmem:[#allocation11 + $0xe8] sm:$0xff] }
 0x15c   :  { %2515 = vmatpush.bf16.msra.mxu0 %v4083_v4  ;;  %2526 = vmatpush.bf16.msra.mxu1 %v4093_v7  ;;  %v1872_v26 = vpop.f32.mrf.mxu1  ;;  %v1861_v50 = vpop.f32.mrf.mxu0 }
 0x15d   :  { %v1873_v55 = vadd.f32 %v1872_v26, %v1860_v54  ;;  %v4117_v26 = vld [vmem:[#allocation11 + $0x120] sm:$0xff]  ;;  %v4116_v50 = vld [vmem:[#allocation11 + $0x118] sm:$0xff] }
 0x15e   :  { %2101 = vmatpush.bf16.msrb.mxu3 %v3536_v62  ;;  %2090 = vmatpush.bf16.msrb.mxu2 %v3296_v63  ;;  %v4108_v62 = vld [vmem:[#allocation11 + $0xd8] sm:$0xff] }
 0x160   :  { %2516 = vmatpush.bf16.msra.mxu0 %v4082_v13  ;;  %2527 = vmatpush.bf16.msra.mxu1 %v4092_v14 }
 0x162   :  { %2102 = vmatpush.bf16.msrb.mxu3 %v3512_v8  ;;  %2091 = vmatpush.bf16.msrb.mxu2 %v3272_v10 }
 0x164   :  { %2517 = vmatpush.bf16.msra.mxu0 %v4081_v22  ;;  %2528 = vmatpush.bf16.msra.mxu1 %v4091_v23  ;;  %v1911_v37 = vpop.f32.mrf.mxu0  ;;  %v4119_v23 = vld [vmem:[#allocation11 + $0x130] sm:$0xff] }
 0x165   :  { %2092 = vmatmul.bf16.vlgmr.msrb.gmra.mxu2 %v4418_v16  ;;  %v1874_v16 = vpop.f32.mrf.mxu1  ;;  %v1912_v7 = vadd.f32 %v1911_v37, %v828_v1 }
 0x166   :  { %2536 = vmatpush.bf16.msra.mxu2 %v4104_v15  ;;  %2103 = vmatpush.bf16.msrb.mxu3 %v3488_v19  ;;  %v4105_v15 = vld [vmem:[#allocation11 + $0xc0] sm:$0xff]  ;;  %v4120_v19 = vld [vmem:[#allocation11 + $0x138] sm:$0xff] }
 0x168   :  { %2529 = vmatpush.bf16.msra.mxu1 %v4090_v27  ;;  %v1833_v33 = vpop.f32.mrf.mxu2  ;;  %2562 = vmatpush.bf16.msrb.mxu0 %v4120_v19  ;;  %v4142_v19 = vld [vmem:[%s4468_s6] ss:$0 sm:$0xff] }
 0x169   :  { %v1834_v40 = vadd.f32 %v1833_v33, %v1821_v38  ;;  %v4114_v33 = vld [vmem:[#allocation11 + $0x108] sm:$0xff] }
 0x16a   :  { %2537 = vmatpush.bf16.msra.mxu2 %v4103_v24  ;;  %2104 = vmatpush.bf16.msrb.mxu3 %v3464_v25  ;;  %v4118_v24 = vld [vmem:[#allocation11 + $0x128] sm:$0xff] }
 0x16c   :  { %2530 = vmatpush.bf16.msra.mxu1 %v4089_v31  ;;  %2563 = vmatpush.bf16.msrb.mxu0 %v4119_v23 }
 0x16d   :  { %2105 = vmatmul.bf16.vlgmr.msrb.gmra.mxu3 %v4421_v46  ;;  %v1924_v41 = vpop.f32.mrf.mxu1  ;;  %v1913_v46 = vpop.f32.mrf.mxu0 }
 0x16e   :  { %2538 = vmatpush.bf16.msra.mxu2 %v4102_v28  ;;  %2549 = vmatpush.bf16.msra.mxu3 %v4112_v49  ;;  %v1925_v10 = vadd.f32 %v1924_v41, %v1912_v7  ;;  %v829_v28 = vperm.slane %v4445_v29, 3  ;;  %v4128_v41 = vld [vmem:[#allocation11 + $0x178] sm:$0xff] }
 0x16f   :  { %v4124_v49 = vld [vmem:[#allocation11 + $0x158] sm:$0xff] }
 0x170   :  { %v1846_v17 = vpop.f32.mrf.mxu3  ;;  %v1835_v42 = vpop.f32.mrf.mxu2  ;;  %2564 = vmatpush.bf16.msrb.mxu0 %v4118_v24  ;;  %2575 = vmatpush.bf16.msrb.mxu1 %v4128_v41 }
 0x171   :  { %v1847_v44 = vadd.f32 %v1846_v17, %v1834_v40 }
 0x172   :  { %2539 = vmatpush.bf16.msra.mxu2 %v4101_v32  ;;  %2550 = vmatpush.bf16.msra.mxu3 %v4111_v3 }
 0x173   :  { %v2110_v2 = vmax.f32 %v1847_v44, 0.0 }
 0x174   :  { %2565 = vmatpush.bf16.msrb.mxu0 %v4117_v26 }
 0x175   :  { %v2116_v47 = vpack.c.bf16 %v2110_v2, %v2110_v2  ;;  %v1926_v51 = vpop.f32.mrf.mxu1  ;;  %v4126_v2 = vld [vmem:[#allocation11 + $0x168] sm:$0xff] }
 0x176   :  { %2540 = vmatpush.bf16.msra.mxu2 %v4100_v34  ;;  %2551 = vmatpush.bf16.msra.mxu3 %v4110_v36  ;;  %v830_v51 = vperm.slane %v4445_v29, 4  ;;  %v4122_v36 = vld [vmem:[#allocation11 + $0x148] sm:$0xff] }
 0x177   :  { %2518 = vmatmul.bf16.vlgmr.msra.gmra.mxu0 %v2116_v47 }
 0x178   :  { %v1848_v52 = vpop.f32.mrf.mxu3  ;;  %v1885_v53 = vpop.f32.mrf.mxu2  ;;  %2566 = vmatpush.bf16.msrb.mxu0 %v4116_v50 }
 0x179   :  { %v1886_v56 = vadd.f32 %v1885_v53, %v1873_v55  ;;  %v4123_v52 = vld [vmem:[#allocation11 + $0x150] sm:$0xff] }
 0x17a   :  { %2541 = vmatpush.bf16.msra.mxu2 %v4099_v39  ;;  %2552 = vmatpush.bf16.msra.mxu3 %v4109_v60  ;;  %v4113_v39 = vld [vmem:[#allocation11 + $0x100] sm:$0xff] }
 0x17c   :  { %2567 = vmatpush.bf16.msrb.mxu0 %v4115_v30 }
 0x17e   :  { %2542 = vmatpush.bf16.msra.mxu2 %v4098_v45  ;;  %2553 = vmatpush.bf16.msra.mxu3 %v4108_v62  ;;  %v4127_v45 = vld [vmem:[#allocation11 + $0x170] sm:$0xff] }
 0x17f   :  { %2576 = vmatpush.bf16.msrb.mxu1 %v4127_v45 }
 0x180   :  { %v1898_v57 = vpop.f32.mrf.mxu3  ;;  %v1887_v58 = vpop.f32.mrf.mxu2  ;;  %2568 = vmatpush.bf16.msrb.mxu0 %v4114_v33 }
 0x181   :  { %v1899_v59 = vadd.f32 %v1898_v57, %v1886_v56 }
 0x182   :  { %2543 = vmatpush.bf16.msra.mxu2 %v4097_v48  ;;  %2554 = vmatpush.bf16.msra.mxu3 %v4107_v6  ;;  %v4125_v48 = vld [vmem:[#allocation11 + $0x160] sm:$0xff] }
 0x183   :  { %v2111_v61 = vmax.f32 %v1899_v59, 0.0  ;;  %2577 = vmatpush.bf16.msrb.mxu1 %v4126_v2  ;;  %v4121_v59 = vld [vmem:[#allocation11 + $0x140] sm:$0xff] }
 0x184   :  { %v1963_v0 = vpop.f32.mrf.mxu0  ;;  %2569 = vmatpush.bf16.msrb.mxu0 %v4113_v39 }
 0x185   :  { %v2117_v63 = vpack.c.bf16 %v2111_v61, %v2111_v61  ;;  %v1964_v32 = vadd.f32 %v1963_v0, %v829_v28 }
 0x186   :  { %2555 = vmatpush.bf16.msra.mxu3 %v4106_v9 }
 0x187   :  { %2531 = vmatmul.bf16.vlgmr.msra.gmra.mxu1 %v2117_v63 }
 0x188   :  { %v1900_v4 = vpop.f32.mrf.mxu3  ;;  %v1937_v5 = vpop.f32.mrf.mxu2  ;;  %2578 = vmatpush.bf16.msrb.mxu1 %v4125_v48 }
 0x189   :  { %v1938_v12 = vadd.f32 %v1937_v5, %v1925_v10  ;;  %v831_v4 = vperm.slane %v4445_v29, 5 }
 0x18a   :  { %2556 = vmatpush.bf16.msra.mxu3 %v4105_v15 }
 0x18c   :  { %v1976_v8 = vpop.f32.mrf.mxu1  ;;  %v1965_v11 = vpop.f32.mrf.mxu0  ;;  %2579 = vmatpush.bf16.msrb.mxu1 %v4124_v49 }
 0x18d   :  { %v1977_v34 = vadd.f32 %v1976_v8, %v1964_v32 }
 0x190   :  { %v1950_v13 = vpop.f32.mrf.mxu3  ;;  %v1939_v14 = vpop.f32.mrf.mxu2  ;;  %2580 = vmatpush.bf16.msrb.mxu1 %v4123_v52 }
 0x191   :  { %v1951_v18 = vadd.f32 %v1950_v13, %v1938_v12 }
 0x193   :  { %v2112_v20 = vmax.f32 %v1951_v18, 0.0 }
 0x194   :  { %v1978_v21 = vpop.f32.mrf.mxu1  ;;  %2581 = vmatpush.bf16.msrb.mxu1 %v4122_v36 }
 0x195   :  { %v2118_v22 = vpack.c.bf16 %v2112_v20, %v2112_v20 }
 0x197   :  { %2544 = vmatmul.bf16.vlgmr.msra.gmra.mxu2 %v2118_v22 }
 0x198   :  { %v1952_v25 = vpop.f32.mrf.mxu3  ;;  %2582 = vmatpush.bf16.msrb.mxu1 %v4121_v59 }
 0x1a4   :  { %v2015_v27 = vpop.f32.mrf.mxu0 }
 0x1a5   :  { %v2016_v3 = vadd.f32 %v2015_v27, %v830_v51 }
 0x1a8   :  { %v1989_v31 = vpop.f32.mrf.mxu2 }
 0x1a9   :  { %v1990_v37 = vadd.f32 %v1989_v31, %v1977_v34 }
 0x1ac   :  { %v2028_v16 = vpop.f32.mrf.mxu1  ;;  %v2017_v35 = vpop.f32.mrf.mxu0 }
 0x1ad   :  { %v2029_v55 = vadd.f32 %v2028_v16, %v2016_v3 }
 0x1b0   :  { %v2002_v38 = vpop.f32.mrf.mxu3  ;;  %v1991_v17 = vpop.f32.mrf.mxu2 }
 0x1b1   :  { %v2003_v40 = vadd.f32 %v2002_v38, %v1990_v37 }
 0x1b3   :  { %v2113_v42 = vmax.f32 %v2003_v40, 0.0 }
 0x1b4   :  { %v2030_v46 = vpop.f32.mrf.mxu1 }
 0x1b5   :  { %v2119_v44 = vpack.c.bf16 %v2113_v42, %v2113_v42 }
 0x1b7   :  { %2557 = vmatmul.bf16.vlgmr.msra.gmra.mxu3 %v2119_v44 }
 0x1b8   :  { %v2004_v47 = vpop.f32.mrf.mxu3 }
 0x1c4   :  { %v2067_v43 = vpop.f32.mrf.mxu0 }
 0x1c5   :  { %v2068_v6 = vadd.f32 %v2067_v43, %v831_v4 }
 0x1c8   :  { %v2041_v53 = vpop.f32.mrf.mxu2 }
 0x1c9   :  { %v2042_v57 = vadd.f32 %v2041_v53, %v2029_v55 }
 0x1cc   :  { %v2080_v54 = vpop.f32.mrf.mxu1  ;;  %v2069_v56 = vpop.f32.mrf.mxu0 }
 0x1cd   :  { %v2081_v7 = vadd.f32 %v2080_v54, %v2068_v6 }
 0x1d0   :  { %v2054_v58 = vpop.f32.mrf.mxu3  ;;  %v2043_v61 = vpop.f32.mrf.mxu2 }
 0x1d1   :  { %v2055_v60 = vadd.f32 %v2054_v58, %v2042_v57 }
 0x1d3   :  { %v2114_v62 = vmax.f32 %v2055_v60, 0.0 }
 0x1d4   :  { %v2082_v63 = vpop.f32.mrf.mxu1 }
 0x1d5   :  { %v2120_v0 = vpack.c.bf16 %v2114_v62, %v2114_v62 }
 0x1d7   :  { %2570 = vmatmul.bf16.vlgmr.msrb.gmra.mxu0 %v2120_v0 }
 0x1d8   :  { %v2056_v1 = vpop.f32.mrf.mxu3 }
 0x1e8   :  { %v2093_v5 = vpop.f32.mrf.mxu2 }
 0x1e9   :  { %v2094_v8 = vadd.f32 %v2093_v5, %v2081_v7 }
 0x1f0   :  { %v2106_v9 = vpop.f32.mrf.mxu3  ;;  %v2095_v11 = vpop.f32.mrf.mxu2 }
 0x1f1   :  { %v2107_v10 = vadd.f32 %v2106_v9, %v2094_v8 }
 0x1f3   :  { %v2115_v12 = vmax.f32 %v2107_v10, 0.0 }
 0x1f4   :  { %v2519_v15 = vpop.f32.mrf.mxu0 }
 0x1f5   :  { %v2121_v13 = vpack.c.bf16 %v2115_v12, %v2115_v12  ;;  %v2520_v20 = vadd.f32 %v4142_v19, %v2519_v15 }
 0x1f7   :  { %2583 = vmatmul.bf16.vlgmr.msrb.gmra.mxu1 %v2121_v13 }
 0x1f8   :  { %v2108_v14 = vpop.f32.mrf.mxu3 }
 0x1fc   :  { %v2521_v18 = vpop.f32.mrf.mxu0 }
 0x204   :  { %v2532_v21 = vpop.f32.mrf.mxu1 }
 0x205   :  { %v2533_v29 = vadd.f32 %v2532_v21, %v2520_v20 }
 0x20c   :  { %v2534_v22 = vpop.f32.mrf.mxu1 }
 0x21a   :  { %v2545_v23 = vpop.f32.mrf.mxu2 }
 0x21b   :  { %v2546_v24 = vadd.f32 %v2545_v23, %v2533_v29 }
 0x222   :  { %v2547_v25 = vpop.f32.mrf.mxu2 }
 0x23a   :  { %v2558_v26 = vpop.f32.mrf.mxu3 }
 0x23b   :  { %v2559_v30 = vadd.f32 %v2558_v26, %v2546_v24 }
 0x242   :  { %v2560_v50 = vpop.f32.mrf.mxu3 }
 0x254   :  { %v2571_v27 = vpop.f32.mrf.mxu0 }
 0x255   :  { %v2572_v31 = vadd.f32 %v2571_v27, %v2559_v30 }
 0x25c   :  { %v2573_v28 = vpop.f32.mrf.mxu0 }
 0x274   :  { %v2584_v32 = vpop.f32.mrf.mxu1 }
 0x275   :  { %v2585_v16 = vadd.f32 %v2584_v32, %v2572_v31 }
 0x277   :  { %2588 = vst [vmem:[#allocation13] sm:$0x3] %v2585_v16 }
 0x278   :  { %2599 = dma.vmem_to_hbm [thread:$0]  %s2595_s11, 32, %s2597_s14, [#allocation4]  }
 0x27c   :  { %v2586_v33 = vpop.f32.mrf.mxu1 }
 0x27d   :  { %4319 = dma.done.wait [#allocation4], 32  }
 0x27e   :  { %4320 = vsyncadd [#allocation4], 4294967264 }
 0x27f   :  { %2604 = vsyncpa [#allocation3], 1 }
 0x280   :  { %2605 = vsyncpa [#allocation6], 1 }
 0x281   :  { %2606 = vsyncpa [#allocation9], 1 }
 0x282   :  { %2607 = vsyncpa [#allocation12], 1 }
 0x283   :  { %2608 = vsyncpa [#allocation4], 1 }

// kernel: tpu_custom_call.1
= control target key start
LH: loop header
LB: loop body
LE: loop exit
PB: predicated region body
PF: predicated region fallthrough
CT: control target
= control target key end

     0   :  { %12 = vsyncpa [#allocation3], 0  ;;  %s4462_s0 = inlined_call_operand.hbm [shape: bf16[2,256], index: 0, kind: input, shape index: {}]   ;;  %s4463_s1 = inlined_call_operand.hbm [shape: bf16[256,512], index: 1, kind: input, shape index: {}]   ;;  %s4464_s2 = inlined_call_operand.hbm [shape: f32[1,512], index: 2, kind: input, shape index: {}]   ;;  %s4465_s3 = inlined_call_operand.hbm [shape: bf16[512,768], index: 3, kind: input, shape index: {}]   ;;  %s4466_s4 = inlined_call_operand.hbm [shape: f32[1,768], index: 4, kind: input, shape index: {}]   ;;  %s4467_s5 = inlined_call_operand.hbm [shape: bf16[768,128], index: 5, kind: input, shape index: {}]   ;;  %s4468_s6 = inlined_call_operand.vmem [shape: f32[1,128], index: 6, kind: input, shape index: {}]   ;;  %s4469_s7 = inlined_call_operand.hbm [shape: f32[2,128], index: 7, kind: output, shape index: {}]  }
   0x1   :  { %13 = vsyncpa [#allocation6], 0 }
   0x2   :  { %14 = vsyncpa [#allocation9], 0 }
   0x3   :  { %15 = vsyncpa [#allocation12], 0  ;;  %s32_s26 = sshll.u32 %s4463_s1, 4  ;;  %s33_s26 = int_to_ptr.hbm [resolvable:$true] %s32_s26 }
   0x4   :  { %16 = vsyncpa [#allocation4], 0  ;;  %s4321_s27 = smov [#allocation5]   ;;  %s56_s8 = sshll.u32 %s4465_s3, 4  ;;  %s57_s8 = int_to_ptr.hbm [resolvable:$true] %s56_s8 }
   0x5   :  { %s34_s28 = sshll.u32 %s4321_s27, 4  ;;  %s4322_s9 = smov 256   ;;  %s35_s28 = int_to_ptr.vmem [resolvable:$true] %s34_s28 }
   0x6   :  { %s4323_s10 = smov 16   ;;  %s4324_s11 = smov [#allocation8]  }
   0x7   :  { %40 = dma.hbm_to_vmem [thread:$0]  %s33_s26, 8192, %s35_s28, [#allocation6], %s4322_s9, %s4322_s9, %s4323_s10  }
   0x8   :  { %s58_s12 = sshll.u32 %s4324_s11, 4  ;;  %s4325_s13 = smov 384   ;;  %s59_s12 = int_to_ptr.vmem [resolvable:$true] %s58_s12 }
   0x9   :  { %s4326_s14 = smov 24   ;;  %s22_s16 = sshll.u32 %s4462_s0, 4  ;;  %s23_s16 = int_to_ptr.hbm [resolvable:$true] %s22_s16 }
   0xa   :  { %64 = dma.hbm_to_vmem [thread:$0]  %s57_s8, 24576, %s59_s12, [#allocation9], %s4325_s13, %s4325_s13, %s4326_s14  }
   0xb   :  { %s4327_s17 = smov [#allocation2]   ;;  %s46_s20 = sshll.u32 %s4464_s2, 4  ;;  %s47_s20 = int_to_ptr.hbm [resolvable:$true] %s46_s20 }
   0xc   :  { %s24_s18 = sshll.u32 %s4327_s17, 4  ;;  %s4328_s21 = smov [#allocation7]   ;;  %s25_s18 = int_to_ptr.vmem [resolvable:$true] %s24_s18 }
   0xd   :  { %27 = dma.hbm_to_vmem [thread:$0]  %s23_s16, 32, %s25_s18, [#allocation3]  }
   0xe   :  { %s48_s22 = sshll.u32 %s4328_s21, 4  ;;  %s70_s25 = sshll.u32 %s4466_s4, 4  ;;  %s49_s22 = int_to_ptr.vmem [resolvable:$true] %s48_s22  ;;  %s71_s25 = int_to_ptr.hbm [resolvable:$true] %s70_s25 }
   0xf   :  { %51 = dma.hbm_to_vmem [thread:$0]  %s47_s20, 64, %s49_s22, [#allocation6]  }
  0x10   :  { %s80_s27 = sshll.u32 %s4467_s5, 4  ;;  %s4329_s28 = smov [#allocation10]   ;;  %s81_s27 = int_to_ptr.hbm [resolvable:$true] %s80_s27 }
  0x11   :  { %s72_s29 = sshll.u32 %s4329_s28, 4  ;;  %s4330_s2 = smov [#allocation11]   ;;  %s73_s29 = int_to_ptr.vmem [resolvable:$true] %s72_s29 }
  0x12   :  { %75 = dma.hbm_to_vmem [thread:$0]  %s71_s25, 96, %s73_s29, [#allocation9]  }
  0x13   :  { %s82_s30 = sshll.u32 %s4330_s2, 4  ;;  %s4331_s8 = smov 64   ;;  %s83_s30 = int_to_ptr.vmem [resolvable:$true] %s82_s30 }
  0x14   :  { %s4332_s9 = smov 4  }
  0x15   :  { %88 = dma.hbm_to_vmem [thread:$0]  %s81_s27, 6144, %s83_s30, [#allocation12], %s4331_s8, %s4331_s8, %s4332_s9  }
  0x16   :  { %4311 = dma.done.wait [#allocation3], 32  }
  0x17   :  { %4312 = vsyncadd [#allocation3], 4294967264 }
  0x18   :  { %4313 = dma.done.wait [#allocation6], 8256  }
  0x19   :  { %4314 = vsyncadd [#allocation6], 4294959040 }
  0x1a   :  { %4315 = dma.done.wait [#allocation9], 24672  }
  0x1b   :  { %4316 = vsyncadd [#allocation9], 4294942624 }
  0x1c   :  { %4317 = dma.done.wait [#allocation12], 6144  }
  0x1d   :  { %4318 = vsyncadd [#allocation12], 4294961152  ;;  %v2723_v0 = vld [vmem:[#allocation5 + $0xe0] sm:$0xf]  ;;  %v3855_v1 = vld [vmem:[#allocation5 + $0xec] sm:$0xf0] }
  0x1e   :  { %v2851_v2 = vld [vmem:[#allocation5 + $0x1e0] sm:$0xf]  ;;  %v2724_v3 = vor.u32 %v3855_v1, %v2723_v0  ;;  %v3887_v4 = vld [vmem:[#allocation5 + $0x1ec] sm:$0xf0]  ;;  %v3853_v5 = vld [vmem:[#allocation5 + $0xe4] sm:$0xf] }
  0x1f   :  { %v2725_v6 = vld [vmem:[#allocation5 + $0xf0] sm:$0xf0]  ;;  %v2852_v7 = vor.u32 %v3887_v4, %v2851_v2  ;;  %v3885_v9 = vld [vmem:[#allocation5 + $0x1e4] sm:$0xf]  ;;  %v2707_v11 = vld [vmem:[#allocation5 + $0xc0] sm:$0xf] }
  0x20   :  { %v2728_v8 = vor.u32 %v3853_v5, %v2725_v6  ;;  %v2853_v10 = vld [vmem:[#allocation5 + $0x1f0] sm:$0xf0]  ;;  %520 = vmatpush.bf16.msra.mxu0 %v2724_v3  ;;  %v3851_v13 = vld [vmem:[#allocation5 + $0xcc] sm:$0xf0]  ;;  %v2835_v14 = vld [vmem:[#allocation5 + $0x1c0] sm:$0xf] }
  0x21   :  { %v2856_v12 = vor.u32 %v3885_v9, %v2853_v10  ;;  %v3883_v15 = vld [vmem:[#allocation5 + $0x1cc] sm:$0xf0]  ;;  %533 = vmatpush.bf16.msra.mxu1 %v2852_v7  ;;  %v2708_v16 = vor.u32 %v3851_v13, %v2707_v11  ;;  %v3849_v18 = vld [vmem:[#allocation5 + $0xc4] sm:$0xf]  ;;  %v2709_v19 = vld [vmem:[#allocation5 + $0xd0] sm:$0xf0] }
  0x22   :  { %546 = vmatpush.bf16.msra.mxu2 %v2728_v8  ;;  %v2836_v17 = vor.u32 %v3883_v15, %v2835_v14  ;;  %v3881_v20 = vld [vmem:[#allocation5 + $0x1c4] sm:$0xf]  ;;  %v2712_v21 = vor.u32 %v3849_v18, %v2709_v19  ;;  %v2837_v22 = vld [vmem:[#allocation5 + $0x1d0] sm:$0xf0]  ;;  %v2691_v23 = vld [vmem:[#allocation5 + $0xa0] sm:$0xf] }
  0x23   :  { %559 = vmatpush.bf16.msra.mxu3 %v2856_v12  ;;  %v3847_v24 = vld [vmem:[#allocation5 + $0xac] sm:$0xf0]  ;;  %v2840_v25 = vor.u32 %v3881_v20, %v2837_v22  ;;  %v2819_v26 = vld [vmem:[#allocation5 + $0x1a0] sm:$0xf]  ;;  %v3845_v28 = vld [vmem:[#allocation5 + $0xa4] sm:$0xf] }
  0x24   :  { %v3879_v27 = vld [vmem:[#allocation5 + $0x1ac] sm:$0xf0]  ;;  %521 = vmatpush.bf16.msra.mxu0 %v2708_v16  ;;  %v2692_v29 = vor.u32 %v3847_v24, %v2691_v23  ;;  %v2693_v30 = vld [vmem:[#allocation5 + $0xb0] sm:$0xf0]  ;;  %v3877_v31 = vld [vmem:[#allocation5 + $0x1a4] sm:$0xf] }
  0x25   :  { %v2821_v32 = vld [vmem:[#allocation5 + $0x1b0] sm:$0xf0]  ;;  %534 = vmatpush.bf16.msra.mxu1 %v2836_v17  ;;  %v2820_v33 = vor.u32 %v3879_v27, %v2819_v26  ;;  %v2696_v34 = vor.u32 %v3845_v28, %v2693_v30  ;;  %v2675_v35 = vld [vmem:[#allocation5 + $0x80] sm:$0xf]  ;;  %v3843_v36 = vld [vmem:[#allocation5 + $0x8c] sm:$0xf0] }
  0x26   :  { %547 = vmatpush.bf16.msra.mxu2 %v2712_v21  ;;  %v2803_v37 = vld [vmem:[#allocation5 + $0x180] sm:$0xf]  ;;  %v2824_v38 = vor.u32 %v3877_v31, %v2821_v32  ;;  %v3875_v39 = vld [vmem:[#allocation5 + $0x18c] sm:$0xf0]  ;;  %v3841_v40 = vld [vmem:[#allocation5 + $0x84] sm:$0xf]  ;;  %v2676_v44 = vor.u32 %v3843_v36, %v2675_v35 }
  0x27   :  { %560 = vmatpush.bf16.msra.mxu3 %v2840_v25  ;;  %v2677_v41 = vld [vmem:[#allocation5 + $0x90] sm:$0xf0]  ;;  %v3873_v42 = vld [vmem:[#allocation5 + $0x184] sm:$0xf]  ;;  %v2804_v45 = vor.u32 %v3875_v39, %v2803_v37  ;;  %v2659_v47 = vld [vmem:[#allocation5 + $0x60] sm:$0xf] }
  0x28   :  { %v2805_v43 = vld [vmem:[#allocation5 + $0x190] sm:$0xf0]  ;;  %522 = vmatpush.bf16.msra.mxu0 %v2692_v29  ;;  %v2680_v46 = vor.u32 %v3841_v40, %v2677_v41  ;;  %v3839_v48 = vld [vmem:[#allocation5 + $0x6c] sm:$0xf0]  ;;  %v2787_v49 = vld [vmem:[#allocation5 + $0x160] sm:$0xf] }
  0x29   :  { %535 = vmatpush.bf16.msra.mxu1 %v2820_v33  ;;  %v2808_v50 = vor.u32 %v3873_v42, %v2805_v43  ;;  %v3871_v51 = vld [vmem:[#allocation5 + $0x16c] sm:$0xf0]  ;;  %v3837_v52 = vld [vmem:[#allocation5 + $0x64] sm:$0xf]  ;;  %v2661_v53 = vld [vmem:[#allocation5 + $0x70] sm:$0xf0]  ;;  %v2660_v56 = vor.u32 %v3839_v48, %v2659_v47 }
  0x2a   :  { %548 = vmatpush.bf16.msra.mxu2 %v2696_v34  ;;  %v3869_v54 = vld [vmem:[#allocation5 + $0x164] sm:$0xf]  ;;  %v2789_v55 = vld [vmem:[#allocation5 + $0x170] sm:$0xf0]  ;;  %v2788_v57 = vor.u32 %v3871_v51, %v2787_v49  ;;  %v2664_v58 = vor.u32 %v3837_v52, %v2661_v53  ;;  %v2643_v59 = vld [vmem:[#allocation5 + $0x40] sm:$0xf] }
  0x2b   :  { %561 = vmatpush.bf16.msra.mxu3 %v2824_v38  ;;  %v3835_v60 = vld [vmem:[#allocation5 + $0x4c] sm:$0xf0]  ;;  %v2771_v61 = vld [vmem:[#allocation5 + $0x140] sm:$0xf]  ;;  %v2792_v62 = vor.u32 %v3869_v54, %v2789_v55  ;;  %v3833_v0 = vld [vmem:[#allocation5 + $0x44] sm:$0xf] }
  0x2c   :  { %523 = vmatpush.bf16.msra.mxu0 %v2676_v44  ;;  %v3867_v63 = vld [vmem:[#allocation5 + $0x14c] sm:$0xf0]  ;;  %v2645_v1 = vld [vmem:[#allocation5 + $0x50] sm:$0xf0]  ;;  %v3865_v2 = vld [vmem:[#allocation5 + $0x144] sm:$0xf]  ;;  %v2644_v4 = vor.u32 %v3835_v60, %v2643_v59 }
  0x2d   :  { %536 = vmatpush.bf16.msra.mxu1 %v2804_v45  ;;  %v2773_v3 = vld [vmem:[#allocation5 + $0x150] sm:$0xf0]  ;;  %v2772_v5 = vor.u32 %v3867_v63, %v2771_v61  ;;  %v2648_v6 = vor.u32 %v3833_v0, %v2645_v1  ;;  %v2627_v7 = vld [vmem:[#allocation5 + $0x20] sm:$0xf]  ;;  %v3831_v8 = vld [vmem:[#allocation5 + $0x2c] sm:$0xf0] }
  0x2e   :  { %549 = vmatpush.bf16.msra.mxu2 %v2680_v46  ;;  %v2755_v9 = vld [vmem:[#allocation5 + $0x120] sm:$0xf]  ;;  %v2776_v10 = vor.u32 %v3865_v2, %v2773_v3  ;;  %v3863_v11 = vld [vmem:[#allocation5 + $0x12c] sm:$0xf0]  ;;  %v3829_v12 = vld [vmem:[#allocation5 + $0x24] sm:$0xf]  ;;  %v2628_v17 = vor.u32 %v3831_v8, %v2627_v7 }
  0x2f   :  { %562 = vmatpush.bf16.msra.mxu3 %v2808_v50  ;;  %v2629_v13 = vld [vmem:[#allocation5 + $0x30] sm:$0xf0]  ;;  %v3861_v14 = vld [vmem:[#allocation5 + $0x124] sm:$0xf]  ;;  %v2611_v16 = vld [vmem:[#allocation5] sm:$0xf]  ;;  %v2756_v21 = vor.u32 %v3863_v11, %v2755_v9 }
  0x30   :  { %524 = vmatpush.bf16.msra.mxu0 %v2660_v56  ;;  %v2757_v15 = vld [vmem:[#allocation5 + $0x130] sm:$0xf0]  ;;  %v3827_v18 = vld [vmem:[#allocation5 + $0xc] sm:$0xf0]  ;;  %v2739_v19 = vld [vmem:[#allocation5 + $0x100] sm:$0xf]  ;;  %v2632_v22 = vor.u32 %v3829_v12, %v2629_v13 }
  0x31   :  { %537 = vmatpush.bf16.msra.mxu1 %v2788_v57  ;;  %v3859_v20 = vld [vmem:[#allocation5 + $0x10c] sm:$0xf0]  ;;  %v3825_v23 = vld [vmem:[#allocation5 + $0x4] sm:$0xf]  ;;  %v2613_v24 = vld [vmem:[#allocation5 + $0x10] sm:$0xf0]  ;;  %v2760_v26 = vor.u32 %v3861_v14, %v2757_v15  ;;  %v2612_v34 = vor.u32 %v3827_v18, %v2611_v16 }
  0x32   :  { %550 = vmatpush.bf16.msra.mxu2 %v2664_v58  ;;  %v115_v25 = vld [vmem:[#allocation2] sm:$0x3]  ;;  %v3857_v27 = vld [vmem:[#allocation5 + $0x104] sm:$0xf]  ;;  %v2741_v28 = vld [vmem:[#allocation5 + $0x110] sm:$0xf0]  ;;  %v2740_v38 = vor.u32 %v3859_v20, %v2739_v19  ;;  %v2616_v39 = vor.u32 %v3825_v23, %v2613_v24 }
  0x33   :  { %563 = vmatpush.bf16.msra.mxu3 %v2792_v62  ;;  %v2731_v29 = vld [vmem:[#allocation5 + $0xe8] sm:$0xf]  ;;  %v116_v30 = vunpack.c.l.bf16 %v115_v25  ;;  %v3856_v31 = vld [vmem:[#allocation5 + $0xf4] sm:$0xf0]  ;;  %v3854_v35 = vld [vmem:[#allocation5 + $0xec] sm:$0xf]  ;;  %v2744_v42 = vor.u32 %v3857_v27, %v2741_v28 }
  0x34   :  { %525 = vmatpush.bf16.msra.mxu0 %v2644_v4  ;;  %v2859_v32 = vld [vmem:[#allocation5 + $0x1e8] sm:$0xf]  ;;  %v3888_v33 = vld [vmem:[#allocation5 + $0x1f4] sm:$0xf0]  ;;  %v2733_v36 = vld [vmem:[#allocation5 + $0xf8] sm:$0xf0]  ;;  %v2732_v43 = vor.u32 %v3856_v31, %v2731_v29 }
  0x35   :  { %538 = vmatpush.bf16.msra.mxu1 %v2772_v5  ;;  %v117_v37 = vmax.f32 %v116_v30, 0.0  ;;  %v3886_v40 = vld [vmem:[#allocation5 + $0x1ec] sm:$0xf]  ;;  %v2861_v41 = vld [vmem:[#allocation5 + $0x1f8] sm:$0xf0]  ;;  %v2860_v44 = vor.u32 %v3888_v33, %v2859_v32  ;;  %v2736_v45 = vor.u32 %v3854_v35, %v2733_v36  ;;  %s4333_s10 = smov [#allocation13]  }
  0x36   :  { %551 = vmatpush.bf16.msra.mxu2 %v2648_v6  ;;  %v2715_v46 = vld [vmem:[#allocation5 + $0xc8] sm:$0xf]  ;;  %v3852_v47 = vld [vmem:[#allocation5 + $0xd4] sm:$0xf0]  ;;  %v2864_v49 = vor.u32 %v3886_v40, %v2861_v41  ;;  %v3850_v51 = vld [vmem:[#allocation5 + $0xcc] sm:$0xf] }
  0x37   :  { %564 = vmatpush.bf16.msra.mxu3 %v2776_v10  ;;  %119 = vst [vmem:[#allocation1] ss:$4 sm:$0xff] %v117_v37  ;;  %v2843_v48 = vld [vmem:[#allocation5 + $0x1c8] sm:$0xf]  ;;  %v3884_v50 = vld [vmem:[#allocation5 + $0x1d4] sm:$0xf0]  ;;  %v2716_v53 = vor.u32 %v3852_v47, %v2715_v46 }
  0x38   :  { %526 = vmatpush.bf16.msra.mxu0 %v2628_v17  ;;  %v2717_v52 = vld [vmem:[#allocation5 + $0xd8] sm:$0xf0]  ;;  %v3882_v54 = vld [vmem:[#allocation5 + $0x1cc] sm:$0xf]  ;;  %v2844_v56 = vor.u32 %v3884_v50, %v2843_v48  ;;  %v2699_v58 = vld [vmem:[#allocation5 + $0xa8] sm:$0xf] }
  0x39   :  { %539 = vmatpush.bf16.msra.mxu1 %v2756_v21  ;;  %v2845_v55 = vld [vmem:[#allocation5 + $0x1d8] sm:$0xf0]  ;;  %v2720_v57 = vor.u32 %v3850_v51, %v2717_v52  ;;  %v3848_v59 = vld [vmem:[#allocation5 + $0xb4] sm:$0xf0]  ;;  %v2827_v60 = vld [vmem:[#allocation5 + $0x1a8] sm:$0xf] }
  0x3a   :  { %552 = vmatpush.bf16.msra.mxu2 %v2632_v22  ;;  %v3880_v61 = vld [vmem:[#allocation5 + $0x1b4] sm:$0xf0]  ;;  %v3846_v62 = vld [vmem:[#allocation5 + $0xac] sm:$0xf]  ;;  %v2701_v63 = vld [vmem:[#allocation5 + $0xb8] sm:$0xf0]  ;;  %v2848_v4 = vor.u32 %v3882_v54, %v2845_v55  ;;  %v2700_v5 = vor.u32 %v3848_v59, %v2699_v58 }
  0x3b   :  { %565 = vmatpush.bf16.msra.mxu3 %v2760_v26  ;;  %v3878_v6 = vld [vmem:[#allocation5 + $0x1ac] sm:$0xf]  ;;  %v2829_v7 = vld [vmem:[#allocation5 + $0x1b8] sm:$0xf0]  ;;  %v2828_v8 = vor.u32 %v3880_v61, %v2827_v60  ;;  %v2704_v9 = vor.u32 %v3846_v62, %v2701_v63  ;;  %v2683_v10 = vld [vmem:[#allocation5 + $0x88] sm:$0xf] }
  0x3c   :  { %527 = vmatpush.bf16.msra.mxu0 %v2612_v34  ;;  %v3844_v11 = vld [vmem:[#allocation5 + $0x94] sm:$0xf0]  ;;  %v2811_v12 = vld [vmem:[#allocation5 + $0x188] sm:$0xf]  ;;  %v3842_v14 = vld [vmem:[#allocation5 + $0x8c] sm:$0xf]  ;;  %v2832_v16 = vor.u32 %v3878_v6, %v2829_v7 }
  0x3d   :  { %540 = vmatpush.bf16.msra.mxu1 %v2740_v38  ;;  %v3876_v13 = vld [vmem:[#allocation5 + $0x194] sm:$0xf0]  ;;  %v2685_v15 = vld [vmem:[#allocation5 + $0x98] sm:$0xf0]  ;;  %v2684_v17 = vor.u32 %v3844_v11, %v2683_v10  ;;  %v3874_v18 = vld [vmem:[#allocation5 + $0x18c] sm:$0xf] }
  0x3e   :  { %553 = vmatpush.bf16.msra.mxu2 %v2616_v39  ;;  %v120_v0 = vld.sshfl [vmem:[#allocation1] sm:$0xff pattern:$0x73625140]  ;;  %v121_v1 = vld.sshfl [vmem:[#allocation1 + $0x8] sm:$0xff pattern:$0x73625140]  ;;  %v2812_v20 = vor.u32 %v3876_v13, %v2811_v12  ;;  %v2688_v21 = vor.u32 %v3842_v14, %v2685_v15 }
  0x3f   :  { %566 = vmatpush.bf16.msra.mxu3 %v2744_v42  ;;  %v4392_v2 = vpack.c.bf16 %v120_v0, %v120_v0  ;;  %v4394_v3 = vpack.c.bf16 %v121_v1, %v121_v1  ;;  %v2813_v19 = vld [vmem:[#allocation5 + $0x198] sm:$0xf0]  ;;  %v2667_v22 = vld [vmem:[#allocation5 + $0x68] sm:$0xf]  ;;  %v3840_v23 = vld [vmem:[#allocation5 + $0x74] sm:$0xf0] }
  0x40   :  { %572 = vmatpush.bf16.msrb.mxu0 %v2732_v43  ;;  %v2795_v24 = vld [vmem:[#allocation5 + $0x168] sm:$0xf]  ;;  %v3872_v25 = vld [vmem:[#allocation5 + $0x174] sm:$0xf0]  ;;  %v3838_v26 = vld [vmem:[#allocation5 + $0x6c] sm:$0xf]  ;;  %v2816_v28 = vor.u32 %v3874_v18, %v2813_v19  ;;  %v2668_v29 = vor.u32 %v3840_v23, %v2667_v22 }
  0x41   :  { %585 = vmatpush.bf16.msrb.mxu1 %v2860_v44  ;;  %528 = vmatmul.bf16.vlgmr.msra.gmra.mxu0 %v4392_v2  ;;  %v2669_v27 = vld [vmem:[#allocation5 + $0x78] sm:$0xf0]  ;;  %v3870_v30 = vld [vmem:[#allocation5 + $0x16c] sm:$0xf]  ;;  %v2796_v32 = vor.u32 %v3872_v25, %v2795_v24  ;;  %v2651_v34 = vld [vmem:[#allocation5 + $0x48] sm:$0xf] }
  0x42   :  { %598 = vmatpush.bf16.msrb.mxu2 %v2736_v45  ;;  %541 = vmatmul.bf16.vlgmr.msra.gmra.mxu1 %v4394_v3  ;;  %v2797_v31 = vld [vmem:[#allocation5 + $0x178] sm:$0xf0]  ;;  %v2672_v33 = vor.u32 %v3838_v26, %v2669_v27  ;;  %v3836_v35 = vld [vmem:[#allocation5 + $0x54] sm:$0xf0]  ;;  %v2779_v36 = vld [vmem:[#allocation5 + $0x148] sm:$0xf] }
  0x43   :  { %611 = vmatpush.bf16.msrb.mxu3 %v2864_v49  ;;  %554 = vmatmul.bf16.vlgmr.msra.gmra.mxu2 %v4392_v2  ;;  %v3868_v37 = vld [vmem:[#allocation5 + $0x154] sm:$0xf0]  ;;  %v3834_v38 = vld [vmem:[#allocation5 + $0x4c] sm:$0xf]  ;;  %v2653_v39 = vld [vmem:[#allocation5 + $0x58] sm:$0xf0]  ;;  %v2800_v40 = vor.u32 %v3870_v30, %v2797_v31  ;;  %v2652_v41 = vor.u32 %v3836_v35, %v2651_v34 }
  0x44   :  { %573 = vmatpush.bf16.msrb.mxu0 %v2716_v53  ;;  %567 = vmatmul.bf16.vlgmr.msra.gmra.mxu3 %v4394_v3  ;;  %v3866_v42 = vld [vmem:[#allocation5 + $0x14c] sm:$0xf]  ;;  %v2781_v43 = vld [vmem:[#allocation5 + $0x158] sm:$0xf0]  ;;  %v2780_v44 = vor.u32 %v3868_v37, %v2779_v36  ;;  %v2656_v45 = vor.u32 %v3834_v38, %v2653_v39  ;;  %v2635_v46 = vld [vmem:[#allocation5 + $0x28] sm:$0xf] }
  0x45   :  { %586 = vmatpush.bf16.msrb.mxu1 %v2844_v56  ;;  %v3832_v47 = vld [vmem:[#allocation5 + $0x34] sm:$0xf0]  ;;  %v2763_v48 = vld [vmem:[#allocation5 + $0x128] sm:$0xf]  ;;  %v3830_v50 = vld [vmem:[#allocation5 + $0x2c] sm:$0xf]  ;;  %v2784_v52 = vor.u32 %v3866_v42, %v2781_v43 }
  0x46   :  { %599 = vmatpush.bf16.msrb.mxu2 %v2720_v57  ;;  %v3864_v49 = vld [vmem:[#allocation5 + $0x134] sm:$0xf0]  ;;  %v2637_v51 = vld [vmem:[#allocation5 + $0x38] sm:$0xf0]  ;;  %v2636_v53 = vor.u32 %v3832_v47, %v2635_v46  ;;  %v3862_v54 = vld [vmem:[#allocation5 + $0x12c] sm:$0xf] }
  0x47   :  { %612 = vmatpush.bf16.msrb.mxu3 %v2848_v4  ;;  %v2765_v55 = vld [vmem:[#allocation5 + $0x138] sm:$0xf0]  ;;  %v2619_v56 = vld [vmem:[#allocation5 + $0x8] sm:$0xf]  ;;  %v2764_v57 = vor.u32 %v3864_v49, %v2763_v48  ;;  %v2640_v58 = vor.u32 %v3830_v50, %v2637_v51  ;;  %v3828_v59 = vld [vmem:[#allocation5 + $0x14] sm:$0xf0] }
  0x48   :  { %574 = vmatpush.bf16.msrb.mxu0 %v2700_v5  ;;  %v2747_v60 = vld [vmem:[#allocation5 + $0x108] sm:$0xf]  ;;  %v3860_v61 = vld [vmem:[#allocation5 + $0x114] sm:$0xf0]  ;;  %v3826_v62 = vld [vmem:[#allocation5 + $0xc] sm:$0xf]  ;;  %v2768_v6 = vor.u32 %v3862_v54, %v2765_v55  ;;  %v2620_v7 = vor.u32 %v3828_v59, %v2619_v56 }
  0x49   :  { %587 = vmatpush.bf16.msrb.mxu1 %v2828_v8  ;;  %v2621_v63 = vld [vmem:[#allocation5 + $0x18] sm:$0xf0]  ;;  %v3035_v0 = vld [vmem:[#allocation8 + $0x150] sm:$0xf]  ;;  %v3934_v1 = vld [vmem:[#allocation8 + $0x164] sm:$0xf0]  ;;  %v2748_v8 = vor.u32 %v3860_v61, %v2747_v60 }
  0x4a   :  { %600 = vmatpush.bf16.msrb.mxu2 %v2704_v9  ;;  %v3227_v4 = vld [vmem:[#allocation8 + $0x2d0] sm:$0xf]  ;;  %v3982_v5 = vld [vmem:[#allocation8 + $0x2e4] sm:$0xf0]  ;;  %v2624_v9 = vor.u32 %v3826_v62, %v2621_v63  ;;  %v2749_v11 = vld [vmem:[#allocation5 + $0x118] sm:$0xf0]  ;;  %v3036_v12 = vor.u32 %v3934_v1, %v3035_v0 }
  0x4b   :  { %613 = vmatpush.bf16.msrb.mxu3 %v2832_v16  ;;  %v3858_v10 = vld [vmem:[#allocation5 + $0x10c] sm:$0xf]  ;;  %v3011_v13 = vld [vmem:[#allocation8 + $0x120] sm:$0xf]  ;;  %v3228_v14 = vor.u32 %v3982_v5, %v3227_v4  ;;  %v3419_v15 = vld [vmem:[#allocation8 + $0x450] sm:$0xf] }
  0x4c   :  { %575 = vmatpush.bf16.msrb.mxu0 %v2684_v17  ;;  %v4030_v16 = vld [vmem:[#allocation8 + $0x464] sm:$0xf0]  ;;  %v3928_v17 = vld [vmem:[#allocation8 + $0x134] sm:$0xf0]  ;;  %v3203_v18 = vld [vmem:[#allocation8 + $0x2a0] sm:$0xf] }
  0x4d   :  { %588 = vmatpush.bf16.msrb.mxu1 %v2812_v20  ;;  %v3976_v19 = vld [vmem:[#allocation8 + $0x2b4] sm:$0xf0]  ;;  %v3420_v20 = vor.u32 %v4030_v16, %v3419_v15  ;;  %v3395_v22 = vld [vmem:[#allocation8 + $0x420] sm:$0xf]  ;;  %v3012_v24 = vor.u32 %v3928_v17, %v3011_v13  ;;  %v2987_v25 = vld [vmem:[#allocation8 + $0xf0] sm:$0xf] }
  0x4e   :  { %601 = vmatpush.bf16.msrb.mxu2 %v2688_v21  ;;  %v2752_v21 = vor.u32 %v3858_v10, %v2749_v11  ;;  %v4024_v23 = vld [vmem:[#allocation8 + $0x434] sm:$0xf0]  ;;  %v3922_v26 = vld [vmem:[#allocation8 + $0x104] sm:$0xf0]  ;;  %v3204_v27 = vor.u32 %v3976_v19, %v3203_v18  ;;  %v3611_v31 = vld [vmem:[#allocation8 + $0x5d0] sm:$0xf] }
  0x4f   :  { %614 = vmatpush.bf16.msrb.mxu3 %v2816_v28  ;;  %v3179_v28 = vld [vmem:[#allocation8 + $0x270] sm:$0xf]  ;;  %v3396_v30 = vor.u32 %v4024_v23, %v3395_v22  ;;  %v4018_v35 = vld [vmem:[#allocation8 + $0x404] sm:$0xf0]  ;;  %v2988_v36 = vor.u32 %v3922_v26, %v2987_v25  ;;  %v2963_v37 = vld [vmem:[#allocation8 + $0xc0] sm:$0xf] }
  0x50   :  { %576 = vmatpush.bf16.msrb.mxu0 %v2668_v29  ;;  %v3970_v29 = vld [vmem:[#allocation8 + $0x284] sm:$0xf0]  ;;  %v3371_v34 = vld [vmem:[#allocation8 + $0x3f0] sm:$0xf]  ;;  %v3916_v38 = vld [vmem:[#allocation8 + $0xd4] sm:$0xf0] }
  0x51   :  { %589 = vmatpush.bf16.msrb.mxu1 %v2796_v32  ;;  %v4078_v32 = vld [vmem:[#allocation8 + $0x5e4] sm:$0xf0]  ;;  %v3180_v39 = vor.u32 %v3970_v29, %v3179_v28  ;;  %v3372_v42 = vor.u32 %v4018_v35, %v3371_v34  ;;  %v3587_v43 = vld [vmem:[#allocation8 + $0x5a0] sm:$0xf]  ;;  %v4012_v46 = vld [vmem:[#allocation8 + $0x3d4] sm:$0xf0]  ;;  %v2964_v47 = vor.u32 %v3916_v38, %v2963_v37 }
  0x52   :  { %602 = vmatpush.bf16.msrb.mxu2 %v2672_v33  ;;  %v3612_v33 = vor.u32 %v4078_v32, %v3611_v31  ;;  %v2939_v48 = vld [vmem:[#allocation8 + $0x90] sm:$0xf]  ;;  %v3910_v49 = vld [vmem:[#allocation8 + $0xa4] sm:$0xf0]  ;;  %v2915_v59 = vld [vmem:[#allocation8 + $0x60] sm:$0xf] }
  0x53   :  { %615 = vmatpush.bf16.msrb.mxu3 %v2800_v40  ;;  %v3155_v40 = vld [vmem:[#allocation8 + $0x240] sm:$0xf]  ;;  %v3131_v51 = vld [vmem:[#allocation8 + $0x210] sm:$0xf]  ;;  %v4066_v54 = vld [vmem:[#allocation8 + $0x584] sm:$0xf0] }
  0x54   :  { %577 = vmatpush.bf16.msrb.mxu0 %v2652_v41  ;;  %v3964_v41 = vld [vmem:[#allocation8 + $0x254] sm:$0xf0]  ;;  %v3323_v56 = vld [vmem:[#allocation8 + $0x390] sm:$0xf]  ;;  %v3107_v62 = vld [vmem:[#allocation8 + $0x1e0] sm:$0xf] }
  0x55   :  { %590 = vmatpush.bf16.msrb.mxu1 %v2780_v44  ;;  %v4072_v44 = vld [vmem:[#allocation8 + $0x5b4] sm:$0xf0]  ;;  %v3156_v50 = vor.u32 %v3964_v41, %v3155_v40  ;;  %v3539_v1 = vld [vmem:[#allocation8 + $0x540] sm:$0xf]  ;;  %v3083_v10 = vld [vmem:[#allocation8 + $0x1b0] sm:$0xf] }
  0x56   :  { %603 = vmatpush.bf16.msrb.mxu2 %v2656_v45  ;;  %v3588_v45 = vor.u32 %v4072_v44, %v3587_v43  ;;  %v3904_v60 = vld [vmem:[#allocation8 + $0x74] sm:$0xf0]  ;;  %v3946_v11 = vld [vmem:[#allocation8 + $0x1c4] sm:$0xf0]  ;;  %v2867_v13 = vld [vmem:[#allocation8] sm:$0xf] }
  0x57   :  { %616 = vmatpush.bf16.msrb.mxu3 %v2784_v52  ;;  %v3958_v52 = vld [vmem:[#allocation8 + $0x224] sm:$0xf0]  ;;  %v3952_v63 = vld [vmem:[#allocation8 + $0x1f4] sm:$0xf0]  ;;  %v3084_v15 = vor.u32 %v3946_v11, %v3083_v10  ;;  %v3931_v16 = vld [vmem:[#allocation8 + $0x154] sm:$0xf] }
  0x58   :  { %578 = vmatpush.bf16.msrb.mxu0 %v2636_v53  ;;  %v3132_v61 = vor.u32 %v3958_v52, %v3131_v51  ;;  %v4060_v4 = vld [vmem:[#allocation8 + $0x554] sm:$0xf0]  ;;  %v3059_v17 = vld [vmem:[#allocation8 + $0x180] sm:$0xf]  ;;  %v3037_v19 = vld [vmem:[#allocation8 + $0x168] sm:$0xf0] }
  0x59   :  { %591 = vmatpush.bf16.msrb.mxu1 %v2764_v57  ;;  %v4006_v57 = vld [vmem:[#allocation8 + $0x3a4] sm:$0xf0]  ;;  %v3540_v5 = vor.u32 %v4060_v4, %v3539_v1  ;;  %v3940_v18 = vld [vmem:[#allocation8 + $0x194] sm:$0xf0]  ;;  %v3925_v25 = vld [vmem:[#allocation8 + $0x124] sm:$0xf] }
  0x5a   :  { %604 = vmatpush.bf16.msrb.mxu2 %v2640_v58  ;;  %v2940_v58 = vor.u32 %v3910_v49, %v2939_v48  ;;  %v3324_v0 = vor.u32 %v4006_v57, %v3323_v56  ;;  %v3060_v23 = vor.u32 %v3940_v18, %v3059_v17  ;;  %v3973_v28 = vld [vmem:[#allocation8 + $0x2a4] sm:$0xf]  ;;  %v3205_v29 = vld [vmem:[#allocation8 + $0x2b8] sm:$0xf0]  ;;  %v3919_v31 = vld [vmem:[#allocation8 + $0xf4] sm:$0xf] }
  0x5b   :  { %617 = vmatpush.bf16.msrb.mxu3 %v2768_v6  ;;  %v2916_v6 = vor.u32 %v3904_v60, %v2915_v59  ;;  %v3208_v32 = vor.u32 %v3973_v28, %v3205_v29  ;;  %v3967_v34 = vld [vmem:[#allocation8 + $0x274] sm:$0xf]  ;;  %v3181_v35 = vld [vmem:[#allocation8 + $0x288] sm:$0xf0]  ;;  %v3913_v37 = vld [vmem:[#allocation8 + $0xc4] sm:$0xf] }
  0x5c   :  { %579 = vmatpush.bf16.msrb.mxu0 %v2620_v7  ;;  %v2891_v7 = vld [vmem:[#allocation8 + $0x30] sm:$0xf]  ;;  %v3184_v38 = vor.u32 %v3967_v34, %v3181_v35  ;;  %v3961_v40 = vld [vmem:[#allocation8 + $0x244] sm:$0xf]  ;;  %v3157_v41 = vld [vmem:[#allocation8 + $0x258] sm:$0xf0] }
  0x5d   :  { %592 = vmatpush.bf16.msrb.mxu1 %v2748_v8  ;;  %v3108_v8 = vor.u32 %v3952_v63, %v3107_v62  ;;  %v3160_v43 = vor.u32 %v3961_v40, %v3157_v41  ;;  %v3907_v44 = vld [vmem:[#allocation8 + $0x94] sm:$0xf]  ;;  %v3901_v48 = vld [vmem:[#allocation8 + $0x64] sm:$0xf]  ;;  %v3515_v52 = vld [vmem:[#allocation8 + $0x510] sm:$0xf] }
  0x5e   :  { %605 = vmatpush.bf16.msrb.mxu2 %v2624_v9  ;;  %v3898_v9 = vld [vmem:[#allocation8 + $0x44] sm:$0xf0]  ;;  %v3275_v57 = vld [vmem:[#allocation8 + $0x330] sm:$0xf]  ;;  %v3895_v59 = vld [vmem:[#allocation8 + $0x34] sm:$0xf] }
  0x5f   :  { %580 = vmatmul.bf16.vlgmr.msrb.gmra.mxu0 %v4392_v2  ;;  %618 = vmatpush.bf16.msrb.mxu3 %v2752_v21  ;;  %v3229_v21 = vld [vmem:[#allocation8 + $0x2e8] sm:$0xf0]  ;;  %v3491_v63 = vld [vmem:[#allocation8 + $0x4e0] sm:$0xf]  ;;  %v3949_v1 = vld [vmem:[#allocation8 + $0x1e4] sm:$0xf] }
  0x60   :  { %1798 = vmatpush.bf16.msra.mxu0 %v3036_v12  ;;  %593 = vmatmul.bf16.vlgmr.msrb.gmra.mxu1 %v4394_v3  ;;  %v2892_v12 = vor.u32 %v3898_v9, %v2891_v7  ;;  %v3251_v7 = vld [vmem:[#allocation8 + $0x300] sm:$0xf]  ;;  %v3889_v10 = vld [vmem:[#allocation8 + $0x4] sm:$0xf]  ;;  %v2869_v11 = vld [vmem:[#allocation8 + $0x18] sm:$0xf0] }
  0x61   :  { %1811 = vmatpush.bf16.msra.mxu1 %v3228_v14  ;;  %606 = vmatmul.bf16.vlgmr.msrb.gmra.mxu2 %v4392_v2  ;;  %v3347_v2 = vld [vmem:[#allocation8 + $0x3c0] sm:$0xf]  ;;  %v3892_v14 = vld [vmem:[#allocation8 + $0x14] sm:$0xf0]  ;;  %v4042_v17 = vld [vmem:[#allocation8 + $0x4c4] sm:$0xf0] }
  0x62   :  { %1824 = vmatpush.bf16.msra.mxu2 %v3420_v20  ;;  %619 = vmatmul.bf16.vlgmr.msrb.gmra.mxu3 %v4394_v3  ;;  %v3348_v53 = vor.u32 %v4012_v46, %v3347_v2  ;;  %v3563_v3 = vld [vmem:[#allocation8 + $0x570] sm:$0xf]  ;;  %v3979_v20 = vld [vmem:[#allocation8 + $0x2d4] sm:$0xf]  ;;  %v2868_v22 = vor.u32 %v3892_v14, %v2867_v13  ;;  %v3299_v46 = vld [vmem:[#allocation8 + $0x360] sm:$0xf]  ;;  %v2872_v13 = vor.u32 %v3889_v10, %v2869_v11 }
  0x63   :  { %1837 = vmatpush.bf16.msra.mxu3 %v3612_v33  ;;  %v3564_v55 = vor.u32 %v4066_v54, %v3563_v3  ;;  %v3232_v26 = vor.u32 %v3979_v20, %v3229_v21  ;;  %v2989_v33 = vld [vmem:[#allocation8 + $0x108] sm:$0xf0]  ;;  %v3955_v3 = vld [vmem:[#allocation8 + $0x214] sm:$0xf]  ;;  %v3937_v28 = vld [vmem:[#allocation8 + $0x184] sm:$0xf] }
  0x64   :  { %1799 = vmatpush.bf16.msra.mxu0 %v3012_v24  ;;  %v3040_v24 = vor.u32 %v3931_v16, %v3037_v19  ;;  %v3421_v14 = vld [vmem:[#allocation8 + $0x468] sm:$0xf0]  ;;  %v3467_v16 = vld [vmem:[#allocation8 + $0x4b0] sm:$0xf]  ;;  %v3943_v18 = vld [vmem:[#allocation8 + $0x1b4] sm:$0xf] }
  0x65   :  { %1812 = vmatpush.bf16.msra.mxu1 %v3204_v27  ;;  %v3013_v27 = vld [vmem:[#allocation8 + $0x138] sm:$0xf0]  ;;  %v3468_v19 = vor.u32 %v4042_v17, %v3467_v16  ;;  %v3085_v20 = vld [vmem:[#allocation8 + $0x1c8] sm:$0xf0]  ;;  %v4015_v34 = vld [vmem:[#allocation8 + $0x3f4] sm:$0xf] }
  0x66   :  { %1825 = vmatpush.bf16.msra.mxu2 %v3396_v30  ;;  %v3016_v30 = vor.u32 %v3925_v25, %v3013_v27  ;;  %v3088_v21 = vor.u32 %v3943_v18, %v3085_v20  ;;  %v3443_v25 = vld [vmem:[#allocation8 + $0x480] sm:$0xf]  ;;  %v3061_v29 = vld [vmem:[#allocation8 + $0x198] sm:$0xf0]  ;;  %v3373_v35 = vld [vmem:[#allocation8 + $0x408] sm:$0xf0] }
  0x67   :  { %1838 = vmatpush.bf16.msra.mxu3 %v3588_v45  ;;  %v2941_v45 = vld [vmem:[#allocation8 + $0xa8] sm:$0xf0]  ;;  %v4009_v40 = vld [vmem:[#allocation8 + $0x3c4] sm:$0xf]  ;;  %v3349_v41 = vld [vmem:[#allocation8 + $0x3d8] sm:$0xf0] }
  0x68   :  { %1800 = vmatpush.bf16.msra.mxu0 %v2988_v36  ;;  %v2992_v36 = vor.u32 %v3919_v31, %v2989_v33  ;;  %v2944_v2 = vor.u32 %v3907_v44, %v2941_v45  ;;  %v3064_v31 = vor.u32 %v3937_v28, %v3061_v29  ;;  %v3565_v44 = vld [vmem:[#allocation8 + $0x588] sm:$0xf0]  ;;  %v3253_v10 = vld [vmem:[#allocation8 + $0x318] sm:$0xf0]  ;;  %v3019_v20 = vld [vmem:[#allocation8 + $0x128] sm:$0xf] }
  0x69   :  { %1813 = vmatpush.bf16.msra.mxu1 %v3180_v39  ;;  %v2965_v39 = vld [vmem:[#allocation8 + $0xd8] sm:$0xf0]  ;;  %v3469_v16 = vld [vmem:[#allocation8 + $0x4c8] sm:$0xf0]  ;;  %v4033_v28 = vld [vmem:[#allocation8 + $0x484] sm:$0xf] }
  0x6a   :  { %1826 = vmatpush.bf16.msra.mxu2 %v3372_v42  ;;  %v2968_v42 = vor.u32 %v3913_v37, %v2965_v39  ;;  %v4069_v37 = vld [vmem:[#allocation8 + $0x5a4] sm:$0xf]  ;;  %v3445_v29 = vld [vmem:[#allocation8 + $0x498] sm:$0xf0]  ;;  %s2594_s11 = sshll.u32 %s4333_s10, 4  ;;  %s2596_s14 = sshll.u32 %s4469_s7, 4  ;;  %s2595_s11 = int_to_ptr.vmem [resolvable:$true] %s2594_s11  ;;  %s2597_s14 = int_to_ptr.hbm [resolvable:$true] %s2596_s14 }
  0x6b   :  { %1839 = vmatpush.bf16.msra.mxu3 %v3564_v55  ;;  %v3133_v55 = vld [vmem:[#allocation8 + $0x228] sm:$0xf0] }
  0x6c   :  { %1801 = vmatpush.bf16.msra.mxu0 %v2964_v47  ;;  %v4000_v47 = vld [vmem:[#allocation8 + $0x374] sm:$0xf0]  ;;  %v3136_v56 = vor.u32 %v3955_v3, %v3133_v55  ;;  %v4051_v55 = vld [vmem:[#allocation8 + $0x514] sm:$0xf] }
  0x6d   :  { %1814 = vmatpush.bf16.msra.mxu1 %v3156_v50  ;;  %v3300_v49 = vor.u32 %v4000_v47, %v3299_v46  ;;  %v2917_v50 = vld [vmem:[#allocation8 + $0x78] sm:$0xf0]  ;;  %v3325_v46 = vld [vmem:[#allocation8 + $0x3a8] sm:$0xf0] }
  0x6e   :  { %1827 = vmatpush.bf16.msra.mxu2 %v3348_v53  ;;  %v2920_v51 = vor.u32 %v3901_v48, %v2917_v50  ;;  %v4054_v53 = vld [vmem:[#allocation8 + $0x524] sm:$0xf0]  ;;  %v4057_v48 = vld [vmem:[#allocation8 + $0x544] sm:$0xf]  ;;  %v4404_v50 = vld [vmem:[#allocation7] sm:$0xf] }
  0x6f   :  { %1840 = vmatpush.bf16.msra.mxu3 %v3540_v5  ;;  %v3516_v54 = vor.u32 %v4054_v53, %v3515_v52  ;;  %v3109_v5 = vld [vmem:[#allocation8 + $0x1f8] sm:$0xf0]  ;;  %v3997_v52 = vld [vmem:[#allocation8 + $0x364] sm:$0xf] }
  0x70   :  { %1802 = vmatpush.bf16.msra.mxu0 %v2940_v58  ;;  %v3994_v58 = vld [vmem:[#allocation8 + $0x344] sm:$0xf0]  ;;  %v3301_v53 = vld [vmem:[#allocation8 + $0x378] sm:$0xf0] }
  0x71   :  { %1815 = vmatpush.bf16.msra.mxu1 %v3132_v61  ;;  %v3276_v60 = vor.u32 %v3994_v58, %v3275_v57  ;;  %v2893_v61 = vld [vmem:[#allocation8 + $0x48] sm:$0xf0]  ;;  %v3304_v3 = vor.u32 %v3997_v52, %v3301_v53  ;;  %v3991_v58 = vld [vmem:[#allocation8 + $0x334] sm:$0xf]  ;;  %v3965_v52 = vld [vmem:[#allocation8 + $0x25c] sm:$0xf0] }
  0x72   :  { %1828 = vmatpush.bf16.msra.mxu2 %v3324_v0  ;;  %v2896_v62 = vor.u32 %v3895_v59, %v2893_v61  ;;  %v4048_v0 = vld [vmem:[#allocation8 + $0x4f4] sm:$0xf0]  ;;  %v3277_v59 = vld [vmem:[#allocation8 + $0x348] sm:$0xf0] }
  0x73   :  { %1841 = vmatpush.bf16.msra.mxu3 %v3516_v54  ;;  %v3492_v4 = vor.u32 %v4048_v0, %v3491_v63  ;;  %v192_v54 = vperm.slane %v4404_v50, 0  ;;  %v3280_v61 = vor.u32 %v3991_v58, %v3277_v59  ;;  %v4045_v0 = vld [vmem:[#allocation8 + $0x4e4] sm:$0xf]  ;;  %v3139_v58 = vld [vmem:[#allocation8 + $0x218] sm:$0xf] }
  0x74   :  { %1803 = vmatpush.bf16.msra.mxu0 %v2916_v6  ;;  %v3112_v6 = vor.u32 %v3949_v1, %v3109_v5  ;;  %v3493_v1 = vld [vmem:[#allocation8 + $0x4f8] sm:$0xf0]  ;;  %v3043_v5 = vld [vmem:[#allocation8 + $0x158] sm:$0xf]  ;;  %v3959_v59 = vld [vmem:[#allocation8 + $0x22c] sm:$0xf0] }
  0x75   :  { %1816 = vmatpush.bf16.msra.mxu1 %v3108_v8  ;;  %v3988_v8 = vld [vmem:[#allocation8 + $0x314] sm:$0xf0] }
  0x76   :  { %1829 = vmatpush.bf16.msra.mxu2 %v3300_v49  ;;  %v3252_v9 = vor.u32 %v3988_v8, %v3251_v7  ;;  %v3541_v49 = vld [vmem:[#allocation8 + $0x558] sm:$0xf0]  ;;  %v3935_v8 = vld [vmem:[#allocation8 + $0x16c] sm:$0xf0] }
  0x77   :  { %1842 = vmatpush.bf16.msra.mxu3 %v3492_v4  ;;  %v193_v4 = vperm.slane %v4404_v50, 1 }
  0x78   :  { %1804 = vmatpush.bf16.msra.mxu0 %v2892_v12  ;;  %v4027_v12 = vld [vmem:[#allocation8 + $0x454] sm:$0xf] }
  0x79   :  { %1817 = vmatpush.bf16.msra.mxu1 %v3084_v15  ;;  %v3424_v15 = vor.u32 %v4027_v12, %v3421_v14  ;;  %v3044_v14 = vor.u32 %v3935_v8, %v3043_v5  ;;  %v3427_v5 = vld [vmem:[#allocation8 + $0x458] sm:$0xf]  ;;  %v3953_v8 = vld [vmem:[#allocation8 + $0x1fc] sm:$0xf0] }
  0x7a   :  { %1830 = vmatpush.bf16.msra.mxu2 %v3276_v60 }
  0x7b   :  { %1843 = vmatpush.bf16.msra.mxu3 %v3468_v19 }
  0x7c   :  { %1805 = vmatpush.bf16.msra.mxu0 %v2868_v22  ;;  %v4021_v22 = vld [vmem:[#allocation8 + $0x424] sm:$0xf] }
  0x7d   :  { %1818 = vmatpush.bf16.msra.mxu1 %v3060_v23  ;;  %v3397_v23 = vld [vmem:[#allocation8 + $0x438] sm:$0xf0] }
  0x7e   :  { %1831 = vmatpush.bf16.msra.mxu2 %v3252_v9  ;;  %v3985_v9 = vld [vmem:[#allocation8 + $0x304] sm:$0xf] }
  0x7f   :  { %v3256_v11 = vor.u32 %v3985_v9, %v3253_v10 }
  0x80   :  { %1850 = vmatpush.bf16.msrb.mxu0 %v3040_v24  ;;  %v3400_v24 = vor.u32 %v4021_v22, %v3397_v23  ;;  %v3235_v23 = vld [vmem:[#allocation8 + $0x2d8] sm:$0xf] }
  0x81   :  { %1863 = vmatpush.bf16.msrb.mxu1 %v3232_v26  ;;  %v4036_v26 = vld [vmem:[#allocation8 + $0x494] sm:$0xf0] }
  0x82   :  { %1876 = vmatpush.bf16.msrb.mxu2 %v3424_v15  ;;  %v3444_v27 = vor.u32 %v4036_v26, %v3443_v25  ;;  %v4039_v15 = vld [vmem:[#allocation8 + $0x4b4] sm:$0xf]  ;;  %v3983_v26 = vld [vmem:[#allocation8 + $0x2ec] sm:$0xf0] }
  0x83   :  { %v3472_v22 = vor.u32 %v4039_v15, %v3469_v16  ;;  %v3932_v15 = vld [vmem:[#allocation8 + $0x15c] sm:$0xf] }
  0x84   :  { %1851 = vmatpush.bf16.msrb.mxu0 %v3016_v30  ;;  %v4075_v30 = vld [vmem:[#allocation8 + $0x5d4] sm:$0xf]  ;;  %1844 = vmatpush.bf16.msra.mxu3 %v3444_v27 }
  0x85   :  { %1864 = vmatpush.bf16.msrb.mxu1 %v3208_v32  ;;  %v3613_v32 = vld [vmem:[#allocation8 + $0x5e8] sm:$0xf0] }
  0x86   :  { %1877 = vmatpush.bf16.msrb.mxu2 %v3400_v24  ;;  %v3616_v33 = vor.u32 %v4075_v30, %v3613_v32 }
  0x88   :  { %1852 = vmatpush.bf16.msrb.mxu0 %v2992_v36  ;;  %v3376_v36 = vor.u32 %v4015_v34, %v3373_v35  ;;  %1889 = vmatpush.bf16.msrb.mxu3 %v3616_v33  ;;  %v2995_v33 = vld [vmem:[#allocation8 + $0xf8] sm:$0xf]  ;;  %v3923_v34 = vld [vmem:[#allocation8 + $0x10c] sm:$0xf0]  ;;  %v3236_v35 = vor.u32 %v3983_v26, %v3235_v23 }
  0x89   :  { %1865 = vmatpush.bf16.msrb.mxu1 %v3184_v38  ;;  %v3589_v38 = vld [vmem:[#allocation8 + $0x5b8] sm:$0xf0] }
  0x8a   :  { %1878 = vmatpush.bf16.msrb.mxu2 %v3376_v36  ;;  %v3592_v39 = vor.u32 %v4069_v37, %v3589_v38  ;;  %v3211_v37 = vld [vmem:[#allocation8 + $0x2a8] sm:$0xf]  ;;  %v3977_v38 = vld [vmem:[#allocation8 + $0x2bc] sm:$0xf0] }
  0x8c   :  { %1853 = vmatpush.bf16.msrb.mxu0 %v2968_v42  ;;  %v3352_v42 = vor.u32 %v4009_v40, %v3349_v41  ;;  %1890 = vmatpush.bf16.msrb.mxu3 %v3592_v39  ;;  %v2996_v39 = vor.u32 %v3923_v34, %v2995_v33 }
  0x8d   :  { %1866 = vmatpush.bf16.msrb.mxu1 %v3160_v43  ;;  %v4063_v43 = vld [vmem:[#allocation8 + $0x574] sm:$0xf] }
  0x8e   :  { %1879 = vmatpush.bf16.msrb.mxu2 %v3352_v42  ;;  %v3568_v45 = vor.u32 %v4063_v43, %v3565_v44  ;;  %v2971_v42 = vld [vmem:[#allocation8 + $0xc8] sm:$0xf]  ;;  %v3917_v43 = vld [vmem:[#allocation8 + $0xdc] sm:$0xf0]  ;;  %v3212_v44 = vor.u32 %v3977_v38, %v3211_v37  ;;  %v3619_v37 = vld [vmem:[#allocation8 + $0x5d8] sm:$0xf] }
  0x8f   :  { %v4079_v38 = vld [vmem:[#allocation8 + $0x5ec] sm:$0xf0] }
  0x90   :  { %1854 = vmatpush.bf16.msrb.mxu0 %v2944_v2  ;;  %v4003_v2 = vld [vmem:[#allocation8 + $0x394] sm:$0xf]  ;;  %1891 = vmatpush.bf16.msrb.mxu3 %v3568_v45  ;;  %v3187_v45 = vld [vmem:[#allocation8 + $0x278] sm:$0xf] }
  0x91   :  { %1867 = vmatpush.bf16.msrb.mxu1 %v3136_v56  ;;  %v3328_v47 = vor.u32 %v4003_v2, %v3325_v46  ;;  %v3517_v56 = vld [vmem:[#allocation8 + $0x528] sm:$0xf0]  ;;  %v3971_v2 = vld [vmem:[#allocation8 + $0x28c] sm:$0xf0]  ;;  %v2972_v46 = vor.u32 %v3917_v43, %v2971_v42  ;;  %v3980_v43 = vld [vmem:[#allocation8 + $0x2dc] sm:$0xf] }
  0x92   :  { %v3520_v57 = vor.u32 %v4051_v55, %v3517_v56  ;;  %v3905_v55 = vld [vmem:[#allocation8 + $0x7c] sm:$0xf0] }
  0x93   :  { %1880 = vmatpush.bf16.msrb.mxu2 %v3328_v47  ;;  %v2947_v47 = vld [vmem:[#allocation8 + $0x98] sm:$0xf] }
  0x94   :  { %1855 = vmatpush.bf16.msrb.mxu0 %v2920_v51  ;;  %v3544_v51 = vor.u32 %v4057_v48, %v3541_v49  ;;  %v3911_v48 = vld [vmem:[#allocation8 + $0xac] sm:$0xf0]  ;;  %v3188_v49 = vor.u32 %v3971_v2, %v3187_v45  ;;  %v3620_v2 = vor.u32 %v4079_v38, %v3619_v37  ;;  %v3896_v37 = vld [vmem:[#allocation8 + $0x3c] sm:$0xf] }
  0x95   :  { %1868 = vmatpush.bf16.msrb.mxu1 %v3112_v6  ;;  %v3496_v6 = vor.u32 %v4045_v0, %v3493_v1  ;;  %v2948_v53 = vor.u32 %v3911_v48, %v2947_v47  ;;  %v3899_v0 = vld [vmem:[#allocation8 + $0x4c] sm:$0xf0] }
  0x96   :  { %1892 = vmatpush.bf16.msrb.mxu3 %v3544_v51  ;;  %v3163_v51 = vld [vmem:[#allocation8 + $0x248] sm:$0xf] }
  0x97   :  { %1881 = vmatpush.bf16.msrb.mxu2 %v3304_v3  ;;  %v194_v3 = vperm.slane %v4404_v50, 2  ;;  %v3164_v56 = vor.u32 %v3965_v52, %v3163_v51  ;;  %v2997_v51 = vld [vmem:[#allocation8 + $0x110] sm:$0xf0]  ;;  %v3595_v52 = vld [vmem:[#allocation8 + $0x5a8] sm:$0xf] }
  0x98   :  { %1856 = vmatpush.bf16.msrb.mxu0 %v2896_v62 }
  0x99   :  { %1869 = vmatpush.bf16.msrb.mxu1 %v3088_v21  ;;  %v3929_v21 = vld [vmem:[#allocation8 + $0x13c] sm:$0xf0] }
  0x9a   :  { %1893 = vmatpush.bf16.msrb.mxu3 %v3520_v57  ;;  %v3020_v30 = vor.u32 %v3929_v21, %v3019_v20  ;;  %v3403_v20 = vld [vmem:[#allocation8 + $0x428] sm:$0xf]  ;;  %v4025_v21 = vld [vmem:[#allocation8 + $0x43c] sm:$0xf0] }
  0x9b   :  { %1882 = vmatpush.bf16.msrb.mxu2 %v3280_v61 }
  0x9c   :  { %1857 = vmatpush.bf16.msrb.mxu0 %v2872_v13 }
  0x9d   :  { %1870 = vmatpush.bf16.msrb.mxu1 %v3064_v31  ;;  %v3448_v31 = vor.u32 %v4033_v28, %v3445_v29 }
  0x9e   :  { %1894 = vmatpush.bf16.msrb.mxu3 %v3496_v6  ;;  %v4031_v6 = vld [vmem:[#allocation8 + $0x46c] sm:$0xf0] }
  0x9f   :  { %1883 = vmatpush.bf16.msrb.mxu2 %v3256_v11  ;;  %v195_v11 = vperm.slane %v4404_v50, 3 }
  0xa2   :  { %1895 = vmatpush.bf16.msrb.mxu3 %v3472_v22 }
  0xa6   :  { %1896 = vmatpush.bf16.msrb.mxu3 %v3448_v31  ;;  %v3926_v31 = vld [vmem:[#allocation8 + $0x12c] sm:$0xf] }
  0xbe   :  { %v529_v60 = vpop.f32.mrf.mxu0 }
  0xbf   :  { %v530_v62 = vadd.f32 %v529_v60, %v192_v54  ;;  %v542_v63 = vpop.f32.mrf.mxu1  ;;  %v2923_v54 = vld [vmem:[#allocation8 + $0x68] sm:$0xf] }
  0xc1   :  { %v543_v7 = vadd.f32 %v542_v63, %v530_v62  ;;  %v2924_v62 = vor.u32 %v3905_v55, %v2923_v54  ;;  %v2899_v63 = vld [vmem:[#allocation8 + $0x38] sm:$0xf]  ;;  %v4073_v54 = vld [vmem:[#allocation8 + $0x5bc] sm:$0xf0]  ;;  %v3355_v55 = vld [vmem:[#allocation8 + $0x3c8] sm:$0xf] }
  0xc2   :  { %v2900_v10 = vor.u32 %v3899_v0, %v2899_v63  ;;  %v3914_v63 = vld [vmem:[#allocation8 + $0xcc] sm:$0xf]  ;;  %v2973_v0 = vld [vmem:[#allocation8 + $0xe0] sm:$0xf0] }
  0xc3   :  { %v624_v12 = vmax.f32 %v543_v7, 0.0  ;;  %v3115_v7 = vld [vmem:[#allocation8 + $0x1e8] sm:$0xf] }
  0xc5   :  { %v4408_v17 = vpack.c.bf16 %v624_v12, %v624_v12  ;;  %v2875_v12 = vld [vmem:[#allocation8 + $0x8] sm:$0xf] }
  0xc6   :  { %v555_v13 = vpop.f32.mrf.mxu2  ;;  %v531_v24 = vpop.f32.mrf.mxu0 }
  0xc7   :  { %v556_v18 = vadd.f32 %v555_v13, %v193_v4  ;;  %v568_v19 = vpop.f32.mrf.mxu3  ;;  %1806 = vmatmul.bf16.vlgmr.msra.gmra.mxu0 %v4408_v17  ;;  %v544_v27 = vpop.f32.mrf.mxu1  ;;  %v3140_v4 = vor.u32 %v3959_v59, %v3139_v58  ;;  %v3893_v13 = vld [vmem:[#allocation8 + $0x1c] sm:$0xf0]  ;;  %v3091_v24 = vld [vmem:[#allocation8 + $0x1b8] sm:$0xf]  ;;  %v3213_v58 = vld [vmem:[#allocation8 + $0x2c0] sm:$0xf0] }
  0xc8   :  { %1902 = vmatpush.bf16.msra.mxu0 %v3044_v14  ;;  %v3428_v14 = vor.u32 %v4031_v6, %v3427_v5  ;;  %v2876_v27 = vor.u32 %v3893_v13, %v2875_v12  ;;  %v4067_v5 = vld [vmem:[#allocation8 + $0x58c] sm:$0xf0]  ;;  %v3331_v6 = vld [vmem:[#allocation8 + $0x398] sm:$0xf]  ;;  %v3908_v13 = vld [vmem:[#allocation8 + $0x9c] sm:$0xf] }
  0xc9   :  { %v569_v25 = vadd.f32 %v568_v19, %v556_v18  ;;  %v3116_v18 = vor.u32 %v3953_v8, %v3115_v7  ;;  %v3045_v19 = vld [vmem:[#allocation8 + $0x170] sm:$0xf0]  ;;  %v4007_v7 = vld [vmem:[#allocation8 + $0x3ac] sm:$0xf0]  ;;  %v3968_v8 = vld [vmem:[#allocation8 + $0x27c] sm:$0xf] }
  0xca   :  { %v3048_v29 = vor.u32 %v3932_v15, %v3045_v19  ;;  %v3332_v12 = vor.u32 %v4007_v7, %v3331_v6  ;;  %v3547_v15 = vld [vmem:[#allocation8 + $0x548] sm:$0xf]  ;;  %v4061_v19 = vld [vmem:[#allocation8 + $0x55c] sm:$0xf0]  ;;  %v3027_v6 = vld [vmem:[#allocation8 + $0x130] sm:$0xf] }
  0xcb   :  { %v625_v32 = vmax.f32 %v569_v25, 0.0  ;;  %v3947_v25 = vld [vmem:[#allocation8 + $0x1cc] sm:$0xf0]  ;;  %v3930_v7 = vld [vmem:[#allocation8 + $0x144] sm:$0xf0] }
  0xcc   :  { %1903 = vmatpush.bf16.msra.mxu0 %v3020_v30  ;;  %v3404_v30 = vor.u32 %v4025_v21, %v3403_v20  ;;  %v3092_v34 = vor.u32 %v3947_v25, %v3091_v24  ;;  %v3307_v20 = vld [vmem:[#allocation8 + $0x368] sm:$0xf]  ;;  %v4001_v21 = vld [vmem:[#allocation8 + $0x37c] sm:$0xf0]  ;;  %v3548_v25 = vor.u32 %v4061_v19, %v3547_v15  ;;  %v3621_v15 = vld [vmem:[#allocation8 + $0x5f0] sm:$0xf0] }
  0xcd   :  { %v4411_v36 = vpack.c.bf16 %v625_v32, %v625_v32  ;;  %v3021_v32 = vld [vmem:[#allocation8 + $0x140] sm:$0xf0]  ;;  %v3984_v19 = vld [vmem:[#allocation8 + $0x2f4] sm:$0xf0] }
  0xce   :  { %v557_v40 = vpop.f32.mrf.mxu2  ;;  %v3024_v45 = vor.u32 %v3926_v31, %v3021_v32  ;;  %v3283_v31 = vld [vmem:[#allocation8 + $0x338] sm:$0xf]  ;;  %v3995_v32 = vld [vmem:[#allocation8 + $0x34c] sm:$0xf0] }
  0xcf   :  { %1819 = vmatmul.bf16.vlgmr.msra.gmra.mxu1 %v4411_v36  ;;  %v570_v41 = vpop.f32.mrf.mxu3  ;;  %v3379_v40 = vld [vmem:[#allocation8 + $0x3f8] sm:$0xf] }
  0xd0   :  { %1915 = vmatpush.bf16.msra.mxu1 %v3236_v35  ;;  %1904 = vmatpush.bf16.msra.mxu0 %v2996_v39  ;;  %v3067_v35 = vld [vmem:[#allocation8 + $0x188] sm:$0xf]  ;;  %v3941_v39 = vld [vmem:[#allocation8 + $0x19c] sm:$0xf0]  ;;  %v4019_v41 = vld [vmem:[#allocation8 + $0x40c] sm:$0xf0] }
  0xd1   :  { %v3068_v47 = vor.u32 %v3941_v39, %v3067_v35  ;;  %v3380_v48 = vor.u32 %v4019_v41, %v3379_v40  ;;  %v3284_v39 = vor.u32 %v3995_v32, %v3283_v31  ;;  %v2901_v40 = vld [vmem:[#allocation8 + $0x50] sm:$0xf0]  ;;  %v3499_v41 = vld [vmem:[#allocation8 + $0x4e8] sm:$0xf]  ;;  %v3219_v31 = vld [vmem:[#allocation8 + $0x2b0] sm:$0xf] }
  0xd2   :  { %v3978_v32 = vld [vmem:[#allocation8 + $0x2c4] sm:$0xf0] }
  0xd4   :  { %1916 = vmatpush.bf16.msra.mxu1 %v3212_v44  ;;  %1905 = vmatpush.bf16.msra.mxu0 %v2972_v46  ;;  %v3237_v44 = vld [vmem:[#allocation8 + $0x2f0] sm:$0xf0] }
  0xd7   :  { %1858 = vmatmul.bf16.vlgmr.msrb.gmra.mxu0 %v4408_v17 }
  0xd8   :  { %1917 = vmatpush.bf16.msra.mxu1 %v3188_v49  ;;  %1906 = vmatpush.bf16.msra.mxu0 %v2948_v53  ;;  %v3920_v49 = vld [vmem:[#allocation8 + $0xfc] sm:$0xf] }
  0xdc   :  { %v581_v57 = vpop.f32.mrf.mxu0  ;;  %1918 = vmatpush.bf16.msra.mxu1 %v3164_v56  ;;  %1907 = vmatpush.bf16.msra.mxu0 %v2924_v62  ;;  %v4013_v56 = vld [vmem:[#allocation8 + $0x3dc] sm:$0xf0] }
  0xdd   :  { %v582_v60 = vadd.f32 %v581_v57, %v194_v3  ;;  %v594_v61 = vpop.f32.mrf.mxu1  ;;  %v3240_v3 = vor.u32 %v3980_v43, %v3237_v44  ;;  %v3974_v57 = vld [vmem:[#allocation8 + $0x2ac] sm:$0xf]  ;;  %v3356_v62 = vor.u32 %v4013_v56, %v3355_v55  ;;  %v3051_v55 = vld [vmem:[#allocation8 + $0x160] sm:$0xf]  ;;  %v3936_v56 = vld [vmem:[#allocation8 + $0x174] sm:$0xf0] }
  0xde   :  { %v3950_v44 = vld [vmem:[#allocation8 + $0x1ec] sm:$0xf] }
  0xdf   :  { %v595_v1 = vadd.f32 %v594_v61, %v582_v60  ;;  %1871 = vmatmul.bf16.vlgmr.msrb.gmra.mxu1 %v4411_v36  ;;  %v3000_v60 = vor.u32 %v3920_v49, %v2997_v51  ;;  %v3596_v61 = vor.u32 %v4073_v54, %v3595_v52  ;;  %v3429_v49 = vld [vmem:[#allocation8 + $0x470] sm:$0xf0]  ;;  %v2904_v51 = vor.u32 %v3896_v37, %v2901_v40  ;;  %v3890_v52 = vld [vmem:[#allocation8 + $0xc] sm:$0xf]  ;;  %v2877_v54 = vld [vmem:[#allocation8 + $0x20] sm:$0xf0] }
  0xe0   :  { %1919 = vmatpush.bf16.msra.mxu1 %v3140_v4  ;;  %1908 = vmatpush.bf16.msra.mxu0 %v2900_v10  ;;  %v3216_v4 = vor.u32 %v3974_v57, %v3213_v58  ;;  %v2976_v10 = vor.u32 %v3914_v63, %v2973_v0  ;;  %v4022_v63 = vld [vmem:[#allocation8 + $0x42c] sm:$0xf]  ;;  %v3405_v0 = vld [vmem:[#allocation8 + $0x440] sm:$0xf0]  ;;  %v3220_v40 = vor.u32 %v3978_v32, %v3219_v31  ;;  %v3053_v32 = vld [vmem:[#allocation8 + $0x178] sm:$0xf0] }
  0xe1   :  { %v626_v9 = vmax.f32 %v595_v1, 0.0  ;;  %v3571_v1 = vld [vmem:[#allocation8 + $0x578] sm:$0xf] }
  0xe3   :  { %v4418_v16 = vpack.c.bf16 %v626_v9, %v626_v9  ;;  %v3189_v9 = vld [vmem:[#allocation8 + $0x290] sm:$0xf0] }
  0xe4   :  { %v607_v22 = vpop.f32.mrf.mxu2  ;;  %v583_v23 = vpop.f32.mrf.mxu0  ;;  %1920 = vmatpush.bf16.msra.mxu1 %v3116_v18  ;;  %1909 = vmatpush.bf16.msra.mxu0 %v2876_v27  ;;  %v3192_v18 = vor.u32 %v3968_v8, %v3189_v9  ;;  %v2925_v27 = vld [vmem:[#allocation8 + $0x80] sm:$0xf0]  ;;  %v3451_v8 = vld [vmem:[#allocation8 + $0x488] sm:$0xf] }
  0xe5   :  { %v608_v26 = vadd.f32 %v607_v22, %v195_v11  ;;  %v596_v50 = vpop.f32.mrf.mxu1  ;;  %1832 = vmatmul.bf16.vlgmr.msra.gmra.mxu2 %v4418_v16  ;;  %v620_v28 = vpop.f32.mrf.mxu3  ;;  %v3572_v11 = vor.u32 %v4067_v5, %v3571_v1  ;;  %v3962_v22 = vld [vmem:[#allocation8 + $0x24c] sm:$0xf]  ;;  %v3165_v23 = vld [vmem:[#allocation8 + $0x260] sm:$0xf0]  ;;  %v2880_v1 = vor.u32 %v3890_v52, %v2877_v54  ;;  %v3912_v52 = vld [vmem:[#allocation8 + $0xb4] sm:$0xf0] }
  0xe6   :  { %1928 = vmatpush.bf16.msra.mxu2 %v3428_v14  ;;  %v2949_v14 = vld [vmem:[#allocation8 + $0xb0] sm:$0xf0]  ;;  %v3902_v50 = vld [vmem:[#allocation8 + $0x6c] sm:$0xf] }
  0xe7   :  { %v621_v33 = vadd.f32 %v620_v28, %v608_v26  ;;  %1910 = vmatmul.bf16.vlgmr.msra.gmra.mxu0 %v4408_v17  ;;  %v2952_v24 = vor.u32 %v3908_v13, %v2949_v14  ;;  %v3308_v26 = vor.u32 %v4001_v21, %v3307_v20  ;;  %v3523_v28 = vld [vmem:[#allocation8 + $0x518] sm:$0xf]  ;;  %v2928_v35 = vor.u32 %v3902_v50, %v2925_v27  ;;  %v3069_v13 = vld [vmem:[#allocation8 + $0x1a0] sm:$0xf0]  ;;  %v4076_v14 = vld [vmem:[#allocation8 + $0x5dc] sm:$0xf] }
  0xe8   :  { %1954 = vmatpush.bf16.msrb.mxu0 %v3048_v29  ;;  %1921 = vmatpush.bf16.msra.mxu1 %v3092_v34  ;;  %v3168_v29 = vor.u32 %v3962_v22, %v3165_v23  ;;  %v3141_v34 = vld [vmem:[#allocation8 + $0x230] sm:$0xf0]  ;;  %v4016_v20 = vld [vmem:[#allocation8 + $0x3fc] sm:$0xf]  ;;  %v3028_v22 = vor.u32 %v3930_v7, %v3027_v6  ;;  %v3924_v50 = vld [vmem:[#allocation8 + $0x114] sm:$0xf0] }
  0xe9   :  { %v627_v42 = vmax.f32 %v621_v33, 0.0  ;;  %v3956_v33 = vld [vmem:[#allocation8 + $0x21c] sm:$0xf]  ;;  %v3381_v21 = vld [vmem:[#allocation8 + $0x410] sm:$0xf0] }
  0xea   :  { %1929 = vmatpush.bf16.msra.mxu2 %v3404_v30  ;;  %v4055_v30 = vld [vmem:[#allocation8 + $0x52c] sm:$0xf0]  ;;  %v3144_v43 = vor.u32 %v3956_v33, %v3141_v34  ;;  %v4010_v33 = vld [vmem:[#allocation8 + $0x3cc] sm:$0xf]  ;;  %v3357_v34 = vld [vmem:[#allocation8 + $0x3e0] sm:$0xf0] }
  0xeb   :  { %v4421_v46 = vpack.c.bf16 %v627_v42, %v627_v42  ;;  %v3524_v38 = vor.u32 %v4055_v30, %v3523_v28  ;;  %v4049_v42 = vld [vmem:[#allocation8 + $0x4fc] sm:$0xf0]  ;;  %v3384_v28 = vor.u32 %v4016_v20, %v3381_v21  ;;  %v3597_v30 = vld [vmem:[#allocation8 + $0x5c0] sm:$0xf0]  ;;  %v4058_v54 = vld [vmem:[#allocation8 + $0x54c] sm:$0xf] }
  0xec   :  { %v609_v53 = vpop.f32.mrf.mxu2  ;;  %1955 = vmatpush.bf16.msrb.mxu0 %v3024_v45  ;;  %1922 = vmatpush.bf16.msra.mxu1 %v3068_v47  ;;  %v3259_v45 = vld [vmem:[#allocation8 + $0x308] sm:$0xf]  ;;  %v3117_v47 = vld [vmem:[#allocation8 + $0x200] sm:$0xf0]  ;;  %v3147_v6 = vld [vmem:[#allocation8 + $0x220] sm:$0xf] }
  0xed   :  { %1845 = vmatmul.bf16.vlgmr.msra.gmra.mxu3 %v4421_v46  ;;  %v622_v59 = vpop.f32.mrf.mxu3  ;;  %v3500_v53 = vor.u32 %v4049_v42, %v3499_v41  ;;  %v3120_v57 = vor.u32 %v3950_v44, %v3117_v47  ;;  %v3360_v41 = vor.u32 %v4010_v33, %v3357_v34  ;;  %v4064_v42 = vld [vmem:[#allocation8 + $0x57c] sm:$0xf]  ;;  %v3195_v44 = vld [vmem:[#allocation8 + $0x280] sm:$0xf]  ;;  %v3333_v47 = vld [vmem:[#allocation8 + $0x3b0] sm:$0xf0] }
  0xee   :  { %1941 = vmatpush.bf16.msra.mxu3 %v3620_v2  ;;  %1930 = vmatpush.bf16.msra.mxu2 %v3380_v48  ;;  %v3989_v2 = vld [vmem:[#allocation8 + $0x31c] sm:$0xf0]  ;;  %v4028_v48 = vld [vmem:[#allocation8 + $0x45c] sm:$0xf]  ;;  %v3475_v59 = vld [vmem:[#allocation8 + $0x4b8] sm:$0xf] }
  0xef   :  { %1923 = vmatmul.bf16.vlgmr.msra.gmra.mxu1 %v4411_v36  ;;  %v3432_v58 = vor.u32 %v4028_v48, %v3429_v49  ;;  %v3960_v7 = vld [vmem:[#allocation8 + $0x234] sm:$0xf0]  ;;  %v3123_v20 = vld [vmem:[#allocation8 + $0x1f0] sm:$0xf]  ;;  %v3954_v21 = vld [vmem:[#allocation8 + $0x204] sm:$0xf0] }
  0xf0   :  { %1967 = vmatpush.bf16.msrb.mxu1 %v3240_v3  ;;  %1956 = vmatpush.bf16.msrb.mxu0 %v3000_v60  ;;  %v3260_v3 = vor.u32 %v3989_v2, %v3259_v45  ;;  %v4043_v60 = vld [vmem:[#allocation8 + $0x4cc] sm:$0xf0]  ;;  %v3972_v45 = vld [vmem:[#allocation8 + $0x294] sm:$0xf0]  ;;  %v4004_v2 = vld [vmem:[#allocation8 + $0x39c] sm:$0xf] }
  0xf1   :  { %v3476_v5 = vor.u32 %v4043_v60, %v3475_v59  ;;  %v3309_v59 = vld [vmem:[#allocation8 + $0x380] sm:$0xf0]  ;;  %v4040_v33 = vld [vmem:[#allocation8 + $0x4bc] sm:$0xf]  ;;  %v3477_v34 = vld [vmem:[#allocation8 + $0x4d0] sm:$0xf0] }
  0xf2   :  { %1942 = vmatpush.bf16.msra.mxu3 %v3596_v61  ;;  %1931 = vmatpush.bf16.msra.mxu2 %v3356_v62  ;;  %v3944_v61 = vld [vmem:[#allocation8 + $0x1bc] sm:$0xf]  ;;  %v3093_v62 = vld [vmem:[#allocation8 + $0x1d0] sm:$0xf0] }
  0xf3   :  { %v3096_v9 = vor.u32 %v3944_v61, %v3093_v62  ;;  %v2931_v62 = vld [vmem:[#allocation8 + $0x70] sm:$0xf] }
  0xf4   :  { %1968 = vmatpush.bf16.msrb.mxu1 %v3216_v4  ;;  %1957 = vmatpush.bf16.msrb.mxu0 %v2976_v10  ;;  %v3052_v4 = vor.u32 %v3936_v56, %v3051_v55  ;;  %v3408_v10 = vor.u32 %v4022_v63, %v3405_v0  ;;  %v3549_v55 = vld [vmem:[#allocation8 + $0x560] sm:$0xf0]  ;;  %v3171_v56 = vld [vmem:[#allocation8 + $0x250] sm:$0xf]  ;;  %v3906_v63 = vld [vmem:[#allocation8 + $0x84] sm:$0xf0] }
  0xf5   :  { %1884 = vmatmul.bf16.vlgmr.msrb.gmra.mxu2 %v4418_v16  ;;  %v3552_v61 = vor.u32 %v4058_v54, %v3549_v55  ;;  %v3981_v54 = vld [vmem:[#allocation8 + $0x2e4] sm:$0xf]  ;;  %v3245_v55 = vld [vmem:[#allocation8 + $0x2f8] sm:$0xf0] }
  0xf6   :  { %1943 = vmatpush.bf16.msra.mxu3 %v3572_v11  ;;  %1932 = vmatpush.bf16.msra.mxu2 %v3332_v12  ;;  %v4037_v11 = vld [vmem:[#allocation8 + $0x49c] sm:$0xf0]  ;;  %v3938_v12 = vld [vmem:[#allocation8 + $0x18c] sm:$0xf] }
  0xf7   :  { %v3452_v23 = vor.u32 %v4037_v11, %v3451_v8  ;;  %v3992_v8 = vld [vmem:[#allocation8 + $0x33c] sm:$0xf] }
  0xf8   :  { %1969 = vmatpush.bf16.msrb.mxu1 %v3192_v18  ;;  %1958 = vmatpush.bf16.msrb.mxu0 %v2952_v24  ;;  %v3243_v18 = vld [vmem:[#allocation8 + $0x2e0] sm:$0xf]  ;;  %v3072_v24 = vor.u32 %v3938_v12, %v3069_v13  ;;  %v3900_v13 = vld [vmem:[#allocation8 + $0x54] sm:$0xf0] }
  0xf9   :  { %v3244_v27 = vor.u32 %v3984_v19, %v3243_v18  ;;  %v2907_v12 = vld [vmem:[#allocation8 + $0x40] sm:$0xf]  ;;  %v4046_v18 = vld [vmem:[#allocation8 + $0x4ec] sm:$0xf]  ;;  %v3501_v19 = vld [vmem:[#allocation8 + $0x500] sm:$0xf0] }
  0xfa   :  { %1944 = vmatpush.bf16.msra.mxu3 %v3548_v25  ;;  %1933 = vmatpush.bf16.msra.mxu2 %v3308_v26  ;;  %v3624_v25 = vor.u32 %v4076_v14, %v3621_v15  ;;  %v3003_v26 = vld [vmem:[#allocation8 + $0x100] sm:$0xf]  ;;  %v3148_v14 = vor.u32 %v3960_v7, %v3147_v6  ;;  %v3975_v6 = vld [vmem:[#allocation8 + $0x2b4] sm:$0xf]  ;;  %v3221_v7 = vld [vmem:[#allocation8 + $0x2c8] sm:$0xf0] }
  0xfc   :  { %1970 = vmatpush.bf16.msrb.mxu1 %v3168_v29  ;;  %1959 = vmatpush.bf16.msrb.mxu0 %v2928_v35  ;;  %v4070_v29 = vld [vmem:[#allocation8 + $0x5ac] sm:$0xf]  ;;  %v3004_v35 = vor.u32 %v3924_v50, %v3003_v26  ;;  %v4032_v26 = vld [vmem:[#allocation8 + $0x474] sm:$0xf0]  ;;  %v3504_v50 = vor.u32 %v4046_v18, %v3501_v19  ;;  %v3579_v18 = vld [vmem:[#allocation8 + $0x580] sm:$0xf] }
  0xfd   :  { %1897 = vmatmul.bf16.vlgmr.msrb.gmra.mxu3 %v4421_v46  ;;  %v3600_v37 = vor.u32 %v4070_v29, %v3597_v30  ;;  %v3933_v29 = vld [vmem:[#allocation8 + $0x164] sm:$0xf]  ;;  %v3124_v30 = vor.u32 %v3954_v21, %v3123_v20  ;;  %v4068_v19 = vld [vmem:[#allocation8 + $0x594] sm:$0xf0]  ;;  %v3197_v21 = vld [vmem:[#allocation8 + $0x298] sm:$0xf0] }
  0xfe   :  { %1945 = vmatpush.bf16.msra.mxu3 %v3524_v38  ;;  %1934 = vmatpush.bf16.msra.mxu2 %v3284_v39  ;;  %v2979_v38 = vld [vmem:[#allocation8 + $0xd0] sm:$0xf]  ;;  %v3918_v39 = vld [vmem:[#allocation8 + $0xe4] sm:$0xf0]  ;;  %v3969_v20 = vld [vmem:[#allocation8 + $0x284] sm:$0xf] }
  0xff   :  { %v2980_v48 = vor.u32 %v3918_v39, %v2979_v38  ;;  %v3948_v38 = vld [vmem:[#allocation8 + $0x1d4] sm:$0xf0] }
 0x100   :  { %1971 = vmatpush.bf16.msrb.mxu1 %v3144_v43  ;;  %1960 = vmatpush.bf16.msrb.mxu0 %v2904_v51  ;;  %v3573_v43 = vld [vmem:[#allocation8 + $0x590] sm:$0xf0]  ;;  %v2955_v51 = vld [vmem:[#allocation8 + $0xa0] sm:$0xf] }
 0x101   :  { %v3576_v49 = vor.u32 %v4064_v42, %v3573_v43  ;;  %v2956_v60 = vor.u32 %v3912_v52, %v2955_v51  ;;  %v3056_v42 = vor.u32 %v3933_v29, %v3053_v32  ;;  %v3480_v43 = vor.u32 %v4040_v33, %v3477_v34  ;;  %v3942_v51 = vld [vmem:[#allocation8 + $0x1a4] sm:$0xf0]  ;;  %v3555_v29 = vld [vmem:[#allocation8 + $0x550] sm:$0xf]  ;;  %v3173_v32 = vld [vmem:[#allocation8 + $0x268] sm:$0xf0] }
 0x102   :  { %1946 = vmatpush.bf16.msra.mxu3 %v3500_v53  ;;  %1935 = vmatpush.bf16.msra.mxu2 %v3260_v3  ;;  %v3196_v53 = vor.u32 %v3972_v45, %v3195_v44  ;;  %v3336_v3 = vor.u32 %v4004_v2, %v3333_v47  ;;  %v3927_v44 = vld [vmem:[#allocation8 + $0x134] sm:$0xf]  ;;  %v3029_v45 = vld [vmem:[#allocation8 + $0x148] sm:$0xf0]  ;;  %v3315_v33 = vld [vmem:[#allocation8 + $0x370] sm:$0xf] }
 0x103   :  { %v4034_v2 = vld [vmem:[#allocation8 + $0x48c] sm:$0xf]  ;;  %v4002_v34 = vld [vmem:[#allocation8 + $0x384] sm:$0xf0] }
 0x104   :  { %1972 = vmatpush.bf16.msrb.mxu1 %v3120_v57  ;;  %1961 = vmatpush.bf16.msrb.mxu0 %v2880_v1  ;;  %v3966_v57 = vld [vmem:[#allocation8 + $0x264] sm:$0xf0] }
 0x105   :  { %1936 = vmatmul.bf16.vlgmr.msra.gmra.mxu2 %v4418_v16  ;;  %v3172_v0 = vor.u32 %v3966_v57, %v3171_v56  ;;  %v3387_v56 = vld [vmem:[#allocation8 + $0x400] sm:$0xf]  ;;  %v4020_v57 = vld [vmem:[#allocation8 + $0x414] sm:$0xf0] }
 0x106   :  { %1980 = vmatpush.bf16.msrb.mxu2 %v3432_v58  ;;  %1947 = vmatpush.bf16.msra.mxu3 %v3476_v5  ;;  %v3998_v58 = vld [vmem:[#allocation8 + $0x36c] sm:$0xf]  ;;  %v3525_v5 = vld [vmem:[#allocation8 + $0x530] sm:$0xf0] }
 0x107   :  { %1962 = vmatmul.bf16.vlgmr.msrb.gmra.mxu0 %v4408_v17  ;;  %v3312_v1 = vor.u32 %v3998_v58, %v3309_v59  ;;  %v3032_v58 = vor.u32 %v3927_v44, %v3029_v45  ;;  %v3957_v44 = vld [vmem:[#allocation8 + $0x224] sm:$0xf]  ;;  %v3149_v45 = vld [vmem:[#allocation8 + $0x238] sm:$0xf0] }
 0x108   :  { %2006 = vmatpush.bf16.msra.mxu0 %v3052_v4  ;;  %1973 = vmatpush.bf16.msrb.mxu1 %v3096_v9  ;;  %v4052_v4 = vld [vmem:[#allocation8 + $0x51c] sm:$0xf]  ;;  %v3285_v9 = vld [vmem:[#allocation8 + $0x350] sm:$0xf0] }
 0x109   :  { %v3528_v11 = vor.u32 %v4052_v4, %v3525_v5  ;;  %v3288_v15 = vor.u32 %v3992_v8, %v3285_v9  ;;  %v3603_v4 = vld [vmem:[#allocation8 + $0x5b0] sm:$0xf]  ;;  %v4074_v5 = vld [vmem:[#allocation8 + $0x5c4] sm:$0xf0] }
 0x10a   :  { %1981 = vmatpush.bf16.msrb.mxu2 %v3408_v10  ;;  %1948 = vmatpush.bf16.msra.mxu3 %v3452_v23  ;;  %v2932_v10 = vor.u32 %v3906_v63, %v2931_v62  ;;  %v3261_v23 = vld [vmem:[#allocation8 + $0x320] sm:$0xf0]  ;;  %v3005_v63 = vld [vmem:[#allocation8 + $0x118] sm:$0xf0]  ;;  %v3363_v8 = vld [vmem:[#allocation8 + $0x3d0] sm:$0xf] }
 0x10b   :  { %v3921_v62 = vld [vmem:[#allocation8 + $0x104] sm:$0xf]  ;;  %v4014_v9 = vld [vmem:[#allocation8 + $0x3e4] sm:$0xf0] }
 0x10c   :  { %2007 = vmatpush.bf16.msra.mxu0 %v3028_v22  ;;  %1974 = vmatpush.bf16.msrb.mxu1 %v3072_v24  ;;  %v3986_v22 = vld [vmem:[#allocation8 + $0x30c] sm:$0xf]  ;;  %v2908_v24 = vor.u32 %v3900_v13, %v2907_v12  ;;  %v3915_v12 = vld [vmem:[#allocation8 + $0xd4] sm:$0xf] }
 0x10d   :  { %1949 = vmatmul.bf16.vlgmr.msra.gmra.mxu3 %v4421_v46  ;;  %v3264_v31 = vor.u32 %v3986_v22, %v3261_v23  ;;  %v2981_v13 = vld [vmem:[#allocation8 + $0xe8] sm:$0xf0]  ;;  %v3339_v22 = vld [vmem:[#allocation8 + $0x3a0] sm:$0xf]  ;;  %v4008_v23 = vld [vmem:[#allocation8 + $0x3b4] sm:$0xf0] }
 0x10e   :  { %1993 = vmatpush.bf16.msrb.mxu3 %v3624_v25  ;;  %1982 = vmatpush.bf16.msrb.mxu2 %v3384_v28  ;;  %v3435_v25 = vld [vmem:[#allocation8 + $0x460] sm:$0xf]  ;;  %v3894_v28 = vld [vmem:[#allocation8 + $0x24] sm:$0xf0] }
 0x10f   :  { %1975 = vmatmul.bf16.vlgmr.msrb.gmra.mxu1 %v4411_v36 }
 0x110   :  { %2019 = vmatpush.bf16.msra.mxu1 %v3244_v27  ;;  %2008 = vmatpush.bf16.msra.mxu0 %v3004_v35  ;;  %v2883_v27 = vld [vmem:[#allocation8 + $0x10] sm:$0xf]  ;;  %v3436_v35 = vor.u32 %v4032_v26, %v3435_v25  ;;  %v3580_v25 = vor.u32 %v4068_v19, %v3579_v18  ;;  %v3909_v26 = vld [vmem:[#allocation8 + $0xa4] sm:$0xf]  ;;  %v4038_v19 = vld [vmem:[#allocation8 + $0x4a4] sm:$0xf0] }
 0x111   :  { %v2884_v39 = vor.u32 %v3894_v28, %v2883_v27  ;;  %v3200_v27 = vor.u32 %v3969_v20, %v3197_v21  ;;  %v3340_v28 = vor.u32 %v4008_v23, %v3339_v22  ;;  %v3939_v20 = vld [vmem:[#allocation8 + $0x194] sm:$0xf]  ;;  %v4088_v21 = vld [vmem:[#allocation11 + $0x38] sm:$0xff]  ;;  %v3077_v23 = vld [vmem:[#allocation8 + $0x1a8] sm:$0xf0] }
 0x112   :  { %1994 = vmatpush.bf16.msrb.mxu3 %v3600_v37  ;;  %1983 = vmatpush.bf16.msrb.mxu2 %v3360_v41  ;;  %v3099_v37 = vld [vmem:[#allocation8 + $0x1c0] sm:$0xf]  ;;  %v4026_v41 = vld [vmem:[#allocation8 + $0x444] sm:$0xf0] }
 0x113   :  { %v3100_v47 = vor.u32 %v3948_v38, %v3099_v37  ;;  %v3903_v38 = vld [vmem:[#allocation8 + $0x74] sm:$0xf] }
 0x114   :  { %2020 = vmatpush.bf16.msra.mxu1 %v3220_v40  ;;  %2009 = vmatpush.bf16.msra.mxu0 %v2980_v48  ;;  %v3411_v40 = vld [vmem:[#allocation8 + $0x430] sm:$0xf]  ;;  %v3453_v48 = vld [vmem:[#allocation8 + $0x4a0] sm:$0xf0] }
 0x115   :  { %v3412_v52 = vor.u32 %v4026_v41, %v3411_v40  ;;  %v3456_v59 = vor.u32 %v4034_v2, %v3453_v48  ;;  %v3316_v41 = vor.u32 %v4002_v34, %v3315_v33  ;;  %v3291_v2 = vld [vmem:[#allocation8 + $0x340] sm:$0xf]  ;;  %v4087_v33 = vld [vmem:[#allocation11 + $0x30] sm:$0xff] }
 0x116   :  { %1995 = vmatpush.bf16.msrb.mxu3 %v3576_v49  ;;  %1984 = vmatpush.bf16.msrb.mxu2 %v3336_v3  ;;  %v3075_v49 = vld [vmem:[#allocation8 + $0x190] sm:$0xf]  ;;  %v4080_v3 = vld [vmem:[#allocation8 + $0x5f4] sm:$0xf0]  ;;  %v4011_v34 = vld [vmem:[#allocation8 + $0x3d4] sm:$0xf] }
 0x118   :  { %2021 = vmatpush.bf16.msra.mxu1 %v3196_v53  ;;  %2010 = vmatpush.bf16.msra.mxu0 %v2956_v60  ;;  %v3627_v53 = vld [vmem:[#allocation8 + $0x5e0] sm:$0xf]  ;;  %v3076_v60 = vor.u32 %v3942_v51, %v3075_v49  ;;  %v3897_v51 = vld [vmem:[#allocation8 + $0x44] sm:$0xf] }
 0x11a   :  { %1996 = vmatpush.bf16.msrb.mxu3 %v3552_v61  ;;  %1985 = vmatpush.bf16.msrb.mxu2 %v3312_v1  ;;  %v3628_v61 = vor.u32 %v4080_v3, %v3627_v53  ;;  %v3388_v1 = vor.u32 %v4020_v57, %v3387_v56  ;;  %v3152_v53 = vor.u32 %v3957_v44, %v3149_v45  ;;  %v3951_v56 = vld [vmem:[#allocation8 + $0x1f4] sm:$0xf]  ;;  %v3125_v57 = vld [vmem:[#allocation8 + $0x208] sm:$0xf0]  ;;  %v4096_v44 = vld [vmem:[#allocation11 + $0x78] sm:$0xff] }
 0x11c   :  { %2022 = vmatpush.bf16.msra.mxu1 %v3172_v0  ;;  %2011 = vmatpush.bf16.msra.mxu0 %v2932_v10  ;;  %v3248_v0 = vor.u32 %v3981_v54, %v3245_v55  ;;  %v3008_v10 = vor.u32 %v3921_v62, %v3005_v63  ;;  %v3507_v54 = vld [vmem:[#allocation8 + $0x4f0] sm:$0xf]  ;;  %v4050_v55 = vld [vmem:[#allocation8 + $0x504] sm:$0xf0]  ;;  %v3437_v62 = vld [vmem:[#allocation8 + $0x478] sm:$0xf0] }
 0x11d   :  { %v3508_v63 = vor.u32 %v4050_v55, %v3507_v54  ;;  %v4053_v55 = vld [vmem:[#allocation8 + $0x524] sm:$0xf] }
 0x11e   :  { %1997 = vmatpush.bf16.msrb.mxu3 %v3528_v11  ;;  %1986 = vmatpush.bf16.msrb.mxu2 %v3288_v15  ;;  %v3604_v11 = vor.u32 %v4074_v5, %v3603_v4  ;;  %v3364_v15 = vor.u32 %v4014_v9, %v3363_v8  ;;  %v3128_v4 = vor.u32 %v3951_v56, %v3125_v57  ;;  %v3945_v9 = vld [vmem:[#allocation8 + $0x1c4] sm:$0xf]  ;;  %v3533_v56 = vld [vmem:[#allocation8 + $0x538] sm:$0xf0] }
 0x11f   :  { %v4084_v57 = vld [vmem:[#allocation11 + $0x18] sm:$0xff] }
 0x120   :  { %2023 = vmatpush.bf16.msra.mxu1 %v3148_v14  ;;  %2012 = vmatpush.bf16.msra.mxu0 %v2908_v24  ;;  %v3224_v14 = vor.u32 %v3975_v6, %v3221_v7  ;;  %v2984_v24 = vor.u32 %v3915_v12, %v2981_v13  ;;  %v3483_v6 = vld [vmem:[#allocation8 + $0x4c0] sm:$0xf]  ;;  %v4044_v7 = vld [vmem:[#allocation8 + $0x4d4] sm:$0xf0]  ;;  %v4023_v12 = vld [vmem:[#allocation8 + $0x434] sm:$0xf] }
 0x121   :  { %v3413_v13 = vld [vmem:[#allocation8 + $0x448] sm:$0xf0] }
 0x122   :  { %1998 = vmatpush.bf16.msrb.mxu3 %v3504_v50  ;;  %1987 = vmatpush.bf16.msrb.mxu2 %v3264_v31  ;;  %v2957_v50 = vld [vmem:[#allocation8 + $0xb8] sm:$0xf0]  ;;  %v3963_v31 = vld [vmem:[#allocation8 + $0x254] sm:$0xf]  ;;  %v3416_v22 = vor.u32 %v4023_v12, %v3413_v13 }
 0x123   :  { %v3176_v40 = vor.u32 %v3963_v31, %v3173_v32  ;;  %v4071_v31 = vld [vmem:[#allocation8 + $0x5b4] sm:$0xf]  ;;  %v3605_v32 = vld [vmem:[#allocation8 + $0x5c8] sm:$0xf0]  ;;  %v3485_v12 = vld [vmem:[#allocation8 + $0x4d8] sm:$0xf0] }
 0x124   :  { %2024 = vmatpush.bf16.msra.mxu1 %v3124_v30  ;;  %2013 = vmatpush.bf16.msra.mxu0 %v2884_v39  ;;  %v4062_v30 = vld [vmem:[#allocation8 + $0x564] sm:$0xf0]  ;;  %v2933_v39 = vld [vmem:[#allocation8 + $0x88] sm:$0xf0] }
 0x125   :  { %1988 = vmatmul.bf16.vlgmr.msrb.gmra.mxu2 %v4418_v16  ;;  %v3556_v37 = vor.u32 %v4062_v30, %v3555_v29  ;;  %v2936_v48 = vor.u32 %v3903_v38, %v2933_v39  ;;  %v4065_v39 = vld [vmem:[#allocation8 + $0x584] sm:$0xf]  ;;  %v4082_v13 = vld [vmem:[#allocation11 + $0x8] sm:$0xff] }
 0x126   :  { %2032 = vmatpush.bf16.msra.mxu2 %v3436_v35  ;;  %1999 = vmatpush.bf16.msrb.mxu3 %v3480_v43  ;;  %v2960_v35 = vor.u32 %v3909_v26, %v2957_v50  ;;  %v4056_v43 = vld [vmem:[#allocation8 + $0x534] sm:$0xf0]  ;;  %v4017_v26 = vld [vmem:[#allocation8 + $0x404] sm:$0xf]  ;;  %v3389_v50 = vld [vmem:[#allocation8 + $0x418] sm:$0xf0] }
 0x127   :  { %2014 = vmatmul.bf16.vlgmr.msra.gmra.mxu0 %v4408_v17  ;;  %v3392_v30 = vor.u32 %v4017_v26, %v3389_v50 }
 0x128   :  { %2058 = vmatpush.bf16.msrb.mxu0 %v3056_v42  ;;  %2025 = vmatpush.bf16.msra.mxu1 %v3100_v47  ;;  %v3531_v42 = vld [vmem:[#allocation8 + $0x520] sm:$0xf]  ;;  %v3996_v47 = vld [vmem:[#allocation8 + $0x354] sm:$0xf0] }
 0x129   :  { %v3532_v49 = vor.u32 %v4056_v43, %v3531_v42  ;;  %v3292_v3 = vor.u32 %v3996_v47, %v3291_v2  ;;  %v3341_v42 = vld [vmem:[#allocation8 + $0x3b8] sm:$0xf0]  ;;  %v4059_v47 = vld [vmem:[#allocation8 + $0x554] sm:$0xf] }
 0x12a   :  { %2033 = vmatpush.bf16.msra.mxu2 %v3412_v52  ;;  %2000 = vmatpush.bf16.msrb.mxu3 %v3456_v59  ;;  %v2909_v52 = vld [vmem:[#allocation8 + $0x58] sm:$0xf0]  ;;  %v3990_v59 = vld [vmem:[#allocation8 + $0x324] sm:$0xf0] }
 0x12c   :  { %2059 = vmatpush.bf16.msrb.mxu0 %v3032_v58  ;;  %2026 = vmatpush.bf16.msra.mxu1 %v3076_v60  ;;  %v3267_v58 = vld [vmem:[#allocation8 + $0x310] sm:$0xf]  ;;  %v2912_v60 = vor.u32 %v3897_v51, %v2909_v52  ;;  %v3999_v51 = vld [vmem:[#allocation8 + $0x374] sm:$0xf]  ;;  %v3317_v52 = vld [vmem:[#allocation8 + $0x388] sm:$0xf0] }
 0x12d   :  { %2001 = vmatmul.bf16.vlgmr.msrb.gmra.mxu3 %v4421_v46  ;;  %v3268_v5 = vor.u32 %v3990_v59, %v3267_v58  ;;  %v3993_v58 = vld [vmem:[#allocation8 + $0x344] sm:$0xf]  ;;  %v3293_v59 = vld [vmem:[#allocation8 + $0x358] sm:$0xf0] }
 0x12e   :  { %2045 = vmatpush.bf16.msra.mxu3 %v3628_v61  ;;  %2034 = vmatpush.bf16.msra.mxu2 %v3388_v1  ;;  %v4029_v61 = vld [vmem:[#allocation8 + $0x464] sm:$0xf]  ;;  %v2885_v1 = vld [vmem:[#allocation8 + $0x28] sm:$0xf0] }
 0x12f   :  { %2027 = vmatmul.bf16.vlgmr.msra.gmra.mxu1 %v4411_v36  ;;  %v3440_v8 = vor.u32 %v4029_v61, %v3437_v62  ;;  %v4094_v61 = vld [vmem:[#allocation11 + $0x68] sm:$0xff]  ;;  %v3536_v62 = vor.u32 %v4053_v55, %v3533_v56 }
 0x130   :  { %2071 = vmatpush.bf16.msrb.mxu1 %v3248_v0  ;;  %2060 = vmatpush.bf16.msrb.mxu0 %v3008_v10  ;;  %v3891_v0 = vld [vmem:[#allocation8 + $0x14] sm:$0xf]  ;;  %v3101_v10 = vld [vmem:[#allocation8 + $0x1d8] sm:$0xf0] }
 0x131   :  { %v3104_v18 = vor.u32 %v3945_v9, %v3101_v10 }
 0x132   :  { %2046 = vmatpush.bf16.msra.mxu3 %v3604_v11  ;;  %2035 = vmatpush.bf16.msra.mxu2 %v3364_v15  ;;  %v2888_v11 = vor.u32 %v3891_v0, %v2885_v1  ;;  %v3459_v15 = vld [vmem:[#allocation8 + $0x490] sm:$0xf]  ;;  %v4047_v0 = vld [vmem:[#allocation8 + $0x4f4] sm:$0xf]  ;;  %v3509_v1 = vld [vmem:[#allocation8 + $0x508] sm:$0xf0] }
 0x134   :  { %2072 = vmatpush.bf16.msrb.mxu1 %v3224_v14  ;;  %2061 = vmatpush.bf16.msrb.mxu0 %v2984_v24  ;;  %v3484_v14 = vor.u32 %v4044_v7, %v3483_v6  ;;  %v4077_v24 = vld [vmem:[#allocation8 + $0x5e4] sm:$0xf]  ;;  %v3269_v6 = vld [vmem:[#allocation8 + $0x328] sm:$0xf0] }
 0x135   :  { %v4093_v7 = vld [vmem:[#allocation11 + $0x60] sm:$0xff] }
 0x136   :  { %2047 = vmatpush.bf16.msra.mxu3 %v3580_v25  ;;  %2036 = vmatpush.bf16.msra.mxu2 %v3340_v28  ;;  %v3629_v25 = vld [vmem:[#allocation8 + $0x5f8] sm:$0xf0]  ;;  %v3080_v28 = vor.u32 %v3939_v20, %v3077_v23  ;;  %v4035_v20 = vld [vmem:[#allocation8 + $0x494] sm:$0xf] }
 0x137   :  { %v3632_v29 = vor.u32 %v4077_v24, %v3629_v25  ;;  %v4091_v23 = vld [vmem:[#allocation11 + $0x50] sm:$0xff] }
 0x138   :  { %2073 = vmatpush.bf16.msrb.mxu1 %v3200_v27  ;;  %2062 = vmatpush.bf16.msrb.mxu0 %v2960_v35  ;;  %v3460_v27 = vor.u32 %v4038_v19, %v3459_v15  ;;  %v3365_v35 = vld [vmem:[#allocation8 + $0x3e8] sm:$0xf0]  ;;  %v4104_v15 = vld [vmem:[#allocation11 + $0xb8] sm:$0xff]  ;;  %v4103_v24 = vld [vmem:[#allocation11 + $0xb0] sm:$0xff] }
 0x139   :  { %v3368_v38 = vor.u32 %v4011_v34, %v3365_v35  ;;  %v4100_v34 = vld [vmem:[#allocation11 + $0x98] sm:$0xff] }
 0x13a   :  { %2048 = vmatpush.bf16.msra.mxu3 %v3556_v37  ;;  %2037 = vmatpush.bf16.msra.mxu2 %v3316_v41  ;;  %v3608_v37 = vor.u32 %v4071_v31, %v3605_v32  ;;  %v4086_v41 = vld [vmem:[#allocation11 + $0x28] sm:$0xff]  ;;  %v4089_v31 = vld [vmem:[#allocation11 + $0x40] sm:$0xff] }
 0x13b   :  { %v4101_v32 = vld [vmem:[#allocation11 + $0xa0] sm:$0xff] }
 0x13c   :  { %2074 = vmatpush.bf16.msrb.mxu1 %v3176_v40  ;;  %2063 = vmatpush.bf16.msrb.mxu0 %v2936_v48  ;;  %v3581_v40 = vld [vmem:[#allocation8 + $0x598] sm:$0xf0]  ;;  %v3557_v48 = vld [vmem:[#allocation8 + $0x568] sm:$0xf0] }
 0x13d   :  { %v3584_v45 = vor.u32 %v4065_v39, %v3581_v40  ;;  %v4099_v39 = vld [vmem:[#allocation11 + $0x90] sm:$0xff] }
 0x13e   :  { %2049 = vmatpush.bf16.msra.mxu3 %v3532_v49  ;;  %2038 = vmatpush.bf16.msra.mxu2 %v3292_v3  ;;  %v4085_v49 = vld [vmem:[#allocation11 + $0x20] sm:$0xff]  ;;  %v3560_v3 = vor.u32 %v4059_v47, %v3557_v48 }
 0x13f   :  { %v4097_v48 = vld [vmem:[#allocation11 + $0x80] sm:$0xff] }
 0x140   :  { %2075 = vmatpush.bf16.msrb.mxu1 %v3152_v53  ;;  %2064 = vmatpush.bf16.msrb.mxu0 %v2912_v60  ;;  %v4095_v53 = vld [vmem:[#allocation11 + $0x70] sm:$0xff] }
 0x142   :  { %2050 = vmatpush.bf16.msra.mxu3 %v3508_v63  ;;  %2039 = vmatpush.bf16.msra.mxu2 %v3268_v5  ;;  %v3296_v63 = vor.u32 %v3993_v58, %v3293_v59  ;;  %v3987_v5 = vld [vmem:[#allocation8 + $0x314] sm:$0xf] }
 0x143   :  { %v3272_v10 = vor.u32 %v3987_v5, %v3269_v6  ;;  %v4107_v6 = vld [vmem:[#allocation11 + $0xd0] sm:$0xff] }
 0x144   :  { %2076 = vmatpush.bf16.msrb.mxu1 %v3128_v4  ;;  %2065 = vmatpush.bf16.msrb.mxu0 %v2888_v11  ;;  %v4440_v43 = vpop.f32.mrf.mxu0  ;;  %v4083_v4 = vld [vmem:[#allocation11 + $0x10] sm:$0xff]  ;;  %v4041_v11 = vld [vmem:[#allocation8 + $0x4c4] sm:$0xf] }
 0x145   :  { %2040 = vmatmul.bf16.vlgmr.msra.gmra.mxu2 %v4418_v16  ;;  %v3488_v19 = vor.u32 %v4041_v11, %v3485_v12 }
 0x146   :  { %2084 = vmatpush.bf16.msrb.mxu2 %v3440_v8  ;;  %2051 = vmatpush.bf16.msra.mxu3 %v3484_v14  ;;  %v3512_v8 = vor.u32 %v4047_v0, %v3509_v1  ;;  %v4092_v14 = vld [vmem:[#allocation11 + $0x58] sm:$0xff] }
 0x147   :  { %2066 = vmatmul.bf16.vlgmr.msrb.gmra.mxu0 %v4408_v17  ;;  %v4005_v17 = vld [vmem:[#allocation8 + $0x3a4] sm:$0xf] }
 0x148   :  { %2077 = vmatpush.bf16.msrb.mxu1 %v3104_v18  ;;  %2510 = vmatpush.bf16.msra.mxu0 %v4088_v21  ;;  %v3344_v2 = vor.u32 %v4005_v17, %v3341_v42  ;;  %v3461_v21 = vld [vmem:[#allocation8 + $0x4a8] sm:$0xf0] }
 0x149   :  { %v3464_v25 = vor.u32 %v4035_v20, %v3461_v21 }
 0x14a   :  { %2085 = vmatpush.bf16.msrb.mxu2 %v3416_v22  ;;  %2052 = vmatpush.bf16.msra.mxu3 %v3460_v27  ;;  %v4081_v22 = vld [vmem:[#allocation11] sm:$0xff]  ;;  %v4090_v27 = vld [vmem:[#allocation11 + $0x48] sm:$0xff] }
 0x14c   :  { %2078 = vmatpush.bf16.msrb.mxu1 %v3080_v28  ;;  %2511 = vmatpush.bf16.msra.mxu0 %v4087_v33  ;;  %v4442_v54 = vpop.f32.mrf.mxu1  ;;  %v1809_v60 = vpop.f32.mrf.mxu0  ;;  %v4102_v28 = vld [vmem:[#allocation11 + $0xa8] sm:$0xff] }
 0x14d   :  { %2053 = vmatmul.bf16.vlgmr.msra.gmra.mxu3 %v4421_v46  ;;  %v4109_v60 = vld [vmem:[#allocation11 + $0xe0] sm:$0xff] }
 0x14e   :  { %2097 = vmatpush.bf16.msrb.mxu3 %v3632_v29  ;;  %2086 = vmatpush.bf16.msrb.mxu2 %v3392_v30  ;;  %v4445_v29 = vld [vmem:[#allocation10] sm:$0x3f] }
 0x14f   :  { %2079 = vmatmul.bf16.vlgmr.msrb.gmra.mxu1 %v4411_v36  ;;  %v3320_v36 = vor.u32 %v3999_v51, %v3317_v52  ;;  %v826_v30 = vperm.slane %v4445_v29, 0  ;;  %v828_v1 = vperm.slane %v4445_v29, 2 }
 0x150   :  { %2512 = vmatpush.bf16.msra.mxu0 %v4086_v41  ;;  %2523 = vmatpush.bf16.msra.mxu1 %v4096_v44 }
 0x151   :  { %v1808_v35 = vadd.f32 %v4440_v43, %v826_v30  ;;  %v827_v43 = vperm.slane %v4445_v29, 1  ;;  %v4115_v30 = vld [vmem:[#allocation11 + $0x110] sm:$0xff] }
 0x152   :  { %2098 = vmatpush.bf16.msrb.mxu3 %v3608_v37  ;;  %2087 = vmatpush.bf16.msrb.mxu2 %v3368_v38 }
 0x153   :  { %v1821_v38 = vadd.f32 %v4442_v54, %v1808_v35 }
 0x154   :  { %2513 = vmatpush.bf16.msra.mxu0 %v4085_v49  ;;  %2524 = vmatpush.bf16.msra.mxu1 %v4095_v53  ;;  %v1822_v9 = vpop.f32.mrf.mxu1  ;;  %v1859_v18 = vpop.f32.mrf.mxu0  ;;  %v4112_v49 = vld [vmem:[#allocation11 + $0xf8] sm:$0xff] }
 0x155   :  { %v1860_v54 = vadd.f32 %v1859_v18, %v827_v43  ;;  %v4106_v9 = vld [vmem:[#allocation11 + $0xc8] sm:$0xff] }
 0x156   :  { %2099 = vmatpush.bf16.msrb.mxu3 %v3584_v45  ;;  %2088 = vmatpush.bf16.msrb.mxu2 %v3344_v2  ;;  %v4098_v45 = vld [vmem:[#allocation11 + $0x88] sm:$0xff] }
 0x158   :  { %2514 = vmatpush.bf16.msra.mxu0 %v4084_v57  ;;  %2525 = vmatpush.bf16.msra.mxu1 %v4094_v61 }
 0x15a   :  { %2100 = vmatpush.bf16.msrb.mxu3 %v3560_v3  ;;  %2089 = vmatpush.bf16.msrb.mxu2 %v3320_v36  ;;  %v4111_v3 = vld [vmem:[#allocation11 + $0xf0] sm:$0xff]  ;;  %v4110_v36 = vld [vmem:[#allocation11 + $0xe8] sm:$0xff] }
 0x15c   :  { %2515 = vmatpush.bf16.msra.mxu0 %v4083_v4  ;;  %2526 = vmatpush.bf16.msra.mxu1 %v4093_v7  ;;  %v1872_v26 = vpop.f32.mrf.mxu1  ;;  %v1861_v50 = vpop.f32.mrf.mxu0 }
 0x15d   :  { %v1873_v55 = vadd.f32 %v1872_v26, %v1860_v54  ;;  %v4117_v26 = vld [vmem:[#allocation11 + $0x120] sm:$0xff]  ;;  %v4116_v50 = vld [vmem:[#allocation11 + $0x118] sm:$0xff] }
 0x15e   :  { %2101 = vmatpush.bf16.msrb.mxu3 %v3536_v62  ;;  %2090 = vmatpush.bf16.msrb.mxu2 %v3296_v63  ;;  %v4108_v62 = vld [vmem:[#allocation11 + $0xd8] sm:$0xff] }
 0x160   :  { %2516 = vmatpush.bf16.msra.mxu0 %v4082_v13  ;;  %2527 = vmatpush.bf16.msra.mxu1 %v4092_v14 }
 0x162   :  { %2102 = vmatpush.bf16.msrb.mxu3 %v3512_v8  ;;  %2091 = vmatpush.bf16.msrb.mxu2 %v3272_v10 }
 0x164   :  { %2517 = vmatpush.bf16.msra.mxu0 %v4081_v22  ;;  %2528 = vmatpush.bf16.msra.mxu1 %v4091_v23  ;;  %v1911_v37 = vpop.f32.mrf.mxu0  ;;  %v4119_v23 = vld [vmem:[#allocation11 + $0x130] sm:$0xff] }
 0x165   :  { %2092 = vmatmul.bf16.vlgmr.msrb.gmra.mxu2 %v4418_v16  ;;  %v1874_v16 = vpop.f32.mrf.mxu1  ;;  %v1912_v7 = vadd.f32 %v1911_v37, %v828_v1 }
 0x166   :  { %2536 = vmatpush.bf16.msra.mxu2 %v4104_v15  ;;  %2103 = vmatpush.bf16.msrb.mxu3 %v3488_v19  ;;  %v4105_v15 = vld [vmem:[#allocation11 + $0xc0] sm:$0xff]  ;;  %v4120_v19 = vld [vmem:[#allocation11 + $0x138] sm:$0xff] }
 0x168   :  { %2529 = vmatpush.bf16.msra.mxu1 %v4090_v27  ;;  %v1833_v33 = vpop.f32.mrf.mxu2  ;;  %2562 = vmatpush.bf16.msrb.mxu0 %v4120_v19  ;;  %v4142_v19 = vld [vmem:[%s4468_s6] ss:$0 sm:$0xff] }
 0x169   :  { %v1834_v40 = vadd.f32 %v1833_v33, %v1821_v38  ;;  %v4114_v33 = vld [vmem:[#allocation11 + $0x108] sm:$0xff] }
 0x16a   :  { %2537 = vmatpush.bf16.msra.mxu2 %v4103_v24  ;;  %2104 = vmatpush.bf16.msrb.mxu3 %v3464_v25  ;;  %v4118_v24 = vld [vmem:[#allocation11 + $0x128] sm:$0xff] }
 0x16c   :  { %2530 = vmatpush.bf16.msra.mxu1 %v4089_v31  ;;  %2563 = vmatpush.bf16.msrb.mxu0 %v4119_v23 }
 0x16d   :  { %2105 = vmatmul.bf16.vlgmr.msrb.gmra.mxu3 %v4421_v46  ;;  %v1924_v41 = vpop.f32.mrf.mxu1  ;;  %v1913_v46 = vpop.f32.mrf.mxu0 }
 0x16e   :  { %2538 = vmatpush.bf16.msra.mxu2 %v4102_v28  ;;  %2549 = vmatpush.bf16.msra.mxu3 %v4112_v49  ;;  %v1925_v10 = vadd.f32 %v1924_v41, %v1912_v7  ;;  %v829_v28 = vperm.slane %v4445_v29, 3  ;;  %v4128_v41 = vld [vmem:[#allocation11 + $0x178] sm:$0xff] }
 0x16f   :  { %v4124_v49 = vld [vmem:[#allocation11 + $0x158] sm:$0xff] }
 0x170   :  { %v1846_v17 = vpop.f32.mrf.mxu3  ;;  %v1835_v42 = vpop.f32.mrf.mxu2  ;;  %2564 = vmatpush.bf16.msrb.mxu0 %v4118_v24  ;;  %2575 = vmatpush.bf16.msrb.mxu1 %v4128_v41 }
 0x171   :  { %v1847_v44 = vadd.f32 %v1846_v17, %v1834_v40 }
 0x172   :  { %2539 = vmatpush.bf16.msra.mxu2 %v4101_v32  ;;  %2550 = vmatpush.bf16.msra.mxu3 %v4111_v3 }
 0x173   :  { %v2110_v2 = vmax.f32 %v1847_v44, 0.0 }
 0x174   :  { %2565 = vmatpush.bf16.msrb.mxu0 %v4117_v26 }
 0x175   :  { %v2116_v47 = vpack.c.bf16 %v2110_v2, %v2110_v2  ;;  %v1926_v51 = vpop.f32.mrf.mxu1  ;;  %v4126_v2 = vld [vmem:[#allocation11 + $0x168] sm:$0xff] }
 0x176   :  { %2540 = vmatpush.bf16.msra.mxu2 %v4100_v34  ;;  %2551 = vmatpush.bf16.msra.mxu3 %v4110_v36  ;;  %v830_v51 = vperm.slane %v4445_v29, 4  ;;  %v4122_v36 = vld [vmem:[#allocation11 + $0x148] sm:$0xff] }
 0x177   :  { %2518 = vmatmul.bf16.vlgmr.msra.gmra.mxu0 %v2116_v47 }
 0x178   :  { %v1848_v52 = vpop.f32.mrf.mxu3  ;;  %v1885_v53 = vpop.f32.mrf.mxu2  ;;  %2566 = vmatpush.bf16.msrb.mxu0 %v4116_v50 }
 0x179   :  { %v1886_v56 = vadd.f32 %v1885_v53, %v1873_v55  ;;  %v4123_v52 = vld [vmem:[#allocation11 + $0x150] sm:$0xff] }
 0x17a   :  { %2541 = vmatpush.bf16.msra.mxu2 %v4099_v39  ;;  %2552 = vmatpush.bf16.msra.mxu3 %v4109_v60  ;;  %v4113_v39 = vld [vmem:[#allocation11 + $0x100] sm:$0xff] }
 0x17c   :  { %2567 = vmatpush.bf16.msrb.mxu0 %v4115_v30 }
 0x17e   :  { %2542 = vmatpush.bf16.msra.mxu2 %v4098_v45  ;;  %2553 = vmatpush.bf16.msra.mxu3 %v4108_v62  ;;  %v4127_v45 = vld [vmem:[#allocation11 + $0x170] sm:$0xff] }
 0x17f   :  { %2576 = vmatpush.bf16.msrb.mxu1 %v4127_v45 }
 0x180   :  { %v1898_v57 = vpop.f32.mrf.mxu3  ;;  %v1887_v58 = vpop.f32.mrf.mxu2  ;;  %2568 = vmatpush.bf16.msrb.mxu0 %v4114_v33 }
 0x181   :  { %v1899_v59 = vadd.f32 %v1898_v57, %v1886_v56 }
 0x182   :  { %2543 = vmatpush.bf16.msra.mxu2 %v4097_v48  ;;  %2554 = vmatpush.bf16.msra.mxu3 %v4107_v6  ;;  %v4125_v48 = vld [vmem:[#allocation11 + $0x160] sm:$0xff] }
 0x183   :  { %v2111_v61 = vmax.f32 %v1899_v59, 0.0  ;;  %2577 = vmatpush.bf16.msrb.mxu1 %v4126_v2  ;;  %v4121_v59 = vld [vmem:[#allocation11 + $0x140] sm:$0xff] }
 0x184   :  { %v1963_v0 = vpop.f32.mrf.mxu0  ;;  %2569 = vmatpush.bf16.msrb.mxu0 %v4113_v39 }
 0x185   :  { %v2117_v63 = vpack.c.bf16 %v2111_v61, %v2111_v61  ;;  %v1964_v32 = vadd.f32 %v1963_v0, %v829_v28 }
 0x186   :  { %2555 = vmatpush.bf16.msra.mxu3 %v4106_v9 }
 0x187   :  { %2531 = vmatmul.bf16.vlgmr.msra.gmra.mxu1 %v2117_v63 }
 0x188   :  { %v1900_v4 = vpop.f32.mrf.mxu3  ;;  %v1937_v5 = vpop.f32.mrf.mxu2  ;;  %2578 = vmatpush.bf16.msrb.mxu1 %v4125_v48 }
 0x189   :  { %v1938_v12 = vadd.f32 %v1937_v5, %v1925_v10  ;;  %v831_v4 = vperm.slane %v4445_v29, 5 }
 0x18a   :  { %2556 = vmatpush.bf16.msra.mxu3 %v4105_v15 }
 0x18c   :  { %v1976_v8 = vpop.f32.mrf.mxu1  ;;  %v1965_v11 = vpop.f32.mrf.mxu0  ;;  %2579 = vmatpush.bf16.msrb.mxu1 %v4124_v49 }
 0x18d   :  { %v1977_v34 = vadd.f32 %v1976_v8, %v1964_v32 }
 0x190   :  { %v1950_v13 = vpop.f32.mrf.mxu3  ;;  %v1939_v14 = vpop.f32.mrf.mxu2  ;;  %2580 = vmatpush.bf16.msrb.mxu1 %v4123_v52 }
 0x191   :  { %v1951_v18 = vadd.f32 %v1950_v13, %v1938_v12 }
 0x193   :  { %v2112_v20 = vmax.f32 %v1951_v18, 0.0 }
 0x194   :  { %v1978_v21 = vpop.f32.mrf.mxu1  ;;  %2581 = vmatpush.bf16.msrb.mxu1 %v4122_v36 }
 0x195   :  { %v2118_v22 = vpack.c.bf16 %v2112_v20, %v2112_v20 }
 0x197   :  { %2544 = vmatmul.bf16.vlgmr.msra.gmra.mxu2 %v2118_v22 }
 0x198   :  { %v1952_v25 = vpop.f32.mrf.mxu3  ;;  %2582 = vmatpush.bf16.msrb.mxu1 %v4121_v59 }
 0x1a4   :  { %v2015_v27 = vpop.f32.mrf.mxu0 }
 0x1a5   :  { %v2016_v3 = vadd.f32 %v2015_v27, %v830_v51 }
 0x1a8   :  { %v1989_v31 = vpop.f32.mrf.mxu2 }
 0x1a9   :  { %v1990_v37 = vadd.f32 %v1989_v31, %v1977_v34 }
 0x1ac   :  { %v2028_v16 = vpop.f32.mrf.mxu1  ;;  %v2017_v35 = vpop.f32.mrf.mxu0 }
 0x1ad   :  { %v2029_v55 = vadd.f32 %v2028_v16, %v2016_v3 }
 0x1b0   :  { %v2002_v38 = vpop.f32.mrf.mxu3  ;;  %v1991_v17 = vpop.f32.mrf.mxu2 }
 0x1b1   :  { %v2003_v40 = vadd.f32 %v2002_v38, %v1990_v37 }
 0x1b3   :  { %v2113_v42 = vmax.f32 %v2003_v40, 0.0 }
 0x1b4   :  { %v2030_v46 = vpop.f32.mrf.mxu1 }
 0x1b5   :  { %v2119_v44 = vpack.c.bf16 %v2113_v42, %v2113_v42 }
 0x1b7   :  { %2557 = vmatmul.bf16.vlgmr.msra.gmra.mxu3 %v2119_v44 }
 0x1b8   :  { %v2004_v47 = vpop.f32.mrf.mxu3 }
 0x1c4   :  { %v2067_v43 = vpop.f32.mrf.mxu0 }
 0x1c5   :  { %v2068_v6 = vadd.f32 %v2067_v43, %v831_v4 }
 0x1c8   :  { %v2041_v53 = vpop.f32.mrf.mxu2 }
 0x1c9   :  { %v2042_v57 = vadd.f32 %v2041_v53, %v2029_v55 }
 0x1cc   :  { %v2080_v54 = vpop.f32.mrf.mxu1  ;;  %v2069_v56 = vpop.f32.mrf.mxu0 }
 0x1cd   :  { %v2081_v7 = vadd.f32 %v2080_v54, %v2068_v6 }
 0x1d0   :  { %v2054_v58 = vpop.f32.mrf.mxu3  ;;  %v2043_v61 = vpop.f32.mrf.mxu2 }
 0x1d1   :  { %v2055_v60 = vadd.f32 %v2054_v58, %v2042_v57 }
 0x1d3   :  { %v2114_v62 = vmax.f32 %v2055_v60, 0.0 }
 0x1d4   :  { %v2082_v63 = vpop.f32.mrf.mxu1 }
 0x1d5   :  { %v2120_v0 = vpack.c.bf16 %v2114_v62, %v2114_v62 }
 0x1d7   :  { %2570 = vmatmul.bf16.vlgmr.msrb.gmra.mxu0 %v2120_v0 }
 0x1d8   :  { %v2056_v1 = vpop.f32.mrf.mxu3 }
 0x1e8   :  { %v2093_v5 = vpop.f32.mrf.mxu2 }
 0x1e9   :  { %v2094_v8 = vadd.f32 %v2093_v5, %v2081_v7 }
 0x1f0   :  { %v2106_v9 = vpop.f32.mrf.mxu3  ;;  %v2095_v11 = vpop.f32.mrf.mxu2 }
 0x1f1   :  { %v2107_v10 = vadd.f32 %v2106_v9, %v2094_v8 }
 0x1f3   :  { %v2115_v12 = vmax.f32 %v2107_v10, 0.0 }
 0x1f4   :  { %v2519_v15 = vpop.f32.mrf.mxu0 }
 0x1f5   :  { %v2121_v13 = vpack.c.bf16 %v2115_v12, %v2115_v12  ;;  %v2520_v20 = vadd.f32 %v4142_v19, %v2519_v15 }
 0x1f7   :  { %2583 = vmatmul.bf16.vlgmr.msrb.gmra.mxu1 %v2121_v13 }
 0x1f8   :  { %v2108_v14 = vpop.f32.mrf.mxu3 }
 0x1fc   :  { %v2521_v18 = vpop.f32.mrf.mxu0 }
 0x204   :  { %v2532_v21 = vpop.f32.mrf.mxu1 }
 0x205   :  { %v2533_v29 = vadd.f32 %v2532_v21, %v2520_v20 }
 0x20c   :  { %v2534_v22 = vpop.f32.mrf.mxu1 }
 0x21a   :  { %v2545_v23 = vpop.f32.mrf.mxu2 }
 0x21b   :  { %v2546_v24 = vadd.f32 %v2545_v23, %v2533_v29 }
 0x222   :  { %v2547_v25 = vpop.f32.mrf.mxu2 }
 0x23a   :  { %v2558_v26 = vpop.f32.mrf.mxu3 }
 0x23b   :  { %v2559_v30 = vadd.f32 %v2558_v26, %v2546_v24 }
 0x242   :  { %v2560_v50 = vpop.f32.mrf.mxu3 }
 0x254   :  { %v2571_v27 = vpop.f32.mrf.mxu0 }
 0x255   :  { %v2572_v31 = vadd.f32 %v2571_v27, %v2559_v30 }
 0x25c   :  { %v2573_v28 = vpop.f32.mrf.mxu0 }
 0x274   :  { %v2584_v32 = vpop.f32.mrf.mxu1 }
 0x275   :  { %v2585_v16 = vadd.f32 %v2584_v32, %v2572_v31 }
 0x277   :  { %2588 = vst [vmem:[#allocation13] sm:$0x3] %v2585_v16 }
 0x278   :  { %2599 = dma.vmem_to_hbm [thread:$0]  %s2595_s11, 32, %s2597_s14, [#allocation4]  }
 0x27c   :  { %v2586_v33 = vpop.f32.mrf.mxu1 }
 0x27d   :  { %4319 = dma.done.wait [#allocation4], 32  }
 0x27e   :  { %4320 = vsyncadd [#allocation4], 4294967264 }
 0x27f   :  { %2604 = vsyncpa [#allocation3], 1 }
 0x280   :  { %2605 = vsyncpa [#allocation6], 1 }
 0x281   :  { %2606 = vsyncpa [#allocation9], 1 }
 0x282   :  { %2607 = vsyncpa [#allocation12], 1 }
 0x283   :  { %2608 = vsyncpa [#allocation4], 1 }

</bundles_post_ra>
